<compile_context>
chip_gen: v7x
topology: tpu7x:2x2x1
jax: 0.10.0
libtpu: 0.0.40
codegen_flags: <defaults>
</compile_context>

<pallas_src>
import functools
import numpy as np
import jax
import jax.numpy as jnp
from jax.experimental import pallas as pl
from jax.experimental.pallas import tpu as pltpu

# ----------------------- synthetic config (mirrors GaussianRegressor.__init__) ------------
NUM_FREQS = 6
FREQ_FACTOR = float(np.pi)
INCLUDE_INPUT = True
D_CODE = 3 * 2 * NUM_FREQS + (3 if INCLUDE_INPUT else 0)     # PositionalEncoding d_out = 39
D_LAT3D = 128                                                # cfg.gaussian_renderer._3d_latent
D_LAT2D = 64                                                 # cfg.gaussian_renderer._2d_latent
D_LATENT = D_LAT3D + D_LAT2D                                 # 192
D_HIDDEN = 64                                                # cfg.gaussian_renderer.d_hidden
N_BLOCKS = 4                                                 # cfg.gaussian_renderer.n_blocks
COMBINE_LAYER = 2                                            # cfg.gaussian_renderer.combine_layer
N_Z = min(COMBINE_LAYER, N_BLOCKS)
# beta = 0.0 -> ReLU activation inside ResnetFC (pixelNeRF convention)
MAX_SH_DEGREE = 1
SH_NUM_RGB = ((MAX_SH_DEGREE + 1) ** 2 - 1) * 3              # 9
SPLIT_DIMS = [3, 1, 3, 4, 3, 3, SH_NUM_RGB]                  # xyz, opacity, scale, rot, dc, feat, sh_rest
D_OUT = sum(SPLIT_DIMS)                                      # 26
BETA_SOFTPLUS = 100.0
SCALE_CLAMP_MAX = 0.05


# ----------------------------------- Pallas kernel ----------------------------------------
def _regressor_kernel(pcds_ref, p3d_ref, p2d_ref, code_ref,
                      w_in_ref, b_in_ref,
                      w_z3_ref, w_z2_ref, b_z_ref,
                      w_blk_ref, b_blk_ref,
                      w_out_ref, b_out_ref,
                      w_dec_ref, b_dec_ref,
                      out_ref):
    f32 = jnp.float32
    bf16 = jnp.bfloat16
    relu = lambda t: jnp.maximum(t, 0.0)

    code = code_ref[...]     # (TM, D_CODE)  bf16
    p3d = p3d_ref[...]       # (TM, 128)     bf16
    p2d = p2d_ref[...]       # (TM, 64)      bf16

    # All lin_z projections (blocks 0..COMBINE_LAYER-1, use_spade=False) fused into TWO wide
    # matmuls with N = N_Z*D_HIDDEN = 128 -> half the MXU pushes vs per-block 64-wide matmuls.
    zp = (jnp.dot(p3d, w_z3_ref[...], preferred_element_type=f32)
          + jnp.dot(p2d, w_z2_ref[...], preferred_element_type=f32)
          + b_z_ref[...])                                    # (TM, N_Z*D_HIDDEN) f32

    # ResnetFC: x = lin_in(code) + lin_z[0](z)  (block-0 injection folded in).
    x = (jnp.dot(code, w_in_ref[...], preferred_element_type=f32)
         + b_in_ref[...] + zp[:, 0:D_HIDDEN])

    for blk in range(N_BLOCKS):
        # combine_interleaved at blk == COMBINE_LAYER is a mean over num_views_per_obj == 1
        # -> identity, nothing to do.
        if 0 < blk < COMBINE_LAYER:
            x = x + zp[:, blk * D_HIDDEN:(blk + 1) * D_HIDDEN]
        # ResnetBlockFC: net = fc_0(relu(x)); dx = fc_1(relu(net)); x = x + dx
        net = jnp.dot(relu(x).astype(bf16), w_blk_ref[blk, 0],
                      preferred_element_type=f32) + b_blk_ref[blk, 0]
        dx = jnp.dot(relu(net).astype(bf16), w_blk_ref[blk, 1],
                     preferred_element_type=f32) + b_blk_ref[blk, 1]
        x = x + dx

    latent = jnp.dot(relu(x).astype(bf16), w_out_ref[...],
                     preferred_element_type=f32) + b_out_ref[...]          # (TM, D_OUT) f32

    # GuassianDecoder: Linear(softplus(latent, beta=100))  (kept fully f32 for accuracy)
    t = BETA_SOFTPLUS * latent
    sp = jnp.where(t > 20.0, latent,
                   jnp.log1p(jnp.exp(jnp.minimum(t, 20.0))) / BETA_SOFTPLUS)
    dec = jnp.dot(sp, w_dec_ref[...],
                  preferred_element_type=f32) + b_dec_ref[...]             # (TM, D_OUT) f32

    # Final per-split activations, computed full-tile with lane-index masks, then ONE dense
    # store (avoids narrow sub-128-lane masked stores per split).
    rows = dec.shape[0]
    lane = jax.lax.broadcasted_iota(jnp.int32, (rows, D_OUT), 1)

    pcds_pad = jnp.concatenate(
        [pcds_ref[...], jnp.zeros((rows, D_OUT - 3), f32)], axis=-1)       # pcds in lanes 0..2

    sig = jax.nn.sigmoid(dec)                                              # EUP, full tile
    scl = jnp.minimum(jnp.exp(dec), SCALE_CLAMP_MAX)                       # EUP, full tile

    rot_mask = (lane >= 7) & (lane < 11)
    rot_sq = jnp.where(rot_mask, dec * dec, 0.0)
    rot_norm = jnp.sqrt(jnp.sum(rot_sq, axis=-1, keepdims=True))           # (TM, 1)
    rotn = dec / jnp.maximum(rot_norm, 1e-12)                              # F.normalize eps

    result = jnp.where(lane < 3, dec + pcds_pad,           # xyz residual
             jnp.where(lane == 3, sig,                     # opacity
             jnp.where(lane < 7, scl,                      # scale
             jnp.where(lane < 11, rotn,                    # rotation
                       dec))))                             # dc | feature | sh_rest (raw)
    out_ref[...] = result


def _choose_tm(m):
    """Largest row tile from {2048..128} that divides m; prefer keeping grid >= 2 (v7x)."""
    candidates = (2048, 1024, 512, 256, 128)
    for tm in candidates:
        if m % tm == 0 and m // tm >= 2:
            return tm
    for tm in candidates:
        if m % tm == 0:
            return tm
    return None


def regressor_pallas(params, pcds_flat, p3d, p2d, code_flat):
    M = pcds_flat.shape[0]
    Mp = ((M + 127) // 128) * 128
    if Mp != M:
        pad = Mp - M
        pcds_flat = jnp.pad(pcds_flat, ((0, pad), (0, 0)))
        p3d = jnp.pad(p3d, ((0, pad), (0, 0)))
        p2d = jnp.pad(p2d, ((0, pad), (0, 0)))
        code_flat = jnp.pad(code_flat, ((0, pad), (0, 0)))
    tm = _choose_tm(Mp)
    assert tm is not None

    bf = lambda a: a.astype(jnp.bfloat16)
    w_in = bf(params['w_in'])
    # Fuse the per-block lin_z weights along the output dim: (D_LAT*, N_Z*D_HIDDEN).
    w_z = params['w_z']                                                   # (N_Z, 192, 64)
    w_z3 = bf(jnp.concatenate([w_z[i, :D_LAT3D, :] for i in range(N_Z)], axis=1))
    w_z2 = bf(jnp.concatenate([w_z[i, D_LAT3D:, :] for i in range(N_Z)], axis=1))
    b_z = jnp.concatenate([params['b_z'][i] for i in range(N_Z)], axis=1)  # (1, N_Z*64)
    w_blk = bf(params['w_blk'])
    w_out = bf(params['w_out'])
    # decoder weights stay f32 (tiny K=26 matmul; epilogue is precision-sensitive)
    w_dec = params['w_dec']
    b_in, b_blk, b_out, b_dec = (params['b_in'], params['b_blk'],
                                 params['b_out'], params['b_dec'])

    def full_spec(shape):
        nd = len(shape)
        return pl.BlockSpec(shape, lambda i, nd=nd: (0,) * nd)

    in_specs = [
        pl.BlockSpec((tm, 3), lambda i: (i, 0)),
        pl.BlockSpec((tm, D_LAT3D), lambda i: (i, 0)),
        pl.BlockSpec((tm, D_LAT2D), lambda i: (i, 0)),
        pl.BlockSpec((tm, D_CODE), lambda i: (i, 0)),
        full_spec(w_in.shape), full_spec(b_in.shape),
        full_spec(w_z3.shape), full_spec(w_z2.shape), full_spec(b_z.shape),
        full_spec(w_blk.shape), full_spec(b_blk.shape),
        full_spec(w_out.shape), full_spec(b_out.shape),
        full_spec(w_dec.shape), full_spec(b_dec.shape),
    ]

    macs_per_row = (D_CODE * D_HIDDEN + N_Z * D_LATENT * D_HIDDEN
                    + N_BLOCKS * 2 * D_HIDDEN * D_HIDDEN
                    + D_HIDDEN * D_OUT + D_OUT * D_OUT)
    weight_bytes = (w_in.size + w_z3.size + w_z2.size + w_blk.size + w_out.size) * 2 \
                   + w_dec.size * 4
    cost = pl.CostEstimate(
        flops=2 * Mp * macs_per_row,
        transcendentals=4 * Mp * D_OUT,
        bytes_accessed=Mp * (3 * 4 + (D_CODE + D_LATENT) * 2 + D_OUT * 4) + weight_bytes)

    out = pl.pallas_call(
        _regressor_kernel,
        out_shape=jax.ShapeDtypeStruct((Mp, D_OUT), jnp.float32),
        grid_spec=pltpu.PrefetchScalarGridSpec(
            num_scalar_prefetch=0,
            grid=(Mp // tm,),
            in_specs=in_specs,
            out_specs=pl.BlockSpec((tm, D_OUT), lambda i: (i, 0)),
        ),
        compiler_params=pltpu.CompilerParams(dimension_semantics=("parallel",)),
        cost_estimate=cost,
    )(pcds_flat, p3d, p2d, code_flat,
      w_in, b_in, w_z3, w_z2, b_z, w_blk, b_blk, w_out, b_out, w_dec, b_dec)
    return out[:M]


# -------------------------------- plain-JAX glue -------------------------------------------
def positional_encoding(x):
    """pixelNeRF PositionalEncoding: x (M, 3) -> (M, D_CODE)."""
    freqs = FREQ_FACTOR * (2.0 ** jnp.arange(NUM_FREQS, dtype=jnp.float32))
    freqs2 = jnp.repeat(freqs, 2)                                    # (2F,)
    phases = jnp.zeros((2 * NUM_FREQS,), jnp.float32).at[1::2].set(np.pi * 0.5)
    emb = jnp.sin(x[:, None, :] * freqs2[None, :, None] + phases[None, :, None])
    emb = emb.reshape(x.shape[0], -1)
    if INCLUDE_INPUT:
        emb = jnp.concatenate([x, emb], axis=-1)
    return emb


def grid_sample_3d(vol, grid_xyz):
    """F.grid_sample 5D equivalent: vol (B,C,D,H,W), grid_xyz (B,N,3) in [-1,1] with
    (x,y,z) -> (W,H,D); trilinear, align_corners=True, padding_mode='zeros'. Returns (B,N,C)."""
    B, C, D, H, W = vol.shape
    gx = (grid_xyz[..., 0] + 1.0) * 0.5 * (W - 1)
    gy = (grid_xyz[..., 1] + 1.0) * 0.5 * (H - 1)
    gz = (grid_xyz[..., 2] + 1.0) * 0.5 * (D - 1)
    x0, y0, z0 = jnp.floor(gx), jnp.floor(gy), jnp.floor(gz)
    out = jnp.zeros((B, C, grid_xyz.shape[1]), jnp.float32)
    gather = jax.vmap(lambda v, zz, yy, xx: v[:, zz, yy, xx])
    for dx in (0, 1):
        for dy in (0, 1):
            for dz in (0, 1):
                ix, iy, iz = x0 + dx, y0 + dy, z0 + dz
                wx = (gx - x0) if dx else (1.0 - (gx - x0))
                wy = (gy - y0) if dy else (1.0 - (gy - y0))
                wz = (gz - z0) if dz else (1.0 - (gz - z0))
                w = wx * wy * wz
                valid = ((ix >= 0) & (ix <= W - 1) & (iy >= 0) & (iy <= H - 1)
                         & (iz >= 0) & (iz <= D - 1)).astype(jnp.float32)
                ic = jnp.clip(ix, 0, W - 1).astype(jnp.int32)
                jc = jnp.clip(iy, 0, H - 1).astype(jnp.int32)
                kc = jnp.clip(iz, 0, D - 1).astype(jnp.int32)
                vals = gather(vol, kc, jc, ic)                       # (B, C, N)
                out = out + vals * (w * valid)[:, None, :]
    return jnp.transpose(out, (0, 2, 1))


def sample_in_feature_map(feature_map, project_xy):
    """GaussianEncoder.sample_in_feature_map: feature_map (B,C,H,W), project_xy (B,N,2) in
    pixel coords; bilinear, align_corners=True, padding='zeros'. Returns (B,N,C)."""
    B, C, H, W = feature_map.shape
    xn = project_xy[..., 0] / (W - 1) * 2.0 - 1.0
    yn = project_xy[..., 1] / (H - 1) * 2.0 - 1.0
    gx = (xn + 1.0) * 0.5 * (W - 1)
    gy = (yn + 1.0) * 0.5 * (H - 1)
    x0, y0 = jnp.floor(gx), jnp.floor(gy)
    out = jnp.zeros((B, C, project_xy.shape[1]), jnp.float32)
    gather = jax.vmap(lambda v, yy, xx: v[:, yy, xx])
    for dx in (0, 1):
        for dy in (0, 1):
            ix, iy = x0 + dx, y0 + dy
            wx = (gx - x0) if dx else (1.0 - (gx - x0))
            wy = (gy - y0) if dy else (1.0 - (gy - y0))
            w = wx * wy
            valid = ((ix >= 0) & (ix <= W - 1) & (iy >= 0) & (iy <= H - 1)).astype(jnp.float32)
            ic = jnp.clip(ix, 0, W - 1).astype(jnp.int32)
            jc = jnp.clip(iy, 0, H - 1).astype(jnp.int32)
            vals = gather(feature_map, jc, ic)                       # (B, C, N)
            out = out + vals * (w * valid)[:, None, :]
    return jnp.transpose(out, (0, 2, 1))


def gaussian_regressor_forward(params, pcds, pcds_project_to_image, voxel_feature, image_feature):
    """Full GaussianRegressor.forward. pcds (B,N,3), pcds_project_to_image (B,N,2),
    voxel_feature (B,128,20,20,20), image_feature (B,64,H,W)."""
    B, N, _ = pcds.shape
    pcds_flat = pcds.reshape(-1, 3)
    # bf16 casts fuse into the producing elementwise/gather ops under jit -> bf16 lands in HBM,
    # halving the kernel's input read bytes (matmul operands; f32 accumulation in-kernel).
    code = positional_encoding(pcds_flat).astype(jnp.bfloat16)                   # (M, 39)
    p3d = grid_sample_3d(voxel_feature, pcds * 2.0 - 1.0
                         ).reshape(-1, D_LAT3D).astype(jnp.bfloat16)             # (M, 128)
    p2d = sample_in_feature_map(image_feature, pcds_project_to_image
                                ).reshape(-1, D_LAT2D).astype(jnp.bfloat16)      # (M, 64)

    out = regressor_pallas(params, pcds_flat, p3d, p2d, code).reshape(B, N, D_OUT)

    xyz_maps = out[..., 0:3]
    opacity_maps = out[..., 3:4]
    scale_maps = out[..., 4:7]
    rot_maps = out[..., 7:11]
    features_dc = out[..., 11:14]
    feature_maps = out[..., 14:17]
    features_rest = out[..., 17:].reshape(B, N, -1, 3)
    sh_maps = jnp.concatenate([features_dc[:, :, None, :], features_rest], axis=2)
    return {
        'xyz_maps': xyz_maps,
        'sh_maps': sh_maps,
        'rot_maps': rot_maps,
        'scale_maps': scale_maps,
        'opacity_maps': opacity_maps,
        'feature_maps': feature_maps,
    }


# ------------------------------- deterministic params --------------------------------------
def init_params(key):
    ks = jax.random.split(key, 6)
    nrm = lambda k, shape, s=0.05: s * jax.random.normal(k, shape, jnp.float32)
    return {
        'w_in':  nrm(ks[0], (D_CODE, D_HIDDEN)),
        'b_in':  jnp.zeros((1, D_HIDDEN), jnp.float32),
        'w_z':   nrm(ks[1], (N_Z, D_LATENT, D_HIDDEN)),
        'b_z':   jnp.zeros((N_Z, 1, D_HIDDEN), jnp.float32),
        'w_blk': nrm(ks[2], (N_BLOCKS, 2, D_HIDDEN, D_HIDDEN)),
        'b_blk': jnp.zeros((N_BLOCKS, 2, 1, D_HIDDEN), jnp.float32),
        'w_out': nrm(ks[3], (D_HIDDEN, D_OUT)),
        'b_out': jnp.zeros((1, D_OUT), jnp.float32),
        'w_dec': nrm(ks[4], (D_OUT, D_OUT)),
        'b_dec': nrm(ks[5], (1, D_OUT), 0.1),
    }


if __name__ == "__main__":
    key = jax.random.PRNGKey(0)
    k1, k2, k3, k4, kp = jax.random.split(key, 5)
    B, N = 2, 128
    Hc, Wc = 16, 16
    pcds = jax.random.uniform(k1, (B, N, 3), jnp.float32)        # canonical coords in [0,1]
    pcds_proj = jax.random.uniform(k2, (B, N, 2), jnp.float32) * jnp.array(
        [Wc - 1, Hc - 1], jnp.float32)
    voxel_feature = jax.random.normal(k3, (B, D_LAT3D, 20, 20, 20), jnp.float32)
    image_feature = jax.random.normal(k4, (B, D_LAT2D, Hc, Wc), jnp.float32)
    params = init_params(kp)

    fwd = jax.jit(functools.partial(gaussian_regressor_forward, params))
    out = fwd(pcds, pcds_proj, voxel_feature, image_feature)
    jax.block_until_ready(out)

    assert out['xyz_maps'].shape == (B, N, 3)
    assert out['opacity_maps'].shape == (B, N, 1)
    assert out['scale_maps'].shape == (B, N, 3)
    assert out['rot_maps'].shape == (B, N, 4)
    assert out['sh_maps'].shape == (B, N, (MAX_SH_DEGREE + 1) ** 2, 3)
    assert out['feature_maps'].shape == (B, N, 3)
    assert bool(jnp.all(out['scale_maps'] <= SCALE_CLAMP_MAX + 1e-6))
    assert bool(jnp.all(jnp.isfinite(out['sh_maps'])))
    rot_norm = jnp.linalg.norm(out['rot_maps'], axis=-1)
    assert bool(jnp.all(jnp.abs(rot_norm - 1.0) < 1e-3))
    print("KERNEL_OK")
</pallas_src>

<mosaic_0001>
module attributes {stable_mosaic.version = 11 : i64} {
  func.func @_regressor_kernel(%arg0: i32, %arg1: memref<128x3xf32, #tpu.memory_space<vmem>>, %arg2: memref<128x128xbf16, #tpu.memory_space<vmem>>, %arg3: memref<128x64xbf16, #tpu.memory_space<vmem>>, %arg4: memref<128x39xbf16, #tpu.memory_space<vmem>>, %arg5: memref<39x64xbf16, #tpu.memory_space<vmem>>, %arg6: memref<1x64xf32, #tpu.memory_space<vmem>>, %arg7: memref<128x128xbf16, #tpu.memory_space<vmem>>, %arg8: memref<64x128xbf16, #tpu.memory_space<vmem>>, %arg9: memref<1x128xf32, #tpu.memory_space<vmem>>, %arg10: memref<4x2x64x64xbf16, #tpu.memory_space<vmem>>, %arg11: memref<4x2x1x64xf32, #tpu.memory_space<vmem>>, %arg12: memref<64x26xbf16, #tpu.memory_space<vmem>>, %arg13: memref<1x26xf32, #tpu.memory_space<vmem>>, %arg14: memref<26x26xf32, #tpu.memory_space<vmem>>, %arg15: memref<1x26xf32, #tpu.memory_space<vmem>>, %arg16: memref<128x26xf32, #tpu.memory_space<vmem>>) attributes {dimension_semantics = [#tpu.dimension_semantics<parallel>], iteration_bounds = array<i64: 2>, scalar_prefetch = 0 : i64, scratch_operands = 0 : i64, tpu.core_type = #tpu.core_type<tc>, window_params = [{transform_indices = @transform_0, window_bounds = array<i64: 128, 3>}, {transform_indices = @transform_1, window_bounds = array<i64: 128, 128>}, {transform_indices = @transform_2, window_bounds = array<i64: 128, 64>}, {transform_indices = @transform_3, window_bounds = array<i64: 128, 39>}, {pipeline_mode = #tpu.pipeline_mode<synchronous>, transform_indices = @transform_4, window_bounds = array<i64: 39, 64>}, {pipeline_mode = #tpu.pipeline_mode<synchronous>, transform_indices = @transform_5, window_bounds = array<i64: 1, 64>}, {pipeline_mode = #tpu.pipeline_mode<synchronous>, transform_indices = @transform_6, window_bounds = array<i64: 128, 128>}, {pipeline_mode = #tpu.pipeline_mode<synchronous>, transform_indices = @transform_7, window_bounds = array<i64: 64, 128>}, {pipeline_mode = #tpu.pipeline_mode<synchronous>, transform_indices = @transform_8, window_bounds = array<i64: 1, 128>}, {pipeline_mode = #tpu.pipeline_mode<synchronous>, transform_indices = @transform_9, window_bounds = array<i64: 4, 2, 64, 64>}, {pipeline_mode = #tpu.pipeline_mode<synchronous>, transform_indices = @transform_10, window_bounds = array<i64: 4, 2, 1, 64>}, {pipeline_mode = #tpu.pipeline_mode<synchronous>, transform_indices = @transform_11, window_bounds = array<i64: 64, 26>}, {pipeline_mode = #tpu.pipeline_mode<synchronous>, transform_indices = @transform_12, window_bounds = array<i64: 1, 26>}, {pipeline_mode = #tpu.pipeline_mode<synchronous>, transform_indices = @transform_13, window_bounds = array<i64: 26, 26>}, {pipeline_mode = #tpu.pipeline_mode<synchronous>, transform_indices = @transform_14, window_bounds = array<i64: 1, 26>}, {transform_indices = @transform_15, window_bounds = array<i64: 128, 26>}]} {
    %c0 = arith.constant 0 : index
    %c0_0 = arith.constant 0 : index
    %0 = vector.load %arg4[%c0, %c0_0] : memref<128x39xbf16, #tpu.memory_space<vmem>>, vector<128x39xbf16>
    %c0_1 = arith.constant 0 : index
    %c0_2 = arith.constant 0 : index
    %1 = vector.load %arg2[%c0_1, %c0_2] : memref<128x128xbf16, #tpu.memory_space<vmem>>, vector<128x128xbf16>
    %c0_3 = arith.constant 0 : index
    %c0_4 = arith.constant 0 : index
    %2 = vector.load %arg3[%c0_3, %c0_4] : memref<128x64xbf16, #tpu.memory_space<vmem>>, vector<128x64xbf16>
    %c0_5 = arith.constant 0 : index
    %c0_6 = arith.constant 0 : index
    %3 = vector.load %arg7[%c0_5, %c0_6] : memref<128x128xbf16, #tpu.memory_space<vmem>>, vector<128x128xbf16>
    %cst = arith.constant dense<0.000000e+00> : vector<128x128xf32>
    %4 = tpu.matmul %1, %3, %cst {dimension_numbers = #tpu.dot_dimension_numbers<[1], [0], [0], [1], [0, 0, 1, 1], [], []>} : vector<128x128xbf16>, vector<128x128xbf16>, vector<128x128xf32> -> vector<128x128xf32>
    %c0_7 = arith.constant 0 : index
    %c0_8 = arith.constant 0 : index
    %5 = vector.load %arg8[%c0_7, %c0_8] : memref<64x128xbf16, #tpu.memory_space<vmem>>, vector<64x128xbf16>
    %cst_9 = arith.constant dense<0.000000e+00> : vector<128x128xf32>
    %6 = tpu.matmul %2, %5, %cst_9 {dimension_numbers = #tpu.dot_dimension_numbers<[1], [0], [0], [1], [0, 0, 1, 1], [], []>} : vector<128x64xbf16>, vector<64x128xbf16>, vector<128x128xf32> -> vector<128x128xf32>
    %7 = arith.addf %4, %6 : vector<128x128xf32>
    %c0_10 = arith.constant 0 : index
    %c0_11 = arith.constant 0 : index
    %8 = vector.load %arg9[%c0_10, %c0_11] : memref<1x128xf32, #tpu.memory_space<vmem>>, vector<1x128xf32>
    %9 = vector.broadcast %8 : vector<1x128xf32> to vector<128x128xf32>
    %10 = arith.addf %7, %9 : vector<128x128xf32>
    %c0_12 = arith.constant 0 : index
    %c0_13 = arith.constant 0 : index
    %11 = vector.load %arg5[%c0_12, %c0_13] : memref<39x64xbf16, #tpu.memory_space<vmem>>, vector<39x64xbf16>
    %cst_14 = arith.constant dense<0.000000e+00> : vector<128x64xf32>
    %12 = tpu.matmul %0, %11, %cst_14 {dimension_numbers = #tpu.dot_dimension_numbers<[1], [0], [0], [1], [0, 0, 1, 1], [], []>} : vector<128x39xbf16>, vector<39x64xbf16>, vector<128x64xf32> -> vector<128x64xf32>
    %c0_15 = arith.constant 0 : index
    %c0_16 = arith.constant 0 : index
    %13 = vector.load %arg6[%c0_15, %c0_16] : memref<1x64xf32, #tpu.memory_space<vmem>>, vector<1x64xf32>
    %14 = vector.broadcast %13 : vector<1x64xf32> to vector<128x64xf32>
    %15 = arith.addf %12, %14 : vector<128x64xf32>
    %16 = vector.extract_strided_slice %10 {offsets = [0, 0], sizes = [128, 64], strides = [1, 1]} : vector<128x128xf32> to vector<128x64xf32>
    %17 = arith.addf %15, %16 : vector<128x64xf32>
    %cst_17 = arith.constant 0.000000e+00 : f32
    %18 = vector.broadcast %cst_17 : f32 to vector<128x64xf32>
    %19 = arith.maximumf %17, %18 : vector<128x64xf32>
    %20 = arith.truncf %19 : vector<128x64xf32> to vector<128x64xbf16>
    %c0_18 = arith.constant 0 : index
    %c0_19 = arith.constant 0 : index
    %c0_20 = arith.constant 0 : index
    %c0_21 = arith.constant 0 : index
    %21 = vector.load %arg10[%c0_18, %c0_19, %c0_20, %c0_21] : memref<4x2x64x64xbf16, #tpu.memory_space<vmem>>, vector<1x1x64x64xbf16>
    %22 = vector.shape_cast %21 : vector<1x1x64x64xbf16> to vector<64x64xbf16>
    %cst_22 = arith.constant dense<0.000000e+00> : vector<128x64xf32>
    %23 = tpu.matmul %20, %22, %cst_22 {dimension_numbers = #tpu.dot_dimension_numbers<[1], [0], [0], [1], [0, 0, 1, 1], [], []>} : vector<128x64xbf16>, vector<64x64xbf16>, vector<128x64xf32> -> vector<128x64xf32>
    %c0_23 = arith.constant 0 : index
    %c0_24 = arith.constant 0 : index
    %c0_25 = arith.constant 0 : index
    %c0_26 = arith.constant 0 : index
    %24 = vector.load %arg11[%c0_23, %c0_24, %c0_25, %c0_26] : memref<4x2x1x64xf32, #tpu.memory_space<vmem>>, vector<1x1x1x64xf32>
    %25 = vector.shape_cast %24 : vector<1x1x1x64xf32> to vector<1x64xf32>
    %26 = vector.broadcast %25 : vector<1x64xf32> to vector<128x64xf32>
    %27 = arith.addf %23, %26 : vector<128x64xf32>
    %cst_27 = arith.constant 0.000000e+00 : f32
    %28 = vector.broadcast %cst_27 : f32 to vector<128x64xf32>
    %29 = arith.maximumf %27, %28 : vector<128x64xf32>
    %30 = arith.truncf %29 : vector<128x64xf32> to vector<128x64xbf16>
    %c0_28 = arith.constant 0 : index
    %c1 = arith.constant 1 : index
    %c0_29 = arith.constant 0 : index
    %c0_30 = arith.constant 0 : index
    %31 = vector.load %arg10[%c0_28, %c1, %c0_29, %c0_30] : memref<4x2x64x64xbf16, #tpu.memory_space<vmem>>, vector<1x1x64x64xbf16>
    %32 = vector.shape_cast %31 : vector<1x1x64x64xbf16> to vector<64x64xbf16>
    %cst_31 = arith.constant dense<0.000000e+00> : vector<128x64xf32>
    %33 = tpu.matmul %30, %32, %cst_31 {dimension_numbers = #tpu.dot_dimension_numbers<[1], [0], [0], [1], [0, 0, 1, 1], [], []>} : vector<128x64xbf16>, vector<64x64xbf16>, vector<128x64xf32> -> vector<128x64xf32>
    %c0_32 = arith.constant 0 : index
    %c1_33 = arith.constant 1 : index
    %c0_34 = arith.constant 0 : index
    %c0_35 = arith.constant 0 : index
    %34 = vector.load %arg11[%c0_32, %c1_33, %c0_34, %c0_35] : memref<4x2x1x64xf32, #tpu.memory_space<vmem>>, vector<1x1x1x64xf32>
    %35 = vector.shape_cast %34 : vector<1x1x1x64xf32> to vector<1x64xf32>
    %36 = vector.broadcast %35 : vector<1x64xf32> to vector<128x64xf32>
    %37 = arith.addf %33, %36 : vector<128x64xf32>
    %38 = arith.addf %17, %37 : vector<128x64xf32>
    %39 = vector.extract_strided_slice %10 {offsets = [0, 64], sizes = [128, 64], strides = [1, 1]} : vector<128x128xf32> to vector<128x64xf32>
    %40 = arith.addf %38, %39 : vector<128x64xf32>
    %cst_36 = arith.constant 0.000000e+00 : f32
    %41 = vector.broadcast %cst_36 : f32 to vector<128x64xf32>
    %42 = arith.maximumf %40, %41 : vector<128x64xf32>
    %43 = arith.truncf %42 : vector<128x64xf32> to vector<128x64xbf16>
    %c1_37 = arith.constant 1 : index
    %c0_38 = arith.constant 0 : index
    %c0_39 = arith.constant 0 : index
    %c0_40 = arith.constant 0 : index
    %44 = vector.load %arg10[%c1_37, %c0_38, %c0_39, %c0_40] : memref<4x2x64x64xbf16, #tpu.memory_space<vmem>>, vector<1x1x64x64xbf16>
    %45 = vector.shape_cast %44 : vector<1x1x64x64xbf16> to vector<64x64xbf16>
    %cst_41 = arith.constant dense<0.000000e+00> : vector<128x64xf32>
    %46 = tpu.matmul %43, %45, %cst_41 {dimension_numbers = #tpu.dot_dimension_numbers<[1], [0], [0], [1], [0, 0, 1, 1], [], []>} : vector<128x64xbf16>, vector<64x64xbf16>, vector<128x64xf32> -> vector<128x64xf32>
    %c1_42 = arith.constant 1 : index
    %c0_43 = arith.constant 0 : index
    %c0_44 = arith.constant 0 : index
    %c0_45 = arith.constant 0 : index
    %47 = vector.load %arg11[%c1_42, %c0_43, %c0_44, %c0_45] : memref<4x2x1x64xf32, #tpu.memory_space<vmem>>, vector<1x1x1x64xf32>
    %48 = vector.shape_cast %47 : vector<1x1x1x64xf32> to vector<1x64xf32>
    %49 = vector.broadcast %48 : vector<1x64xf32> to vector<128x64xf32>
    %50 = arith.addf %46, %49 : vector<128x64xf32>
    %cst_46 = arith.constant 0.000000e+00 : f32
    %51 = vector.broadcast %cst_46 : f32 to vector<128x64xf32>
    %52 = arith.maximumf %50, %51 : vector<128x64xf32>
    %53 = arith.truncf %52 : vector<128x64xf32> to vector<128x64xbf16>
    %c1_47 = arith.constant 1 : index
    %c1_48 = arith.constant 1 : index
    %c0_49 = arith.constant 0 : index
    %c0_50 = arith.constant 0 : index
    %54 = vector.load %arg10[%c1_47, %c1_48, %c0_49, %c0_50] : memref<4x2x64x64xbf16, #tpu.memory_space<vmem>>, vector<1x1x64x64xbf16>
    %55 = vector.shape_cast %54 : vector<1x1x64x64xbf16> to vector<64x64xbf16>
    %cst_51 = arith.constant dense<0.000000e+00> : vector<128x64xf32>
    %56 = tpu.matmul %53, %55, %cst_51 {dimension_numbers = #tpu.dot_dimension_numbers<[1], [0], [0], [1], [0, 0, 1, 1], [], []>} : vector<128x64xbf16>, vector<64x64xbf16>, vector<128x64xf32> -> vector<128x64xf32>
    %c1_52 = arith.constant 1 : index
    %c1_53 = arith.constant 1 : index
    %c0_54 = arith.constant 0 : index
    %c0_55 = arith.constant 0 : index
    %57 = vector.load %arg11[%c1_52, %c1_53, %c0_54, %c0_55] : memref<4x2x1x64xf32, #tpu.memory_space<vmem>>, vector<1x1x1x64xf32>
    %58 = vector.shape_cast %57 : vector<1x1x1x64xf32> to vector<1x64xf32>
    %59 = vector.broadcast %58 : vector<1x64xf32> to vector<128x64xf32>
    %60 = arith.addf %56, %59 : vector<128x64xf32>
    %61 = arith.addf %40, %60 : vector<128x64xf32>
    %cst_56 = arith.constant 0.000000e+00 : f32
    %62 = vector.broadcast %cst_56 : f32 to vector<128x64xf32>
    %63 = arith.maximumf %61, %62 : vector<128x64xf32>
    %64 = arith.truncf %63 : vector<128x64xf32> to vector<128x64xbf16>
    %c2 = arith.constant 2 : index
    %c0_57 = arith.constant 0 : index
    %c0_58 = arith.constant 0 : index
    %c0_59 = arith.constant 0 : index
    %65 = vector.load %arg10[%c2, %c0_57, %c0_58, %c0_59] : memref<4x2x64x64xbf16, #tpu.memory_space<vmem>>, vector<1x1x64x64xbf16>
    %66 = vector.shape_cast %65 : vector<1x1x64x64xbf16> to vector<64x64xbf16>
    %cst_60 = arith.constant dense<0.000000e+00> : vector<128x64xf32>
    %67 = tpu.matmul %64, %66, %cst_60 {dimension_numbers = #tpu.dot_dimension_numbers<[1], [0], [0], [1], [0, 0, 1, 1], [], []>} : vector<128x64xbf16>, vector<64x64xbf16>, vector<128x64xf32> -> vector<128x64xf32>
    %c2_61 = arith.constant 2 : index
    %c0_62 = arith.constant 0 : index
    %c0_63 = arith.constant 0 : index
    %c0_64 = arith.constant 0 : index
    %68 = vector.load %arg11[%c2_61, %c0_62, %c0_63, %c0_64] : memref<4x2x1x64xf32, #tpu.memory_space<vmem>>, vector<1x1x1x64xf32>
    %69 = vector.shape_cast %68 : vector<1x1x1x64xf32> to vector<1x64xf32>
    %70 = vector.broadcast %69 : vector<1x64xf32> to vector<128x64xf32>
    %71 = arith.addf %67, %70 : vector<128x64xf32>
    %cst_65 = arith.constant 0.000000e+00 : f32
    %72 = vector.broadcast %cst_65 : f32 to vector<128x64xf32>
    %73 = arith.maximumf %71, %72 : vector<128x64xf32>
    %74 = arith.truncf %73 : vector<128x64xf32> to vector<128x64xbf16>
    %c2_66 = arith.constant 2 : index
    %c1_67 = arith.constant 1 : index
    %c0_68 = arith.constant 0 : index
    %c0_69 = arith.constant 0 : index
    %75 = vector.load %arg10[%c2_66, %c1_67, %c0_68, %c0_69] : memref<4x2x64x64xbf16, #tpu.memory_space<vmem>>, vector<1x1x64x64xbf16>
    %76 = vector.shape_cast %75 : vector<1x1x64x64xbf16> to vector<64x64xbf16>
    %cst_70 = arith.constant dense<0.000000e+00> : vector<128x64xf32>
    %77 = tpu.matmul %74, %76, %cst_70 {dimension_numbers = #tpu.dot_dimension_numbers<[1], [0], [0], [1], [0, 0, 1, 1], [], []>} : vector<128x64xbf16>, vector<64x64xbf16>, vector<128x64xf32> -> vector<128x64xf32>
    %c2_71 = arith.constant 2 : index
    %c1_72 = arith.constant 1 : index
    %c0_73 = arith.constant 0 : index
    %c0_74 = arith.constant 0 : index
    %78 = vector.load %arg11[%c2_71, %c1_72, %c0_73, %c0_74] : memref<4x2x1x64xf32, #tpu.memory_space<vmem>>, vector<1x1x1x64xf32>
    %79 = vector.shape_cast %78 : vector<1x1x1x64xf32> to vector<1x64xf32>
    %80 = vector.broadcast %79 : vector<1x64xf32> to vector<128x64xf32>
    %81 = arith.addf %77, %80 : vector<128x64xf32>
    %82 = arith.addf %61, %81 : vector<128x64xf32>
    %cst_75 = arith.constant 0.000000e+00 : f32
    %83 = vector.broadcast %cst_75 : f32 to vector<128x64xf32>
    %84 = arith.maximumf %82, %83 : vector<128x64xf32>
    %85 = arith.truncf %84 : vector<128x64xf32> to vector<128x64xbf16>
    %c3 = arith.constant 3 : index
    %c0_76 = arith.constant 0 : index
    %c0_77 = arith.constant 0 : index
    %c0_78 = arith.constant 0 : index
    %86 = vector.load %arg10[%c3, %c0_76, %c0_77, %c0_78] : memref<4x2x64x64xbf16, #tpu.memory_space<vmem>>, vector<1x1x64x64xbf16>
    %87 = vector.shape_cast %86 : vector<1x1x64x64xbf16> to vector<64x64xbf16>
    %cst_79 = arith.constant dense<0.000000e+00> : vector<128x64xf32>
    %88 = tpu.matmul %85, %87, %cst_79 {dimension_numbers = #tpu.dot_dimension_numbers<[1], [0], [0], [1], [0, 0, 1, 1], [], []>} : vector<128x64xbf16>, vector<64x64xbf16>, vector<128x64xf32> -> vector<128x64xf32>
    %c3_80 = arith.constant 3 : index
    %c0_81 = arith.constant 0 : index
    %c0_82 = arith.constant 0 : index
    %c0_83 = arith.constant 0 : index
    %89 = vector.load %arg11[%c3_80, %c0_81, %c0_82, %c0_83] : memref<4x2x1x64xf32, #tpu.memory_space<vmem>>, vector<1x1x1x64xf32>
    %90 = vector.shape_cast %89 : vector<1x1x1x64xf32> to vector<1x64xf32>
    %91 = vector.broadcast %90 : vector<1x64xf32> to vector<128x64xf32>
    %92 = arith.addf %88, %91 : vector<128x64xf32>
    %cst_84 = arith.constant 0.000000e+00 : f32
    %93 = vector.broadcast %cst_84 : f32 to vector<128x64xf32>
    %94 = arith.maximumf %92, %93 : vector<128x64xf32>
    %95 = arith.truncf %94 : vector<128x64xf32> to vector<128x64xbf16>
    %c3_85 = arith.constant 3 : index
    %c1_86 = arith.constant 1 : index
    %c0_87 = arith.constant 0 : index
    %c0_88 = arith.constant 0 : index
    %96 = vector.load %arg10[%c3_85, %c1_86, %c0_87, %c0_88] : memref<4x2x64x64xbf16, #tpu.memory_space<vmem>>, vector<1x1x64x64xbf16>
    %97 = vector.shape_cast %96 : vector<1x1x64x64xbf16> to vector<64x64xbf16>
    %cst_89 = arith.constant dense<0.000000e+00> : vector<128x64xf32>
    %98 = tpu.matmul %95, %97, %cst_89 {dimension_numbers = #tpu.dot_dimension_numbers<[1], [0], [0], [1], [0, 0, 1, 1], [], []>} : vector<128x64xbf16>, vector<64x64xbf16>, vector<128x64xf32> -> vector<128x64xf32>
    %c3_90 = arith.constant 3 : index
    %c1_91 = arith.constant 1 : index
    %c0_92 = arith.constant 0 : index
    %c0_93 = arith.constant 0 : index
    %99 = vector.load %arg11[%c3_90, %c1_91, %c0_92, %c0_93] : memref<4x2x1x64xf32, #tpu.memory_space<vmem>>, vector<1x1x1x64xf32>
    %100 = vector.shape_cast %99 : vector<1x1x1x64xf32> to vector<1x64xf32>
    %101 = vector.broadcast %100 : vector<1x64xf32> to vector<128x64xf32>
    %102 = arith.addf %98, %101 : vector<128x64xf32>
    %103 = arith.addf %82, %102 : vector<128x64xf32>
    %cst_94 = arith.constant 0.000000e+00 : f32
    %104 = vector.broadcast %cst_94 : f32 to vector<128x64xf32>
    %105 = arith.maximumf %103, %104 : vector<128x64xf32>
    %106 = arith.truncf %105 : vector<128x64xf32> to vector<128x64xbf16>
    %c0_95 = arith.constant 0 : index
    %c0_96 = arith.constant 0 : index
    %107 = vector.load %arg12[%c0_95, %c0_96] : memref<64x26xbf16, #tpu.memory_space<vmem>>, vector<64x26xbf16>
    %cst_97 = arith.constant dense<0.000000e+00> : vector<128x26xf32>
    %108 = tpu.matmul %106, %107, %cst_97 {dimension_numbers = #tpu.dot_dimension_numbers<[1], [0], [0], [1], [0, 0, 1, 1], [], []>} : vector<128x64xbf16>, vector<64x26xbf16>, vector<128x26xf32> -> vector<128x26xf32>
    %c0_98 = arith.constant 0 : index
    %c0_99 = arith.constant 0 : index
    %109 = vector.load %arg13[%c0_98, %c0_99] : memref<1x26xf32, #tpu.memory_space<vmem>>, vector<1x26xf32>
    %110 = vector.broadcast %109 : vector<1x26xf32> to vector<128x26xf32>
    %111 = arith.addf %108, %110 : vector<128x26xf32>
    %cst_100 = arith.constant 1.000000e+02 : f32
    %112 = vector.broadcast %cst_100 : f32 to vector<128x26xf32>
    %113 = arith.mulf %112, %111 : vector<128x26xf32>
    %cst_101 = arith.constant 2.000000e+01 : f32
    %114 = vector.broadcast %cst_101 : f32 to vector<128x26xf32>
    %115 = arith.cmpf ogt, %113, %114 : vector<128x26xf32>
    %cst_102 = arith.constant 2.000000e+01 : f32
    %116 = vector.broadcast %cst_102 : f32 to vector<128x26xf32>
    %117 = arith.minimumf %113, %116 : vector<128x26xf32>
    %118 = math.exp %117 : vector<128x26xf32>
    %119 = math.log1p %118 : vector<128x26xf32>
    %cst_103 = arith.constant 1.000000e+02 : f32
    %120 = vector.broadcast %cst_103 : f32 to vector<128x26xf32>
    %121 = arith.divf %119, %120 : vector<128x26xf32>
    %122 = arith.select %115, %111, %121 : vector<128x26xi1>, vector<128x26xf32>
    %c0_104 = arith.constant 0 : index
    %c0_105 = arith.constant 0 : index
    %123 = vector.load %arg14[%c0_104, %c0_105] : memref<26x26xf32, #tpu.memory_space<vmem>>, vector<26x26xf32>
    %cst_106 = arith.constant dense<0.000000e+00> : vector<128x26xf32>
    %124 = tpu.matmul %122, %123, %cst_106 {dimension_numbers = #tpu.dot_dimension_numbers<[1], [0], [0], [1], [0, 0, 1, 1], [], []>} : vector<128x26xf32>, vector<26x26xf32>, vector<128x26xf32> -> vector<128x26xf32>
    %c0_107 = arith.constant 0 : index
    %c0_108 = arith.constant 0 : index
    %125 = vector.load %arg15[%c0_107, %c0_108] : memref<1x26xf32, #tpu.memory_space<vmem>>, vector<1x26xf32>
    %126 = vector.broadcast %125 : vector<1x26xf32> to vector<128x26xf32>
    %127 = arith.addf %124, %126 : vector<128x26xf32>
    %128 = tpu.iota {dimensions = array<i32: 1>} : vector<128x26xi32>
    %c0_109 = arith.constant 0 : index
    %c0_110 = arith.constant 0 : index
    %129 = vector.load %arg1[%c0_109, %c0_110] : memref<128x3xf32, #tpu.memory_space<vmem>>, vector<128x3xf32>
    %cst_111 = arith.constant 0.000000e+00 : f32
    %130 = vector.broadcast %cst_111 : f32 to vector<128x23xf32>
    %131 = tpu.concatenate %129, %130 in 1 : vector<128x3xf32>, vector<128x23xf32> -> vector<128x26xf32>
    %132 = arith.negf %127 : vector<128x26xf32>
    %133 = math.exp %132 : vector<128x26xf32>
    %cst_112 = arith.constant 1.000000e+00 : f32
    %134 = vector.broadcast %cst_112 : f32 to vector<128x26xf32>
    %135 = arith.addf %134, %133 : vector<128x26xf32>
    %136 = arith.divf %134, %135 : vector<128x26xf32>
    %137 = math.exp %127 : vector<128x26xf32>
    %cst_113 = arith.constant 5.000000e-02 : f32
    %138 = vector.broadcast %cst_113 : f32 to vector<128x26xf32>
    %139 = arith.minimumf %137, %138 : vector<128x26xf32>
    %c7_i32 = arith.constant 7 : i32
    %140 = vector.broadcast %c7_i32 : i32 to vector<128x26xi32>
    %141 = arith.cmpi sge, %128, %140 : vector<128x26xi32>
    %c11_i32 = arith.constant 11 : i32
    %142 = vector.broadcast %c11_i32 : i32 to vector<128x26xi32>
    %143 = arith.cmpi slt, %128, %142 : vector<128x26xi32>
    %144 = arith.andi %141, %143 : vector<128x26xi1>
    %145 = arith.mulf %127, %127 : vector<128x26xf32>
    %cst_114 = arith.constant 0.000000e+00 : f32
    %146 = vector.broadcast %cst_114 : f32 to vector<128x26xf32>
    %147 = arith.select %144, %145, %146 : vector<128x26xi1>, vector<128x26xf32>
    %cst_115 = arith.constant dense<0.000000e+00> : vector<128xf32>
    %148 = vector.multi_reduction <add>, %147, %cst_115 [1] : vector<128x26xf32> to vector<128xf32>
    %149 = vector.shape_cast %148 : vector<128xf32> to vector<128x1xf32>
    %150 = math.sqrt %149 : vector<128x1xf32>
    %cst_116 = arith.constant 9.99999996E-13 : f32
    %151 = vector.broadcast %cst_116 : f32 to vector<128x1xf32>
    %152 = arith.maximumf %150, %151 : vector<128x1xf32>
    %153 = vector.broadcast %152 : vector<128x1xf32> to vector<128x26xf32>
    %154 = arith.divf %127, %153 : vector<128x26xf32>
    %c3_i32 = arith.constant 3 : i32
    %155 = vector.broadcast %c3_i32 : i32 to vector<128x26xi32>
    %156 = arith.cmpi slt, %128, %155 : vector<128x26xi32>
    %157 = arith.addf %127, %131 : vector<128x26xf32>
    %c3_i32_117 = arith.constant 3 : i32
    %158 = vector.broadcast %c3_i32_117 : i32 to vector<128x26xi32>
    %159 = arith.cmpi eq, %128, %158 : vector<128x26xi32>
    %c7_i32_118 = arith.constant 7 : i32
    %160 = vector.broadcast %c7_i32_118 : i32 to vector<128x26xi32>
    %161 = arith.cmpi slt, %128, %160 : vector<128x26xi32>
    %c11_i32_119 = arith.constant 11 : i32
    %162 = vector.broadcast %c11_i32_119 : i32 to vector<128x26xi32>
    %163 = arith.cmpi slt, %128, %162 : vector<128x26xi32>
    %164 = arith.select %163, %154, %127 : vector<128x26xi1>, vector<128x26xf32>
    %165 = arith.select %161, %139, %164 : vector<128x26xi1>, vector<128x26xf32>
    %166 = arith.select %159, %136, %165 : vector<128x26xi1>, vector<128x26xf32>
    %167 = arith.select %156, %157, %166 : vector<128x26xi1>, vector<128x26xf32>
    %c0_120 = arith.constant 0 : index
    %c0_121 = arith.constant 0 : index
    %168 = vector.load %arg16[%c0_120, %c0_121] : memref<128x26xf32, #tpu.memory_space<vmem>>, vector<128x26xf32>
    tpu.vector_store %arg16[%c0_120, %c0_121], %167 {strides = array<i32>} : memref<128x26xf32, #tpu.memory_space<vmem>>, vector<128x26xf32>,
    return
  }
  func.func @transform_0(%arg0: i32) -> (i32, i32) {
    %c0_i32 = arith.constant 0 : i32
    %c0_i32_0 = arith.constant 0 : i32
    return %arg0, %c0_i32 : i32, i32
  }
  func.func @transform_1(%arg0: i32) -> (i32, i32) {
    %c0_i32 = arith.constant 0 : i32
    %c0_i32_0 = arith.constant 0 : i32
    return %arg0, %c0_i32 : i32, i32
  }
  func.func @transform_2(%arg0: i32) -> (i32, i32) {
    %c0_i32 = arith.constant 0 : i32
    %c0_i32_0 = arith.constant 0 : i32
    return %arg0, %c0_i32 : i32, i32
  }
  func.func @transform_3(%arg0: i32) -> (i32, i32) {
    %c0_i32 = arith.constant 0 : i32
    %c0_i32_0 = arith.constant 0 : i32
    return %arg0, %c0_i32 : i32, i32
  }
  func.func @transform_4(%arg0: i32) -> (i32, i32) {
    %c0_i32 = arith.constant 0 : i32
    %c0_i32_0 = arith.constant 0 : i32
    %c0_i32_1 = arith.constant 0 : i32
    return %c0_i32, %c0_i32_0 : i32, i32
  }
  func.func @transform_5(%arg0: i32) -> (i32, i32) {
    %c0_i32 = arith.constant 0 : i32
    %c0_i32_0 = arith.constant 0 : i32
    %c0_i32_1 = arith.constant 0 : i32
    return %c0_i32, %c0_i32_0 : i32, i32
  }
  func.func @transform_6(%arg0: i32) -> (i32, i32) {
    %c0_i32 = arith.constant 0 : i32
    %c0_i32_0 = arith.constant 0 : i32
    %c0_i32_1 = arith.constant 0 : i32
    return %c0_i32, %c0_i32_0 : i32, i32
  }
  func.func @transform_7(%arg0: i32) -> (i32, i32) {
    %c0_i32 = arith.constant 0 : i32
    %c0_i32_0 = arith.constant 0 : i32
    %c0_i32_1 = arith.constant 0 : i32
    return %c0_i32, %c0_i32_0 : i32, i32
  }
  func.func @transform_8(%arg0: i32) -> (i32, i32) {
    %c0_i32 = arith.constant 0 : i32
    %c0_i32_0 = arith.constant 0 : i32
    %c0_i32_1 = arith.constant 0 : i32
    return %c0_i32, %c0_i32_0 : i32, i32
  }
  func.func @transform_9(%arg0: i32) -> (i32, i32, i32, i32) {
    %c0_i32 = arith.constant 0 : i32
    %c0_i32_0 = arith.constant 0 : i32
    %c0_i32_1 = arith.constant 0 : i32
    %c0_i32_2 = arith.constant 0 : i32
    %c0_i32_3 = arith.constant 0 : i32
    return %c0_i32, %c0_i32_0, %c0_i32_1, %c0_i32_2 : i32, i32, i32, i32
  }
  func.func @transform_10(%arg0: i32) -> (i32, i32, i32, i32) {
    %c0_i32 = arith.constant 0 : i32
    %c0_i32_0 = arith.constant 0 : i32
    %c0_i32_1 = arith.constant 0 : i32
    %c0_i32_2 = arith.constant 0 : i32
    %c0_i32_3 = arith.constant 0 : i32
    return %c0_i32, %c0_i32_0, %c0_i32_1, %c0_i32_2 : i32, i32, i32, i32
  }
  func.func @transform_11(%arg0: i32) -> (i32, i32) {
    %c0_i32 = arith.constant 0 : i32
    %c0_i32_0 = arith.constant 0 : i32
    %c0_i32_1 = arith.constant 0 : i32
    return %c0_i32, %c0_i32_0 : i32, i32
  }
  func.func @transform_12(%arg0: i32) -> (i32, i32) {
    %c0_i32 = arith.constant 0 : i32
    %c0_i32_0 = arith.constant 0 : i32
    %c0_i32_1 = arith.constant 0 : i32
    return %c0_i32, %c0_i32_0 : i32, i32
  }
  func.func @transform_13(%arg0: i32) -> (i32, i32) {
    %c0_i32 = arith.constant 0 : i32
    %c0_i32_0 = arith.constant 0 : i32
    %c0_i32_1 = arith.constant 0 : i32
    return %c0_i32, %c0_i32_0 : i32, i32
  }
  func.func @transform_14(%arg0: i32) -> (i32, i32) {
    %c0_i32 = arith.constant 0 : i32
    %c0_i32_0 = arith.constant 0 : i32
    %c0_i32_1 = arith.constant 0 : i32
    return %c0_i32, %c0_i32_0 : i32, i32
  }
  func.func @transform_15(%arg0: i32) -> (i32, i32) {
    %c0_i32 = arith.constant 0 : i32
    %c0_i32_0 = arith.constant 0 : i32
    return %arg0, %c0_i32 : i32, i32
  }
}

</mosaic_0001>

<bundles_post_ra>
// kernel: mul.14
= control target key start
LH: loop header
LB: loop body
LE: loop exit
PB: predicated region body
PF: predicated region fallthrough
CT: control target
= control target key end

     0   :  { %s56_s0 = inlined_call_operand.vmem [shape: f32[2,128,1], index: 0, kind: input, shape index: {}]   ;;  %s57_s1 = inlined_call_operand.vmem [shape: f32[2,128,1], index: 1, kind: input, shape index: {}]   ;;  %s58_s2 = inlined_call_operand.vmem [shape: f32[2,128,1], index: 2, kind: output, shape index: {}]  }
   0x1   :  { %v3_v0 = vld [vmem:[%s56_s0] sm:$0x1]  ;;  %v20_v2 = vld [vmem:[%s56_s0 + $0x1] sm:$0x1] }
   0x2   :  { %v4_v1 = vld [vmem:[%s57_s1] sm:$0x1]  ;;  %v21_v4 = vld [vmem:[%s57_s1 + $0x1] sm:$0x1] }
   0x3   :  { %v7_v3 = vmul.f32 %v4_v1, %v3_v0  ;;  %v16_v5 = vmul.f32 %v21_v4, %v20_v2 }
   0x5   :  { %9 = vst [vmem:[%s58_s2] sm:$0x1] %v7_v3  ;;  %22 = vst [vmem:[%s58_s2 + $0x1] sm:$0x1] %v16_v5 }

// kernel: mul.110
= control target key start
LH: loop header
LB: loop body
LE: loop exit
PB: predicated region body
PF: predicated region fallthrough
CT: control target
= control target key end

     0   :  { %s51_s10 = smov 10   ;;  %s52_s11 = smov 6   ;;  %vm3_vm0 = vcmask 15360   ;;  %vm9_vm1 = vcmask 97360   ;;  %vm15_vm2 = vcmask 80960   ;;  %vm21_vm3 = vcmask 64560   ;;  %s87_s0 = inlined_call_operand.vmem [shape: f32[6,2], index: 0, kind: input, shape index: {}]   ;;  %s88_s1 = inlined_call_operand.vmem [shape: f32[12], index: 1, kind: output, shape index: {}]  }
   0x1   :  { %v41_v0 = vld [vmem:[%s87_s0 + $0x5] sm:$0x1]   ;;  %v43_v1 = vld [vmem:[%s87_s0 + $0x3] sm:$0x1]   ;;  %v42_v2 = vld [vmem:[%s87_s0 + $0x4] sm:$0x1]  }
   0x2   :  { %7 = vrot.lane.b32.xlu0 %v41_v0, %s51_s10  ;;  %19 = vrot.lane.b32.xlu1 %v43_v1, %s52_s11  ;;  %v44_v3 = vld [vmem:[%s87_s0 + $0x2] sm:$0x1]   ;;  %v2_v4 = vld [vmem:[%s87_s0] sm:$0x1]   ;;  %s53_s18 = smov 8   ;;  %s54_s19 = smov 4  }
   0x3   :  { %4 = vst.msk [vmem:[#allocation0] sm:$0x1] %vm3_vm0, %v2_v4   ;;  %v45_v5 = vld [vmem:[%s87_s0 + $0x1] sm:$0x1]   ;;  %s55_s0 = smov 2   ;;  %vm27_vm4 = vcmask 48160  }
   0x4   :  { %vm33_vm5 = vcmask 31760  }
   0x6   :  { %13 = vrot.lane.b32.xlu0 %v42_v2, %s53_s18  ;;  %25 = vrot.lane.b32.xlu1 %v44_v3, %s54_s19 }
   0xa   :  { %31 = vrot.lane.b32.xlu0 %v45_v5, %s55_s0 }
  0x74   :  { %v8_v6 = vpop.permute.xlu0 %7   ;;  %v20_v7 = vpop.permute.xlu1 %19  }
  0x75   :  { %10 = vst.msk [vmem:[#allocation0] sm:$0x1] %vm9_vm1, %v8_v6  }
  0x78   :  { %v14_v8 = vpop.permute.xlu0 %13   ;;  %v26_v9 = vpop.permute.xlu1 %25  }
  0x79   :  { %16 = vst.msk [vmem:[#allocation0] sm:$0x1] %vm15_vm2, %v14_v8  }
  0x7a   :  { %22 = vst.msk [vmem:[#allocation0] sm:$0x1] %vm21_vm3, %v20_v7  }
  0x7b   :  { %28 = vst.msk [vmem:[#allocation0] sm:$0x1] %vm27_vm4, %v26_v9  }
  0x7c   :  { %v32_v10 = vpop.permute.xlu0 %31  }
  0x7d   :  { %34 = vst.msk [vmem:[#allocation0] sm:$0x1] %vm33_vm5, %v32_v10  }
  0x84   :  { %v38_v11 = vld [vmem:[#allocation0] sm:$0x1] }
  0x85   :  { %40 = vst [vmem:[%s88_s1] sm:$0x1] %v38_v11 }

// kernel: gaussian_regressor_forward.1
= control target key start
LH: loop header
LB: loop body
LE: loop exit
PB: predicated region body
PF: predicated region fallthrough
CT: control target
= control target key end

     0   :  { %s5358_s18 = smov 0   ;;  %s7179_s0 = inlined_call_operand.vmem [shape: f32[256,3], index: 0, kind: input, shape index: {}]   ;;  %s7180_s1 = inlined_call_operand.vmem [shape: bf16[256,128], index: 1, kind: input, shape index: {}]   ;;  %s7181_s2 = inlined_call_operand.vmem [shape: bf16[256,64], index: 2, kind: input, shape index: {}]   ;;  %s7182_s3 = inlined_call_operand.vmem [shape: bf16[256,39], index: 3, kind: input, shape index: {}]   ;;  %s7183_s4 = inlined_call_operand.vmem [shape: bf16[39,64], index: 4, kind: input, shape index: {}]   ;;  %s7184_s5 = inlined_call_operand.vmem [shape: f32[1,64], index: 5, kind: input, shape index: {}]   ;;  %s7185_s6 = inlined_call_operand.vmem [shape: bf16[128,128], index: 6, kind: input, shape index: {}]   ;;  %s7186_s7 = inlined_call_operand.vmem [shape: bf16[64,128], index: 7, kind: input, shape index: {}]   ;;  %s7187_s8 = inlined_call_operand.vmem [shape: f32[1,128], index: 8, kind: input, shape index: {}]   ;;  %s7188_s9 = inlined_call_operand.vmem [shape: bf16[4,2,64,64], index: 9, kind: input, shape index: {}]   ;;  %s7189_s10 = inlined_call_operand.vmem [shape: f32[4,2,1,64], index: 10, kind: input, shape index: {}]   ;;  %s7190_s11 = inlined_call_operand.vmem [shape: bf16[64,26], index: 11, kind: input, shape index: {}]   ;;  %s7191_s12 = inlined_call_operand.vmem [shape: f32[1,26], index: 12, kind: input, shape index: {}]   ;;  %s7192_s13 = inlined_call_operand.vmem [shape: f32[26,26], index: 13, kind: input, shape index: {}]   ;;  %s7193_s14 = inlined_call_operand.vmem [shape: f32[1,26], index: 14, kind: input, shape index: {}]   ;;  %s7194_s15 = inlined_call_operand.vmem [shape: f32[256,26], index: 15, kind: output, shape index: {}]  }
   0x1 LB: > { %s4144_s19 = sadd.s32 4294967295, %s5273_s18   ;;  %p4148_p0 = scmp.ge.s32.totalorder %s5273_s18, 1  ;;  %s5273_s18 = sphi %s5358_s18, %s25_s18  }
   0x2   : > { %p471_p1 = scmp.lt.s32.totalorder %s5273_s18, 3 }
   0x4   : > { %p472_p2 = pnand %p4148_p0, %p471_p1 }
   0x6   : > { %475 = sbr.rel (%p472_p2) target bundleno = 2807 (0xaf7), region = 80 }
   0xd   : > { %v4968_v0 = vld [vmem:[%s7186_s7] sm:$0xff]   ;;  %s4149_s22 = sshll.u32 %s4144_s19, 4  ;;  %v4969_v1 = vld [vmem:[%s7186_s7 + $0x8] sm:$0xff]   ;;  %v4970_v2 = vld [vmem:[%s7186_s7 + $0x10] sm:$0xff]   ;;  %vm701_vm0 = vcmask 523264   ;;  %vm1131_vm1 = vcmask 1042432  }
   0xe   : > { %p535_p3 = scmp.lt.s32.totalorder %s4149_s22, 31  ;;  %4599 = vmatprep.subr.bf16.mxu0 %v4968_v0  ;;  %v4971_v4 = vld [vmem:[%s7186_s7 + $0x18] sm:$0xff]   ;;  %v4974_v5 = vld [vmem:[%s7185_s6] sm:$0xff]   ;;  %v4975_v8 = vld [vmem:[%s7185_s6 + $0x8] sm:$0xff]   ;;  %vm1132_vm2 = vcmask 1043456   ;;  %v5275_v12 = vmov 65535  }
   0xf   : > { %4600 = vmatpush3.bf16.msra.mxu0 %v4968_v0  ;;  %v4978_v9 = vld [vmem:[%s7185_s6 + $0x10] sm:$0xff]   ;;  %v1133_v13 = vsel %vm1131_vm1, 4294967295, %v5275_v12  ;;  %v4990_v14 = vld [vmem:[%s7183_s4] sm:$0xff]   ;;  %v4979_v15 = vld [vmem:[%s7185_s6 + $0x18] sm:$0xff]   ;;  %vm1106_vm3 = vcmask 318464   ;;  %s5276_s23 = smov 64  }
  0x10   : > { %s7249_s22 = smov (!%p535_p3, %s4149_s22), 31  ;;  %4601 = vmatprep.subr.bf16.mxu0 %v4969_v1  ;;  %4935 = vmatprep.subr.bf16.mxu1 %v4990_v14  ;;  %v1134_v16 = vsel %vm1132_vm2, %v1133_v13, 0  ;;  %v4993_v17 = vld [vmem:[%s7183_s4 + $0x8] sm:$0xff]   ;;  %v4994_v18 = vld [vmem:[%s7183_s4 + $0x10] ss:$0 sps:$4 sm:$0xff]   ;;  %v4982_v19 = vld [vmem:[%s7185_s6 + $0x20] sm:$0xff]  }
  0x11   : > { %s5378_s27 = sshll.u32 %s7249_s22, 2  ;;  %4938 = vmatpush3.bf16.msra.mxu1 %v4990_v14  ;;  %v1136_v20 = vand.u32 %v4994_v18, %v1134_v16  ;;  %v4983_v24 = vld [vmem:[%s7185_s6 + $0x28] sm:$0xff]   ;;  %v4986_v27 = vld [vmem:[%s7185_s6 + $0x30] sm:$0xff]   ;;  %v4987_v29 = vld [vmem:[%s7185_s6 + $0x38] sm:$0xff]   ;;  %vm3382_vm4 = vcmask 1041408   ;;  %vm5277_vm5 = vmmov 1  }
  0x12   : > { %s5384_s30 = scalar_lea.vmem %s7181_s2, %s5378_s27  ;;  %s5405_s26 = scalar_lea.vmem %s7180_s1, %s5378_s27  ;;  %4936 = vmatprep.subr.bf16.mxu1 %v4993_v17  ;;  %v5007_v43 = vld [vmem:[%s7188_s9] sm:$0xff]   ;;  %v5008_v44 = vld [vmem:[%s7188_s9 + $0x8] sm:$0xff]   ;;  %v5009_v45 = vld [vmem:[%s7188_s9 + $0x10] sm:$0xff]   ;;  %vm3333_vm9 = vcmask 211968  }
  0x13   : > { %4602 = vmatpush3.bf16.msra.mxu0 %v4969_v1  ;;  %v4972_v3 = vld [vmem:[%s5384_s30] sm:$0xff]   ;;  %v4973_v6 = vld [vmem:[%s5384_s30 + $0x8] sm:$0xff]   ;;  %v4976_v7 = vld [vmem:[%s5384_s30 + $0x10] sm:$0xff]   ;;  %s5422_s24 = scalar_lea.vmem %s7182_s3, %s5378_s27  ;;  %s4150_s29 = sshll.u32 %s7249_s22, 3 }
  0x14   : > { %4603 = vmatprep.subr.bf16.mxu0 %v4970_v2  ;;  %4607 = vmatprep.mubr.msk.bf16.mxu0 %vm701_vm0, %v4972_v3  ;;  %v4977_v10 = vld [vmem:[%s5384_s30 + $0x18] sm:$0xff]   ;;  %v4980_v11 = vld [vmem:[%s5384_s30 + $0x20] sm:$0xff]   ;;  %v4981_v22 = vld [vmem:[%s5384_s30 + $0x28] sm:$0xff]   ;;  %s6621_s17 = scalar_lea.vmem %s7179_s0, %s4150_s29  ;;  %s6799_s19 = scalar_lea.vmem %s7194_s15, %s4150_s29 }
  0x15   : > { %v4996_v21 = vld [vmem:[%s5422_s24 + $0x20] sm:$0xff]   ;;  %4939 = vmatpush3.bf16.msra.mxu1 %v4993_v17  ;;  %v4984_v23 = vld [vmem:[%s5384_s30 + $0x30] sm:$0xff]   ;;  %v4998_v25 = vld [vmem:[%s5422_s24 + $0x28] sm:$0xff]  }
  0x16   : > { %4669 = vmatprep.mubr.msk.bf16.mxu1 %vm1106_vm3, %v4996_v21  ;;  %4937 = vmatprep.subr.bf16.mxu1 %v1136_v20  ;;  %v5000_v26 = vld [vmem:[%s5422_s24 + $0x30] sm:$0xff]   ;;  %v4985_v28 = vld [vmem:[%s5384_s30 + $0x38] sm:$0xff]   ;;  %v4988_v30 = vld [vmem:[%s5405_s26] sm:$0xff]  }
  0x17   : > { %4604 = vmatpush3.bf16.msra.mxu0 %v4970_v2  ;;  %v5002_v31 = vld [vmem:[%s5422_s24 + $0x38] sm:$0xff]   ;;  %v4989_v32 = vld [vmem:[%s5405_s26 + $0x8] sm:$0xff]   ;;  %v4991_v33 = vld [vmem:[%s5405_s26 + $0x10] sm:$0xff]  }
  0x18   : > { %4605 = vmatprep.subr.bf16.mxu0 %v4971_v4  ;;  %v4992_v34 = vld [vmem:[%s5405_s26 + $0x18] sm:$0xff]   ;;  %v4995_v35 = vld [vmem:[%s5405_s26 + $0x20] sm:$0xff]   ;;  %v4997_v36 = vld [vmem:[%s5405_s26 + $0x28] sm:$0xff]  }
  0x19   : > { %4940 = vmatpush3.bf16.msra.mxu1 %v1136_v20  ;;  %v4999_v37 = vld [vmem:[%s5405_s26 + $0x30] sm:$0xff]   ;;  %v5001_v38 = vld [vmem:[%s5405_s26 + $0x38] sm:$0xff]   ;;  %v5003_v39 = vld [vmem:[%s5422_s24] sm:$0xff]  }
  0x1a   : > { %v5004_v40 = vld [vmem:[%s5422_s24 + $0x8] sm:$0xff]   ;;  %v5005_v41 = vld [vmem:[%s5422_s24 + $0x10] sm:$0xff]   ;;  %v5006_v42 = vld [vmem:[%s5422_s24 + $0x18] sm:$0xff]   ;;  %4677 = vmatprep.subr.bf16.mxu1 %v5007_v43 }
  0x1b   : > { %4606 = vmatpush3.bf16.msra.mxu0 %v4971_v4  ;;  %v5010_v46 = vld [vmem:[%s7188_s9 + $0x18] sm:$0xff]   ;;  %v5489_v54 = vld [vmem:[%s7187_s8] ss:$0 sm:$0xff]  ;;  %vm4930_vm6 = vmpackc.low %vm3382_vm4, %vm5277_vm5 }
  0x1c   : > { %4623 = vmatprep.subr.bf16.mxu0 %v4974_v5  ;;  %4670 = vmatmul.mubr.msk.bf16.vlgmr.msra.gmra.mrb[0].mxu1 %vm1106_vm3, %v4998_v25 }
  0x1d   : > { %4673 = vmatprep.mubr.msk.bf16.mxu1 %vm1106_vm3, %v5000_v26  ;;  %4678 = vmatpush3.bf16.msra.mxu1 %v5007_v43 }
  0x1e   : > { %4608 = vmatmul.mubr.msk.bf16.vlgmr.msra.gmra.mrb[0].mxu0 %vm701_vm0, %v4973_v6  ;;  %4679 = vmatprep.subr.bf16.mxu1 %v5008_v44  ;;  %v5522_v6 = vld [vmem:[%s7184_s5] ss:$0 sm:$0xff] }
  0x1f   : > { %4624 = vmatpush3.bf16.msra.mxu0 %v4974_v5  ;;  %4611 = vmatprep.mubr.msk.bf16.mxu0 %vm701_vm0, %v4976_v7 }
  0x20   : > { %4625 = vmatprep.subr.bf16.mxu0 %v4975_v8 }
  0x21   : > { %4680 = vmatpush3.bf16.msra.mxu1 %v5008_v44 }
  0x22   : > { %4681 = vmatprep.subr.bf16.mxu1 %v5009_v45 }
  0x23   : > { %4626 = vmatpush3.bf16.msra.mxu0 %v4975_v8 }
  0x24   : > { %4627 = vmatprep.subr.bf16.mxu0 %v4978_v9  ;;  %4674 = vmatmul.mubr.msk.bf16.gmra.mrb[4].mxu1 %vm1106_vm3, %v5002_v31 }
  0x25   : > { %4682 = vmatpush3.bf16.msra.mxu1 %v5009_v45 }
  0x26   : > { %4612 = vmatmul.mubr.msk.bf16.gmra.mrb[4].mxu0 %vm701_vm0, %v4977_v10  ;;  %4683 = vmatprep.subr.bf16.mxu1 %v5010_v46 }
  0x27   : > { %4628 = vmatpush3.bf16.msra.mxu0 %v4978_v9  ;;  %4615 = vmatprep.mubr.msk.bf16.mxu0 %vm701_vm0, %v4980_v11 }
  0x28   : > { %4629 = vmatprep.subr.bf16.mxu0 %v4979_v15 }
  0x29   : > { %4684 = vmatpush3.bf16.msra.mxu1 %v5010_v46 }
  0x2b   : > { %4630 = vmatpush3.bf16.msra.mxu0 %v4979_v15 }
  0x2c   : > { %4631 = vmatprep.subr.bf16.mxu0 %v4982_v19 }
  0x2e   : > { %4616 = vmatmul.mubr.msk.bf16.gmra.mrb[8].mxu0 %vm701_vm0, %v4981_v22 }
  0x2f   : > { %4632 = vmatpush3.bf16.msra.mxu0 %v4982_v19  ;;  %4619 = vmatprep.mubr.msk.bf16.mxu0 %vm701_vm0, %v4984_v23  ;;  %v5011_v23 = vld [vmem:[%s7188_s9 + $0x20] sm:$0xff]  }
  0x30   : > { %4633 = vmatprep.subr.bf16.mxu0 %v4983_v24  ;;  %4701 = vmatprep.subr.bf16.mxu1 %v5011_v23 }
  0x33   : > { %4634 = vmatpush3.bf16.msra.mxu0 %v4983_v24 }
  0x34   : > { %4635 = vmatprep.subr.bf16.mxu0 %v4986_v27 }
  0x36   : > { %4620 = vmatmul.mubr.msk.bf16.gmra.mrb[12].mxu0 %vm701_vm0, %v4985_v28 }
  0x37   : > { %4636 = vmatpush3.bf16.msra.mxu0 %v4986_v27  ;;  %4639 = vmatprep.mubr.bf16.mxu0 %v4988_v30 }
  0x38   : > { %4637 = vmatprep.subr.bf16.mxu0 %v4987_v29 }
  0x3b   : > { %4638 = vmatpush3.bf16.msra.mxu0 %v4987_v29 }
  0x3c   : > { %4655 = vmatprep.subr.bf16.mxu0 %v4990_v14 }
  0x3e   : > { %4640 = vmatmul.mubr.bf16.vlgmr.msra.gmra.mrb[0].mxu0 %v4989_v32 }
  0x3f   : > { %4656 = vmatpush3.bf16.msra.mxu0 %v4990_v14  ;;  %4643 = vmatprep.mubr.bf16.mxu0 %v4991_v33 }
  0x40   : > { %4657 = vmatprep.subr.bf16.mxu0 %v4993_v17 }
  0x43   : > { %4658 = vmatpush3.bf16.msra.mxu0 %v4993_v17 }
  0x44   : > { %4659 = vmatprep.subr.bf16.mxu0 %v1136_v20 }
  0x46   : > { %4644 = vmatmul.mubr.bf16.gmra.mrb[4].mxu0 %v4992_v34 }
  0x47   : > { %4647 = vmatprep.mubr.bf16.mxu0 %v4995_v35  ;;  %4660 = vmatpush3.bf16.msra.mxu0 %v1136_v20 }
  0x4e   : > { %4648 = vmatmul.mubr.bf16.gmra.mrb[8].mxu0 %v4997_v36 }
  0x4f   : > { %4651 = vmatprep.mubr.bf16.mxu0 %v4999_v37 }
  0x56   : > { %4652 = vmatmul.mubr.bf16.gmra.mrb[12].mxu0 %v5001_v38 }
  0x57   : > { %4661 = vmatprep.mubr.msk.bf16.mxu0 %vm1106_vm3, %v5003_v39 }
  0x5e   : > { %4662 = vmatmul.mubr.msk.bf16.vlgmr.msra.gmra.mrb[16].mxu0 %vm1106_vm3, %v5004_v40 }
  0x5f   : > { %4665 = vmatprep.mubr.msk.bf16.mxu0 %vm1106_vm3, %v5005_v41 }
  0x66   : > { %4666 = vmatmul.mubr.msk.bf16.gmra.mrb[20].mxu0 %vm1106_vm3, %v5006_v42 }
  0xef   : > { %v4671_v47 = vpop.f32.mrb[0].mxu1 }
  0xf0   : > { %v1204_v48 = vpop.f32.mrb[1].mxu1  ;;  %v1213_v8 = vadd.f32 %v4671_v47, %v5522_v6 }
  0xf1   : > { %v4672_v49 = vpop.f32.mrb[2].mxu1  ;;  %v1205_v11 = vadd.f32 %v5522_v6, %v1204_v48 }
  0xf2   : > { %v1207_v50 = vpop.f32.mrb[3].mxu1  ;;  %v1216_v14 = vadd.f32 %v4672_v49, %v5522_v6 }
  0xf3   : > { %v1208_v17 = vadd.f32 %v5522_v6, %v1207_v50 }
  0xf7   : > { %v4675_v51 = vpop.f32.mrb[4].mxu1 }
  0xf8   : > { %v1220_v52 = vpop.f32.mrb[5].mxu1  ;;  %v1229_v26 = vadd.f32 %v4675_v51, %v5522_v6 }
  0xf9   : > { %v4676_v53 = vpop.f32.mrb[6].mxu1  ;;  %v1221_v28 = vadd.f32 %v5522_v6, %v1220_v52 }
  0xfa   : > { %v1223_v55 = vpop.f32.mrb[7].mxu1  ;;  %v1232_v31 = vadd.f32 %v4676_v53, %v5522_v6 }
  0xfb   : > { %v1224_v34 = vadd.f32 %v5522_v6, %v1223_v55 }
 0x111   : > { %v4641_v56 = vpop.f32.mrb[0].mxu0 }
 0x112   : > { %v5492_v57 = vadd.f32 %v4641_v56, %v5489_v54  ;;  %v953_v58 = vpop.f32.mrb[1].mxu0 }
 0x113   : > { %v5495_v59 = vadd.f32 %v5489_v54, %v953_v58  ;;  %v4642_v60 = vpop.f32.mrb[2].mxu0 }
 0x114   : > { %1657 = vrot.lane.b32.xlu1 %v5492_v57, %s5276_s23  ;;  %v956_v61 = vpop.f32.mrb[3].mxu0  ;;  %v5502_v62 = vadd.f32 %v4642_v60, %v5489_v54 }
 0x115   : > { %1653 = vrot.lane.b32.xlu0 %v5495_v59, %s5276_s23  ;;  %v5505_v63 = vadd.f32 %v5489_v54, %v956_v61 }
 0x118   : > { %1659 = vrot.lane.b32.xlu1 %v5502_v62, %s5276_s23 }
 0x119   : > { %1655 = vrot.lane.b32.xlu0 %v5505_v63, %s5276_s23  ;;  %v4645_v0 = vpop.f32.mrb[4].mxu0 }
 0x11a   : > { %v969_v1 = vpop.f32.mrb[5].mxu0  ;;  %v5525_v7 = vadd.f32 %v4645_v0, %v5489_v54 }
 0x11b   : > { %v5512_v2 = vadd.f32 %v5489_v54, %v969_v1  ;;  %v4646_v3 = vpop.f32.mrb[6].mxu0 }
 0x11c   : > { %v972_v4 = vpop.f32.mrb[7].mxu0  ;;  %v5531_v9 = vadd.f32 %v4646_v3, %v5489_v54 }
 0x11d   : > { %v5515_v5 = vadd.f32 %v5489_v54, %v972_v4  ;;  %1661 = vrot.lane.b32.xlu0 %v5512_v2, %s5276_s23 }
 0x11f   : > { %1663 = vrot.lane.b32.xlu1 %v5515_v5, %s5276_s23 }
 0x121   : > { %1665 = vrot.lane.b32.xlu0 %v5525_v7, %s5276_s23  ;;  %v4649_v10 = vpop.f32.mrb[8].mxu0 }
 0x122   : > { %v1033_v12 = vadd.f32 %v4649_v10, %v5489_v54  ;;  %v985_v13 = vpop.f32.mrb[9].mxu0 }
 0x123   : > { %v1031_v15 = vadd.f32 %v5489_v54, %v985_v13  ;;  %1667 = vrot.lane.b32.xlu1 %v5531_v9, %s5276_s23  ;;  %v4650_v16 = vpop.f32.mrb[10].mxu0 }
 0x124   : > { %v5542_v18 = vadd.f32 %v1213_v8, %v1033_v12  ;;  %v1034_v19 = vadd.f32 %v4650_v16, %v5489_v54  ;;  %v988_v20 = vpop.f32.mrb[11].mxu0  ;;  %v5012_v8 = vld [vmem:[%s7188_s9 + $0x28] sm:$0xff]  }
 0x125   : > { %v5545_v21 = vadd.f32 %v1205_v11, %v1031_v15  ;;  %v1032_v22 = vadd.f32 %v5489_v54, %v988_v20  ;;  %1669 = vrot.lane.b32.xlu0 %v1031_v15, %s5276_s23 }
 0x126   : > { %v5552_v24 = vadd.f32 %v1216_v14, %v1034_v19 }
 0x127   : > { %v5554_v25 = vadd.f32 %v1208_v17, %v1032_v22  ;;  %1671 = vrot.lane.b32.xlu1 %v1032_v22, %s5276_s23  ;;  %v1259_v16 = vmax.f32 %v5545_v21, 0.0 }
 0x128   : > { %v1262_v20 = vmax.f32 %v5552_v24, 0.0 }
 0x129   : > { %1673 = vrot.lane.b32.xlu0 %v1033_v12, %s5276_s23  ;;  %v4653_v27 = vpop.f32.mrb[12].mxu0 }
 0x12a   : > { %v1037_v29 = vadd.f32 %v4653_v27, %v5489_v54  ;;  %v1001_v30 = vpop.f32.mrb[13].mxu0 }
 0x12b   : > { %v1035_v32 = vadd.f32 %v5489_v54, %v1001_v30  ;;  %1675 = vrot.lane.b32.xlu1 %v1034_v19, %s5276_s23  ;;  %v4654_v33 = vpop.f32.mrb[14].mxu0 }
 0x12c   : > { %v5565_v35 = vadd.f32 %v1229_v26, %v1037_v29  ;;  %v1038_v36 = vadd.f32 %v4654_v33, %v5489_v54  ;;  %v1004_v37 = vpop.f32.mrb[15].mxu0  ;;  %v5015_v33 = vld [vmem:[%s7188_s9 + $0x40] sm:$0xff]  }
 0x12d   : > { %v5568_v38 = vadd.f32 %v1221_v28, %v1035_v32  ;;  %v1036_v39 = vadd.f32 %v5489_v54, %v1004_v37  ;;  %1677 = vrot.lane.b32.xlu0 %v1035_v32, %s5276_s23  ;;  %v5014_v32 = vld [vmem:[%s7188_s9 + $0x38] sm:$0xff]   ;;  %4725 = vmatprep.subr.bf16.mxu0 %v5015_v33 }
 0x12e   : > { %v5572_v40 = vadd.f32 %v1232_v31, %v1038_v36  ;;  %v1265_v30 = vmax.f32 %v5565_v35, 0.0  ;;  %4726 = vmatpush3.bf16.msra.mxu0 %v5015_v33 }
 0x12f   : > { %v5574_v41 = vadd.f32 %v1224_v34, %v1036_v39  ;;  %1679 = vrot.lane.b32.xlu1 %v1036_v39, %s5276_s23  ;;  %v1263_v26 = vmax.f32 %v5568_v38, 0.0  ;;  %v4216_v34 = vld [vmem:[%s7189_s10] ss:$0 sm:$0xff] }
 0x131   : > { %1681 = vrot.lane.b32.xlu0 %v1037_v29, %s5276_s23  ;;  %v4663_v42 = vpop.f32.mrb[16].mxu0  ;;  %v1264_v22 = vmax.f32 %v5574_v41, 0.0  ;;  %v1266_v29 = vmax.f32 %v5572_v40, 0.0 }
 0x132   : > { %v1181_v43 = vadd.f32 %v4663_v42, %v5522_v6  ;;  %v1172_v44 = vpop.f32.mrb[17].mxu0 }
 0x133   : > { %v1173_v45 = vadd.f32 %v5522_v6, %v1172_v44  ;;  %v4664_v46 = vpop.f32.mrb[18].mxu0  ;;  %1683 = vrot.lane.b32.xlu1 %v1038_v36, %s5276_s23  ;;  %v1273_v28 = vpack.c.bf16 %v1264_v22, %v1263_v26  ;;  %v1274_v31 = vpack.c.bf16 %v1266_v29, %v1265_v30 }
 0x134   : > { %v5582_v47 = vadd.f32 %v1181_v43, %v5492_v57  ;;  %v1184_v48 = vadd.f32 %v4664_v46, %v5522_v6  ;;  %v1175_v49 = vpop.f32.mrb[19].mxu0 }
 0x135   : > { %v5586_v50 = vadd.f32 %v1173_v45, %v5495_v59  ;;  %v1176_v51 = vadd.f32 %v5522_v6, %v1175_v49 }
 0x136   : > { %v5590_v52 = vadd.f32 %v1184_v48, %v5502_v62  ;;  %v1253_v58 = vmax.f32 %v5582_v47, 0.0 }
 0x137   : > { %v5593_v53 = vadd.f32 %v1176_v51, %v5505_v63  ;;  %v1251_v55 = vmax.f32 %v5586_v50, 0.0 }
 0x138   : > { %v1254_v54 = vmax.f32 %v5590_v52, 0.0 }
 0x139   : > { %v1252_v56 = vmax.f32 %v5593_v53, 0.0  ;;  %v4667_v57 = vpop.f32.mrb[20].mxu0 }
 0x13a   : > { %v1197_v59 = vadd.f32 %v4667_v57, %v5522_v6  ;;  %v1188_v60 = vpop.f32.mrb[21].mxu0  ;;  %v1268_v1 = vpack.c.bf16 %v1254_v54, %v1253_v58 }
 0x13b   : > { %v1267_v61 = vpack.c.bf16 %v1252_v56, %v1251_v55  ;;  %v1189_v0 = vadd.f32 %v5522_v6, %v1188_v60  ;;  %v4668_v62 = vpop.f32.mrb[22].mxu0 }
 0x13c   : > { %v5602_v63 = vadd.f32 %v1197_v59, %v5525_v7  ;;  %v1200_v3 = vadd.f32 %v4668_v62, %v5522_v6  ;;  %v1191_v4 = vpop.f32.mrb[23].mxu0 }
 0x13d   : > { %v5609_v10 = vadd.f32 %v1189_v0, %v5512_v2  ;;  %v1192_v11 = vadd.f32 %v5522_v6, %v1191_v4  ;;  %4685 = vmatprep.mubr.msk.bf16.mxu1 %vm701_vm0, %v1267_v61  ;;  %v5013_v2 = vld [vmem:[%s7188_s9 + $0x30] sm:$0xff]   ;;  %v1260_v6 = vmax.f32 %v5554_v25, 0.0 }
 0x13e   : > { %v5614_v12 = vadd.f32 %v1200_v3, %v5531_v9  ;;  %4686 = vmatmul.mubr.msk.bf16.vlgmr.msra.gmra.mrb[8].mxu1 %vm701_vm0, %v1268_v1  ;;  %v1257_v15 = vmax.f32 %v5602_v63, 0.0 }
 0x13f   : > { %v5618_v7 = vadd.f32 %v1192_v11, %v5515_v5  ;;  %4702 = vmatpush3.bf16.msra.mxu1 %v5011_v23  ;;  %v1255_v14 = vmax.f32 %v5609_v10, 0.0  ;;  %v1271_v19 = vpack.c.bf16 %v1260_v6, %v1259_v16  ;;  %v1261_v23 = vmax.f32 %v5542_v18, 0.0 }
 0x140   : > { %v1258_v13 = vmax.f32 %v5614_v12, 0.0  ;;  %4703 = vmatprep.subr.bf16.mxu1 %v5012_v8 }
 0x141   : > { %v1256_v9 = vmax.f32 %v5618_v7, 0.0  ;;  %v1272_v27 = vpack.c.bf16 %v1262_v20, %v1261_v23 }
 0x142   : > { %v1270_v17 = vpack.c.bf16 %v1258_v13, %v1257_v15 }
 0x143   : > { %v1269_v5 = vpack.c.bf16 %v1256_v9, %v1255_v14  ;;  %4704 = vmatpush3.bf16.msra.mxu1 %v5012_v8 }
 0x144   : > { %4705 = vmatprep.subr.bf16.mxu1 %v5013_v2 }
 0x145   : > { %4689 = vmatprep.mubr.msk.bf16.mxu1 %vm701_vm0, %v1269_v5 }
 0x146   : > { %4690 = vmatmul.mubr.msk.bf16.gmra.mrb[12].mxu1 %vm701_vm0, %v1270_v17 }
 0x147   : > { %4693 = vmatprep.mubr.msk.bf16.mxu1 %vm701_vm0, %v1271_v19  ;;  %4706 = vmatpush3.bf16.msra.mxu1 %v5013_v2 }
 0x148   : > { %4707 = vmatprep.subr.bf16.mxu1 %v5014_v32 }
 0x14b   : > { %4708 = vmatpush3.bf16.msra.mxu1 %v5014_v32 }
 0x14e   : > { %4694 = vmatmul.mubr.msk.bf16.gmra.mrb[16].mxu1 %vm701_vm0, %v1272_v27 }
 0x14f   : > { %4697 = vmatprep.mubr.msk.bf16.mxu1 %vm701_vm0, %v1273_v28 }
 0x156   : > { %4698 = vmatmul.mubr.msk.bf16.gmra.mrb[20].mxu1 %vm701_vm0, %v1274_v31 }
 0x211   : > { %v4687_v36 = vpop.f32.mrb[8].mxu1 }
 0x212   : > { %v1381_v37 = vadd.f32 %v4687_v36, %v4216_v34  ;;  %v1372_v39 = vpop.f32.mrb[9].mxu1 }
 0x213   : > { %v1373_v42 = vadd.f32 %v4216_v34, %v1372_v39  ;;  %v4688_v43 = vpop.f32.mrb[10].mxu1 }
 0x214   : > { %v1384_v44 = vadd.f32 %v4688_v43, %v4216_v34  ;;  %v1375_v45 = vpop.f32.mrb[11].mxu1  ;;  %v1437_v48 = vmax.f32 %v1381_v37, 0.0 }
 0x215   : > { %v1376_v46 = vadd.f32 %v4216_v34, %v1375_v45  ;;  %v1435_v51 = vmax.f32 %v1373_v42, 0.0 }
 0x216   : > { %v1438_v49 = vmax.f32 %v1384_v44, 0.0 }
 0x217   : > { %v1436_v54 = vmax.f32 %v1376_v46, 0.0 }
 0x218   : > { %v1452_v55 = vpack.c.bf16 %v1438_v49, %v1437_v48  ;;  %v5016_v49 = vld [vmem:[%s7188_s9 + $0x48] sm:$0xff]  }
 0x219   : > { %v1451_v56 = vpack.c.bf16 %v1436_v54, %v1435_v51  ;;  %v4691_v57 = vpop.f32.mrb[12].mxu1  ;;  %4727 = vmatprep.subr.bf16.mxu0 %v5016_v49  ;;  %v5018_v51 = vld [vmem:[%s7188_s9 + $0x58] sm:$0xff]   ;;  %v5019_v54 = vld [vmem:[%s7188_s9 + $0x60] sm:$0xff]  }
 0x21a   : > { %v1397_v58 = vadd.f32 %v4691_v57, %v4216_v34  ;;  %v1388_v59 = vpop.f32.mrb[13].mxu1  ;;  %4728 = vmatpush3.bf16.msra.mxu0 %v5016_v49  ;;  %4749 = vmatprep.subr.bf16.mxu1 %v5019_v54  ;;  %v1654_v57 = vpop.permute.xlu0 %1653 }
 0x21b   : > { %v1389_v60 = vadd.f32 %v4216_v34, %v1388_v59  ;;  %v4692_v61 = vpop.f32.mrb[14].mxu1  ;;  %4709 = vmatprep.mubr.msk.bf16.mxu1 %vm701_vm0, %v1451_v56  ;;  %v5021_v56 = vld [vmem:[%s7188_s9 + $0x70] sm:$0xff]  }
 0x21c   : > { %v1400_v0 = vadd.f32 %v4692_v61, %v4216_v34  ;;  %v1391_v62 = vpop.f32.mrb[15].mxu1  ;;  %4710 = vmatmul.mubr.msk.bf16.vlgmr.msra.gmra.mrb[24].mxu1 %vm701_vm0, %v1452_v55  ;;  %v1441_v3 = vmax.f32 %v1397_v58, 0.0  ;;  %v5020_v55 = vld [vmem:[%s7188_s9 + $0x68] sm:$0xff]   ;;  %v1658_v58 = vpop.permute.xlu1 %1657  ;;  %v5679_v61 = vld [vmem:[%s7189_s10 + $0x1] ss:$0 sm:$0xff] }
 0x21d   : > { %v1392_v1 = vadd.f32 %v4216_v34, %v1391_v62  ;;  %v1439_v8 = vmax.f32 %v1389_v60, 0.0  ;;  %4750 = vmatpush3.bf16.msra.mxu1 %v5019_v54 }
 0x21e   : > { %v1442_v4 = vmax.f32 %v1400_v0, 0.0  ;;  %4751 = vmatprep.subr.bf16.mxu1 %v5020_v55  ;;  %v1656_v59 = vpop.permute.xlu0 %1655 }
 0x21f   : > { %v1440_v11 = vmax.f32 %v1392_v1, 0.0 }
 0x220   : > { %v1454_v13 = vpack.c.bf16 %v1442_v4, %v1441_v3  ;;  %v1660_v60 = vpop.permute.xlu1 %1659 }
 0x221   : > { %v1453_v2 = vpack.c.bf16 %v1440_v11, %v1439_v8  ;;  %v4695_v6 = vpop.f32.mrb[16].mxu1  ;;  %4752 = vmatpush3.bf16.msra.mxu1 %v5020_v55 }
 0x222   : > { %v1413_v14 = vadd.f32 %v4695_v6, %v4216_v34  ;;  %v1404_v9 = vpop.f32.mrb[17].mxu1  ;;  %4753 = vmatprep.subr.bf16.mxu1 %v5021_v56  ;;  %v1662_v0 = vpop.permute.xlu0 %1661 }
 0x223   : > { %v1405_v15 = vadd.f32 %v4216_v34, %v1404_v9  ;;  %v4696_v16 = vpop.f32.mrb[18].mxu1  ;;  %4713 = vmatprep.mubr.msk.bf16.mxu1 %vm701_vm0, %v1453_v2 }
 0x224   : > { %v1416_v5 = vadd.f32 %v4696_v16, %v4216_v34  ;;  %v1407_v17 = vpop.f32.mrb[19].mxu1  ;;  %4714 = vmatmul.mubr.msk.bf16.gmra.mrb[28].mxu1 %vm701_vm0, %v1454_v13  ;;  %v1445_v20 = vmax.f32 %v1413_v14, 0.0  ;;  %v1664_v62 = vpop.permute.xlu1 %1663 }
 0x225   : > { %v1408_v19 = vadd.f32 %v4216_v34, %v1407_v17  ;;  %v1443_v23 = vmax.f32 %v1405_v15, 0.0  ;;  %4754 = vmatpush3.bf16.msra.mxu1 %v5021_v56 }
 0x226   : > { %v1446_v22 = vmax.f32 %v1416_v5, 0.0  ;;  %v1666_v15 = vpop.permute.xlu0 %1665 }
 0x227   : > { %v1444_v26 = vmax.f32 %v1408_v19, 0.0 }
 0x228   : > { %v1456_v27 = vpack.c.bf16 %v1446_v22, %v1445_v20  ;;  %v1668_v5 = vpop.permute.xlu1 %1667 }
 0x229   : > { %v1455_v28 = vpack.c.bf16 %v1444_v26, %v1443_v23  ;;  %v4699_v29 = vpop.f32.mrb[20].mxu1 }
 0x22a   : > { %v1429_v30 = vadd.f32 %v4699_v29, %v4216_v34  ;;  %v1420_v31 = vpop.f32.mrb[21].mxu1 }
 0x22b   : > { %v1421_v32 = vadd.f32 %v4216_v34, %v1420_v31  ;;  %v4700_v33 = vpop.f32.mrb[22].mxu1  ;;  %4717 = vmatprep.mubr.msk.bf16.mxu1 %vm701_vm0, %v1455_v28 }
 0x22c   : > { %v1432_v36 = vadd.f32 %v4700_v33, %v4216_v34  ;;  %v1423_v37 = vpop.f32.mrb[23].mxu1  ;;  %4718 = vmatmul.mubr.msk.bf16.gmra.mrb[32].mxu1 %vm701_vm0, %v1456_v27  ;;  %v1449_v42 = vmax.f32 %v1429_v30, 0.0 }
 0x22d   : > { %v1424_v39 = vadd.f32 %v4216_v34, %v1423_v37  ;;  %v1447_v44 = vmax.f32 %v1421_v32, 0.0  ;;  %v5017_v34 = vld [vmem:[%s7188_s9 + $0x50] sm:$0xff]   ;;  %v1672_v37 = vpop.permute.xlu1 %1671 }
 0x22e   : > { %v1450_v43 = vmax.f32 %v1432_v36, 0.0  ;;  %4729 = vmatprep.subr.bf16.mxu0 %v5017_v34 }
 0x22f   : > { %v1448_v45 = vmax.f32 %v1424_v39, 0.0  ;;  %4730 = vmatpush3.bf16.msra.mxu0 %v5017_v34 }
 0x230   : > { %v1458_v46 = vpack.c.bf16 %v1450_v43, %v1449_v42  ;;  %4731 = vmatprep.subr.bf16.mxu0 %v5018_v51 }
 0x231   : > { %v1457_v48 = vpack.c.bf16 %v1448_v45, %v1447_v44  ;;  %v1676_v56 = vpop.permute.xlu1 %1675 }
 0x233   : > { %4721 = vmatprep.mubr.msk.bf16.mxu1 %vm701_vm0, %v1457_v48  ;;  %4732 = vmatpush3.bf16.msra.mxu0 %v5018_v51 }
 0x234   : > { %4722 = vmatmul.mubr.msk.bf16.gmra.mrb[36].mxu1 %vm701_vm0, %v1458_v46 }
 0x2ef   : > { %v4711_v1 = vpop.f32.mrb[24].mxu1 }
 0x2f0   : > { %v1567_v3 = vadd.f32 %v4711_v1, %v5679_v61  ;;  %v1558_v4 = vpop.f32.mrb[25].mxu1 }
 0x2f1   : > { %v1559_v8 = vadd.f32 %v5679_v61, %v1558_v4  ;;  %v4712_v11 = vpop.f32.mrb[26].mxu1 }
 0x2f2   : > { %v1623_v13 = vadd.f32 %v1567_v3, %v5582_v47  ;;  %v1570_v2 = vadd.f32 %v4712_v11, %v5679_v61  ;;  %v1561_v6 = vpop.f32.mrb[27].mxu1 }
 0x2f3   : > { %v1621_v14 = vadd.f32 %v1559_v8, %v5586_v50  ;;  %v1562_v9 = vadd.f32 %v5679_v61, %v1561_v6 }
 0x2f4   : > { %v1624_v16 = vadd.f32 %v1570_v2, %v5590_v52  ;;  %v5691_v20 = vadd.f32 %v1658_v58, %v1623_v13 }
 0x2f5   : > { %v5688_v17 = vadd.f32 %v1654_v57, %v1621_v14  ;;  %v1622_v19 = vadd.f32 %v1562_v9, %v5593_v53  ;;  %v1670_v53 = vpop.permute.xlu0 %1669 }
 0x2f6   : > { %v5693_v22 = vadd.f32 %v1660_v60, %v1624_v16  ;;  %v1719_v31 = vmax.f32 %v5691_v20, 0.0 }
 0x2f7   : > { %v5695_v47 = vadd.f32 %v1656_v59, %v1622_v19  ;;  %v4715_v23 = vpop.f32.mrb[28].mxu1  ;;  %v1717_v28 = vmax.f32 %v5688_v17, 0.0 }
 0x2f8   : > { %v1720_v26 = vmax.f32 %v5693_v22, 0.0  ;;  %v1583_v50 = vadd.f32 %v4715_v23, %v5679_v61  ;;  %v1574_v27 = vpop.f32.mrb[29].mxu1 }
 0x2f9   : > { %v1718_v52 = vmax.f32 %v5695_v47, 0.0  ;;  %v1575_v29 = vadd.f32 %v5679_v61, %v1574_v27  ;;  %v4716_v30 = vpop.f32.mrb[30].mxu1  ;;  %v1674_v51 = vpop.permute.xlu0 %1673 }
 0x2fa   : > { %v1627_v32 = vadd.f32 %v1583_v50, %v5602_v63  ;;  %v1586_v33 = vadd.f32 %v4716_v30, %v5679_v61  ;;  %v1577_v36 = vpop.f32.mrb[31].mxu1  ;;  %v1734_v44 = vpack.c.bf16 %v1720_v26, %v1719_v31 }
 0x2fb   : > { %v1625_v39 = vadd.f32 %v1575_v29, %v5609_v10  ;;  %v1578_v42 = vadd.f32 %v5679_v61, %v1577_v36  ;;  %v1733_v43 = vpack.c.bf16 %v1718_v52, %v1717_v28 }
 0x2fc   : > { %v1628_v45 = vadd.f32 %v1586_v33, %v5614_v12  ;;  %v5712_v49 = vadd.f32 %v1666_v15, %v1627_v32 }
 0x2fd   : > { %v5708_v46 = vadd.f32 %v1662_v0, %v1625_v39  ;;  %v1626_v48 = vadd.f32 %v1578_v42, %v5618_v7  ;;  %4733 = vmatprep.mubr.msk.bf16.mxu0 %vm701_vm0, %v1733_v43  ;;  %v1678_v14 = vpop.permute.xlu0 %1677 }
 0x2fe   : > { %v5714_v63 = vadd.f32 %v1668_v5, %v1628_v45  ;;  %4734 = vmatmul.mubr.msk.bf16.vlgmr.msra.gmra.mrb[24].mxu0 %vm701_vm0, %v1734_v44  ;;  %v1723_v60 = vmax.f32 %v5712_v49, 0.0 }
 0x2ff   : > { %v5717_v34 = vadd.f32 %v1664_v62, %v1626_v48  ;;  %v4719_v10 = vpop.f32.mrb[32].mxu1  ;;  %v1721_v7 = vmax.f32 %v5708_v46, 0.0 }
 0x300   : > { %v1724_v54 = vmax.f32 %v5714_v63, 0.0  ;;  %v1599_v12 = vadd.f32 %v4719_v10, %v5679_v61  ;;  %v1590_v55 = vpop.f32.mrb[33].mxu1  ;;  %v5022_v10 = vld [vmem:[%s7188_s9 + $0x78] sm:$0xff]  }
 0x301   : > { %v1722_v57 = vmax.f32 %v5717_v34, 0.0  ;;  %v1591_v58 = vadd.f32 %v5679_v61, %v1590_v55  ;;  %v4720_v59 = vpop.f32.mrb[34].mxu1  ;;  %v1682_v36 = vpop.permute.xlu0 %1681  ;;  %4755 = vmatprep.subr.bf16.mxu1 %v5022_v10  ;;  %v4260_v55 = vld [vmem:[%s7189_s10 + $0x2] ss:$0 sm:$0xff] }
 0x302   : > { %v1631_v0 = vadd.f32 %v1599_v12, %v5542_v18  ;;  %v1602_v62 = vadd.f32 %v4720_v59, %v5679_v61  ;;  %v1593_v1 = vpop.f32.mrb[35].mxu1  ;;  %v1736_v13 = vpack.c.bf16 %v1724_v54, %v1723_v60  ;;  %4756 = vmatpush3.bf16.msra.mxu1 %v5022_v10  ;;  %v5024_v54 = vld [vmem:[%s7188_s9 + $0x88] sm:$0xff]   ;;  %v5025_v12 = vld [vmem:[%s7188_s9 + $0x90] sm:$0xff]  }
 0x303   : > { %v1629_v3 = vadd.f32 %v1591_v58, %v5545_v21  ;;  %v1594_v4 = vadd.f32 %v5679_v61, %v1593_v1  ;;  %v1735_v8 = vpack.c.bf16 %v1722_v57, %v1721_v7  ;;  %v1680_v21 = vpop.permute.xlu1 %1679 }
 0x304   : > { %v1632_v11 = vadd.f32 %v1602_v62, %v5552_v24  ;;  %v5734_v9 = vadd.f32 %v1674_v51, %v1631_v0  ;;  %v5023_v51 = vld [vmem:[%s7188_s9 + $0x80] sm:$0xff]  }
 0x305   : > { %v5730_v2 = vadd.f32 %v1670_v53, %v1629_v3  ;;  %v1630_v6 = vadd.f32 %v1594_v4, %v5554_v25  ;;  %4737 = vmatprep.mubr.msk.bf16.mxu0 %vm701_vm0, %v1735_v8  ;;  %4773 = vmatprep.subr.bf16.mxu0 %v5023_v51 }
 0x306   : > { %v5736_v18 = vadd.f32 %v1676_v56, %v1632_v11  ;;  %4738 = vmatmul.mubr.msk.bf16.gmra.mrb[28].mxu0 %vm701_vm0, %v1736_v13  ;;  %v1727_v27 = vmax.f32 %v5734_v9, 0.0 }
 0x307   : > { %v5739_v15 = vadd.f32 %v1672_v37, %v1630_v6  ;;  %v4723_v16 = vpop.f32.mrb[36].mxu1  ;;  %v1725_v25 = vmax.f32 %v5730_v2, 0.0  ;;  %v1684_v37 = vpop.permute.xlu1 %1683  ;;  %4774 = vmatpush3.bf16.msra.mxu0 %v5023_v51 }
 0x308   : > { %v1728_v24 = vmax.f32 %v5736_v18, 0.0  ;;  %v1615_v5 = vadd.f32 %v4723_v16, %v5679_v61  ;;  %v1606_v19 = vpop.f32.mrb[37].mxu1  ;;  %4775 = vmatprep.subr.bf16.mxu0 %v5024_v54 }
 0x309   : > { %v1726_v23 = vmax.f32 %v5739_v15, 0.0  ;;  %v1607_v26 = vadd.f32 %v5679_v61, %v1606_v19  ;;  %v4724_v50 = vpop.f32.mrb[38].mxu1 }
 0x30a   : > { %v1635_v28 = vadd.f32 %v1615_v5, %v5565_v35  ;;  %v1618_v52 = vadd.f32 %v4724_v50, %v5679_v61  ;;  %v1609_v29 = vpop.f32.mrb[39].mxu1  ;;  %v1738_v33 = vpack.c.bf16 %v1728_v24, %v1727_v27 }
 0x30b   : > { %v1633_v30 = vadd.f32 %v1607_v26, %v5568_v38  ;;  %v1610_v53 = vadd.f32 %v5679_v61, %v1609_v29  ;;  %v1737_v31 = vpack.c.bf16 %v1726_v23, %v1725_v25  ;;  %4776 = vmatpush3.bf16.msra.mxu0 %v5024_v54 }
 0x30c   : > { %v1636_v32 = vadd.f32 %v1618_v52, %v5572_v40  ;;  %v5756_v35 = vadd.f32 %v1682_v36, %v1635_v28  ;;  %4777 = vmatprep.subr.bf16.mxu0 %v5025_v12 }
 0x30d   : > { %v5752_v39 = vadd.f32 %v1678_v14, %v1633_v30  ;;  %v1634_v42 = vadd.f32 %v1610_v53, %v5574_v41  ;;  %4741 = vmatprep.mubr.msk.bf16.mxu0 %vm701_vm0, %v1737_v31 }
 0x30e   : > { %v5758_v43 = vadd.f32 %v1684_v37, %v1636_v32  ;;  %4742 = vmatmul.mubr.msk.bf16.gmra.mrb[32].mxu0 %vm701_vm0, %v1738_v33  ;;  %v1731_v45 = vmax.f32 %v5756_v35, 0.0 }
 0x30f   : > { %v5761_v38 = vadd.f32 %v1680_v21, %v1634_v42  ;;  %v1729_v40 = vmax.f32 %v5752_v39, 0.0  ;;  %4778 = vmatpush3.bf16.msra.mxu0 %v5025_v12 }
 0x310   : > { %v1732_v61 = vmax.f32 %v5758_v43, 0.0 }
 0x311   : > { %v1730_v44 = vmax.f32 %v5761_v38, 0.0 }
 0x312   : > { %v1740_v41 = vpack.c.bf16 %v1732_v61, %v1731_v45 }
 0x313   : > { %v1739_v48 = vpack.c.bf16 %v1730_v44, %v1729_v40 }
 0x315   : > { %4745 = vmatprep.mubr.msk.bf16.mxu0 %vm701_vm0, %v1739_v48 }
 0x316   : > { %4746 = vmatmul.mubr.msk.bf16.gmra.mrb[36].mxu0 %vm701_vm0, %v1740_v41 }
 0x3d1   : > { %v4735_v56 = vpop.f32.mrb[24].mxu0 }
 0x3d2   : > { %v1849_v7 = vadd.f32 %v4735_v56, %v4260_v55  ;;  %v1840_v57 = vpop.f32.mrb[25].mxu0 }
 0x3d3   : > { %v1841_v58 = vadd.f32 %v4260_v55, %v1840_v57  ;;  %v4736_v59 = vpop.f32.mrb[26].mxu0 }
 0x3d4   : > { %v1852_v60 = vadd.f32 %v4736_v59, %v4260_v55  ;;  %v1843_v0 = vpop.f32.mrb[27].mxu0  ;;  %v1905_v1 = vmax.f32 %v1849_v7, 0.0 }
 0x3d5   : > { %v1844_v62 = vadd.f32 %v4260_v55, %v1843_v0  ;;  %v1903_v4 = vmax.f32 %v1841_v58, 0.0 }
 0x3d6   : > { %v1906_v3 = vmax.f32 %v1852_v60, 0.0 }
 0x3d7   : > { %v1904_v8 = vmax.f32 %v1844_v62, 0.0 }
 0x3d8   : > { %v1920_v11 = vpack.c.bf16 %v1906_v3, %v1905_v1  ;;  %v5026_v3 = vld [vmem:[%s7188_s9 + $0x98] sm:$0xff]  }
 0x3d9   : > { %v1919_v13 = vpack.c.bf16 %v1904_v8, %v1903_v4  ;;  %v4739_v6 = vpop.f32.mrb[28].mxu0  ;;  %4779 = vmatprep.subr.bf16.mxu0 %v5026_v3  ;;  %v5028_v4 = vld [vmem:[%s7188_s9 + $0xa8] sm:$0xff]   ;;  %v5029_v8 = vld [vmem:[%s7188_s9 + $0xb0] sm:$0xff]  }
 0x3da   : > { %v1865_v14 = vadd.f32 %v4739_v6, %v4260_v55  ;;  %v1856_v21 = vpop.f32.mrb[29].mxu0  ;;  %4780 = vmatpush3.bf16.msra.mxu0 %v5026_v3 }
 0x3db   : > { %v1857_v16 = vadd.f32 %v4260_v55, %v1856_v21  ;;  %v4740_v24 = vpop.f32.mrb[30].mxu0  ;;  %4757 = vmatprep.mubr.msk.bf16.mxu1 %vm701_vm0, %v1919_v13 }
 0x3dc   : > { %v1868_v5 = vadd.f32 %v4740_v24, %v4260_v55  ;;  %v1859_v19 = vpop.f32.mrb[31].mxu0  ;;  %4758 = vmatmul.mubr.msk.bf16.vlgmr.msra.gmra.mrb[40].mxu1 %vm701_vm0, %v1920_v11  ;;  %v1909_v23 = vmax.f32 %v1865_v14, 0.0  ;;  %v5807_v11 = vld [vmem:[%s7189_s10 + $0x3] ss:$0 sm:$0xff] }
 0x3dd   : > { %v1860_v25 = vadd.f32 %v4260_v55, %v1859_v19  ;;  %v1907_v50 = vmax.f32 %v1857_v16, 0.0 }
 0x3de   : > { %v1910_v26 = vmax.f32 %v1868_v5, 0.0 }
 0x3df   : > { %v1908_v27 = vmax.f32 %v1860_v25, 0.0 }
 0x3e0   : > { %v1922_v28 = vpack.c.bf16 %v1910_v26, %v1909_v23 }
 0x3e1   : > { %v1921_v52 = vpack.c.bf16 %v1908_v27, %v1907_v50  ;;  %v4743_v29 = vpop.f32.mrb[32].mxu0 }
 0x3e2   : > { %v1881_v30 = vadd.f32 %v4743_v29, %v4260_v55  ;;  %v1872_v53 = vpop.f32.mrb[33].mxu0 }
 0x3e3   : > { %v1873_v31 = vadd.f32 %v4260_v55, %v1872_v53  ;;  %v4744_v32 = vpop.f32.mrb[34].mxu0  ;;  %4761 = vmatprep.mubr.msk.bf16.mxu1 %vm701_vm0, %v1921_v52 }
 0x3e4   : > { %v1884_v33 = vadd.f32 %v4744_v32, %v4260_v55  ;;  %v1875_v36 = vpop.f32.mrb[35].mxu0  ;;  %4762 = vmatmul.mubr.msk.bf16.gmra.mrb[44].mxu1 %vm701_vm0, %v1922_v28  ;;  %v1913_v42 = vmax.f32 %v1881_v30, 0.0 }
 0x3e5   : > { %v1876_v37 = vadd.f32 %v4260_v55, %v1875_v36  ;;  %v1911_v40 = vmax.f32 %v1873_v31, 0.0 }
 0x3e6   : > { %v1914_v61 = vmax.f32 %v1884_v33, 0.0 }
 0x3e7   : > { %v1912_v44 = vmax.f32 %v1876_v37, 0.0 }
 0x3e8   : > { %v1924_v45 = vpack.c.bf16 %v1914_v61, %v1913_v42 }
 0x3e9   : > { %v1923_v48 = vpack.c.bf16 %v1912_v44, %v1911_v40  ;;  %v4747_v41 = vpop.f32.mrb[36].mxu0 }
 0x3ea   : > { %v1897_v10 = vadd.f32 %v4747_v41, %v4260_v55  ;;  %v1888_v51 = vpop.f32.mrb[37].mxu0 }
 0x3eb   : > { %v1889_v54 = vadd.f32 %v4260_v55, %v1888_v51  ;;  %v4748_v12 = vpop.f32.mrb[38].mxu0  ;;  %4765 = vmatprep.mubr.msk.bf16.mxu1 %vm701_vm0, %v1923_v48 }
 0x3ec   : > { %v1900_v56 = vadd.f32 %v4748_v12, %v4260_v55  ;;  %v1891_v7 = vpop.f32.mrb[39].mxu0  ;;  %4766 = vmatmul.mubr.msk.bf16.gmra.mrb[48].mxu1 %vm701_vm0, %v1924_v45  ;;  %v1917_v58 = vmax.f32 %v1897_v10, 0.0 }
 0x3ed   : > { %v1892_v57 = vadd.f32 %v4260_v55, %v1891_v7  ;;  %v1915_v60 = vmax.f32 %v1889_v54, 0.0  ;;  %v5027_v55 = vld [vmem:[%s7188_s9 + $0xa0] sm:$0xff]  }
 0x3ee   : > { %v1918_v59 = vmax.f32 %v1900_v56, 0.0  ;;  %4797 = vmatprep.subr.bf16.mxu1 %v5027_v55 }
 0x3ef   : > { %v1916_v0 = vmax.f32 %v1892_v57, 0.0  ;;  %4798 = vmatpush3.bf16.msra.mxu1 %v5027_v55 }
 0x3f0   : > { %v1926_v62 = vpack.c.bf16 %v1918_v59, %v1917_v58  ;;  %4799 = vmatprep.subr.bf16.mxu1 %v5028_v4 }
 0x3f1   : > { %v1925_v1 = vpack.c.bf16 %v1916_v0, %v1915_v60 }
 0x3f3   : > { %4769 = vmatprep.mubr.msk.bf16.mxu1 %vm701_vm0, %v1925_v1  ;;  %4800 = vmatpush3.bf16.msra.mxu1 %v5028_v4 }
 0x3f4   : > { %4770 = vmatmul.mubr.msk.bf16.gmra.mrb[52].mxu1 %vm701_vm0, %v1926_v62  ;;  %4801 = vmatprep.subr.bf16.mxu1 %v5029_v8 }
 0x3f7   : > { %4802 = vmatpush3.bf16.msra.mxu1 %v5029_v8 }
 0x4af   : > { %v4759_v13 = vpop.f32.mrb[40].mxu1 }
 0x4b0   : > { %v2035_v6 = vadd.f32 %v4759_v13, %v5807_v11  ;;  %v2026_v14 = vpop.f32.mrb[41].mxu1 }
 0x4b1   : > { %v2027_v21 = vadd.f32 %v5807_v11, %v2026_v14  ;;  %v4760_v16 = vpop.f32.mrb[42].mxu1 }
 0x4b2   : > { %v2038_v24 = vadd.f32 %v4760_v16, %v5807_v11  ;;  %v2029_v5 = vpop.f32.mrb[43].mxu1  ;;  %v5817_v23 = vadd.f32 %v2035_v6, %v5691_v20 }
 0x4b3   : > { %v5813_v19 = vadd.f32 %v2027_v21, %v5688_v17  ;;  %v2030_v25 = vadd.f32 %v5807_v11, %v2029_v5 }
 0x4b4   : > { %v5820_v26 = vadd.f32 %v2038_v24, %v5693_v22  ;;  %v2107_v17 = vmax.f32 %v5817_v23, 0.0 }
 0x4b5   : > { %v5823_v50 = vadd.f32 %v2030_v25, %v5695_v47  ;;  %v2105_v28 = vmax.f32 %v5813_v19, 0.0 }
 0x4b6   : > { %v2108_v27 = vmax.f32 %v5820_v26, 0.0 }
 0x4b7   : > { %v2106_v52 = vmax.f32 %v5823_v50, 0.0  ;;  %v4763_v29 = vpop.f32.mrb[44].mxu1 }
 0x4b8   : > { %v2051_v30 = vadd.f32 %v4763_v29, %v5807_v11  ;;  %v2042_v53 = vpop.f32.mrb[45].mxu1  ;;  %v2122_v32 = vpack.c.bf16 %v2108_v27, %v2107_v17  ;;  %v5033_v29 = vld [vmem:[%s7188_s9 + $0xd0] sm:$0xff]   ;;  %v4304_v17 = vld [vmem:[%s7189_s10 + $0x4] ss:$0 sm:$0xff] }
 0x4b9   : > { %v2121_v20 = vpack.c.bf16 %v2106_v52, %v2105_v28  ;;  %v2043_v31 = vadd.f32 %v5807_v11, %v2042_v53  ;;  %v4764_v22 = vpop.f32.mrb[46].mxu1 }
 0x4ba   : > { %v2054_v47 = vadd.f32 %v4764_v22, %v5807_v11  ;;  %v2045_v33 = vpop.f32.mrb[47].mxu1  ;;  %v5838_v42 = vadd.f32 %v2051_v30, %v5712_v49 }
 0x4bb   : > { %v5833_v36 = vadd.f32 %v2043_v31, %v5708_v46  ;;  %v2046_v37 = vadd.f32 %v5807_v11, %v2045_v33  ;;  %4781 = vmatprep.mubr.msk.bf16.mxu0 %vm701_vm0, %v2121_v20 }
 0x4bc   : > { %v5841_v61 = vadd.f32 %v2054_v47, %v5714_v63  ;;  %4782 = vmatmul.mubr.msk.bf16.vlgmr.msra.gmra.mrb[40].mxu0 %vm701_vm0, %v2122_v32  ;;  %v2111_v41 = vmax.f32 %v5838_v42, 0.0 }
 0x4bd   : > { %v5845_v40 = vadd.f32 %v2046_v37, %v5717_v34  ;;  %v2109_v46 = vmax.f32 %v5833_v36, 0.0 }
 0x4be   : > { %v2112_v44 = vmax.f32 %v5841_v61, 0.0 }
 0x4bf   : > { %v2110_v45 = vmax.f32 %v5845_v40, 0.0  ;;  %v4767_v48 = vpop.f32.mrb[48].mxu1 }
 0x4c0   : > { %v2067_v49 = vadd.f32 %v4767_v48, %v5807_v11  ;;  %v2058_v10 = vpop.f32.mrb[49].mxu1  ;;  %v2124_v12 = vpack.c.bf16 %v2112_v44, %v2111_v41 }
 0x4c1   : > { %v2123_v51 = vpack.c.bf16 %v2110_v45, %v2109_v46  ;;  %v2059_v63 = vadd.f32 %v5807_v11, %v2058_v10  ;;  %v4768_v54 = vpop.f32.mrb[50].mxu1 }
 0x4c2   : > { %v2070_v34 = vadd.f32 %v4768_v54, %v5807_v11  ;;  %v2061_v56 = vpop.f32.mrb[51].mxu1  ;;  %v5860_v58 = vadd.f32 %v2067_v49, %v5734_v9 }
 0x4c3   : > { %v5855_v7 = vadd.f32 %v2059_v63, %v5730_v2  ;;  %v2062_v57 = vadd.f32 %v5807_v11, %v2061_v56  ;;  %4785 = vmatprep.mubr.msk.bf16.mxu0 %vm701_vm0, %v2123_v51 }
 0x4c4   : > { %v5863_v59 = vadd.f32 %v2070_v34, %v5736_v18  ;;  %4786 = vmatmul.mubr.msk.bf16.gmra.mrb[44].mxu0 %vm701_vm0, %v2124_v12  ;;  %v2115_v3 = vmax.f32 %v5860_v58, 0.0 }
 0x4c5   : > { %v5867_v60 = vadd.f32 %v2062_v57, %v5739_v15  ;;  %v2113_v2 = vmax.f32 %v5855_v7, 0.0 }
 0x4c6   : > { %v2116_v0 = vmax.f32 %v5863_v59, 0.0 }
 0x4c7   : > { %v2114_v62 = vmax.f32 %v5867_v60, 0.0  ;;  %v4771_v1 = vpop.f32.mrb[52].mxu1 }
 0x4c8   : > { %v2083_v9 = vadd.f32 %v4771_v1, %v5807_v11  ;;  %v2074_v55 = vpop.f32.mrb[53].mxu1  ;;  %v2126_v13 = vpack.c.bf16 %v2116_v0, %v2115_v3 }
 0x4c9   : > { %v2125_v4 = vpack.c.bf16 %v2114_v62, %v2113_v2  ;;  %v2075_v18 = vadd.f32 %v5807_v11, %v2074_v55  ;;  %v4772_v8 = vpop.f32.mrb[54].mxu1 }
 0x4ca   : > { %v2086_v15 = vadd.f32 %v4772_v8, %v5807_v11  ;;  %v2077_v6 = vpop.f32.mrb[55].mxu1  ;;  %v5882_v16 = vadd.f32 %v2083_v9, %v5756_v35  ;;  %v5030_v35 = vld [vmem:[%s7188_s9 + $0xb8] sm:$0xff]  }
 0x4cb   : > { %v5877_v14 = vadd.f32 %v2075_v18, %v5752_v39  ;;  %v2078_v21 = vadd.f32 %v5807_v11, %v2077_v6  ;;  %4789 = vmatprep.mubr.msk.bf16.mxu0 %vm701_vm0, %v2125_v4  ;;  %4803 = vmatprep.subr.bf16.mxu1 %v5030_v35 }
 0x4cc   : > { %v5885_v24 = vadd.f32 %v2086_v15, %v5758_v43  ;;  %4790 = vmatmul.mubr.msk.bf16.gmra.mrb[48].mxu0 %vm701_vm0, %v2126_v13  ;;  %v2119_v11 = vmax.f32 %v5882_v16, 0.0  ;;  %4804 = vmatpush3.bf16.msra.mxu1 %v5030_v35  ;;  %v5031_v43 = vld [vmem:[%s7188_s9 + $0xc0] sm:$0xff]  }
 0x4cd   : > { %v5889_v5 = vadd.f32 %v2078_v21, %v5761_v38  ;;  %v2117_v39 = vmax.f32 %v5877_v14, 0.0  ;;  %v5032_v38 = vld [vmem:[%s7188_s9 + $0xc8] sm:$0xff]   ;;  %4821 = vmatprep.subr.bf16.mxu0 %v5031_v43 }
 0x4ce   : > { %v2120_v25 = vmax.f32 %v5885_v24, 0.0  ;;  %4822 = vmatpush3.bf16.msra.mxu0 %v5031_v43 }
 0x4cf   : > { %v2118_v27 = vmax.f32 %v5889_v5, 0.0  ;;  %4823 = vmatprep.subr.bf16.mxu0 %v5032_v38 }
 0x4d0   : > { %v2128_v52 = vpack.c.bf16 %v2120_v25, %v2119_v11 }
 0x4d1   : > { %v2127_v28 = vpack.c.bf16 %v2118_v27, %v2117_v39 }
 0x4d2   : > { %4824 = vmatpush3.bf16.msra.mxu0 %v5032_v38 }
 0x4d3   : > { %4793 = vmatprep.mubr.msk.bf16.mxu0 %vm701_vm0, %v2127_v28  ;;  %4825 = vmatprep.subr.bf16.mxu0 %v5033_v29 }
 0x4d4   : > { %4794 = vmatmul.mubr.msk.bf16.gmra.mrb[52].mxu0 %vm701_vm0, %v2128_v52 }
 0x4d6   : > { %4826 = vmatpush3.bf16.msra.mxu0 %v5033_v29 }
 0x58f   : > { %v4783_v30 = vpop.f32.mrb[40].mxu0 }
 0x590   : > { %v2237_v53 = vadd.f32 %v4783_v30, %v4304_v17  ;;  %v2228_v20 = vpop.f32.mrb[41].mxu0 }
 0x591   : > { %v2229_v31 = vadd.f32 %v4304_v17, %v2228_v20  ;;  %v4784_v22 = vpop.f32.mrb[42].mxu0 }
 0x592   : > { %v2240_v32 = vadd.f32 %v4784_v22, %v4304_v17  ;;  %v2231_v47 = vpop.f32.mrb[43].mxu0  ;;  %v2293_v37 = vmax.f32 %v2237_v53, 0.0 }
 0x593   : > { %v2232_v33 = vadd.f32 %v4304_v17, %v2231_v47  ;;  %v2291_v46 = vmax.f32 %v2229_v31, 0.0 }
 0x594   : > { %v2294_v44 = vmax.f32 %v2240_v32, 0.0 }
 0x595   : > { %v2292_v45 = vmax.f32 %v2232_v33, 0.0 }
 0x596   : > { %v2308_v48 = vpack.c.bf16 %v2294_v44, %v2293_v37  ;;  %v5034_v44 = vld [vmem:[%s7188_s9 + $0xd8] sm:$0xff]  }
 0x597   : > { %v2307_v41 = vpack.c.bf16 %v2292_v45, %v2291_v46  ;;  %v4787_v49 = vpop.f32.mrb[44].mxu0  ;;  %4827 = vmatprep.subr.bf16.mxu0 %v5034_v44  ;;  %v5036_v46 = vld [vmem:[%s7188_s9 + $0xe8] sm:$0xff]   ;;  %v5037_v45 = vld [vmem:[%s7188_s9 + $0xf0] sm:$0xff]  }
 0x598   : > { %v2253_v10 = vadd.f32 %v4787_v49, %v4304_v17  ;;  %v2244_v51 = vpop.f32.mrb[45].mxu0  ;;  %4828 = vmatpush3.bf16.msra.mxu0 %v5034_v44 }
 0x599   : > { %v2245_v63 = vadd.f32 %v4304_v17, %v2244_v51  ;;  %v4788_v54 = vpop.f32.mrb[46].mxu0  ;;  %4805 = vmatprep.mubr.msk.bf16.mxu1 %vm701_vm0, %v2307_v41 }
 0x59a   : > { %v2256_v12 = vadd.f32 %v4788_v54, %v4304_v17  ;;  %v2247_v34 = vpop.f32.mrb[47].mxu0  ;;  %4806 = vmatmul.mubr.msk.bf16.vlgmr.msra.gmra.mrb[56].mxu1 %vm701_vm0, %v2308_v48  ;;  %v2297_v57 = vmax.f32 %v2253_v10, 0.0  ;;  %v5935_v48 = vld [vmem:[%s7189_s10 + $0x5] ss:$0 sm:$0xff] }
 0x59b   : > { %v2248_v56 = vadd.f32 %v4304_v17, %v2247_v34  ;;  %v2295_v2 = vmax.f32 %v2245_v63, 0.0 }
 0x59c   : > { %v2298_v0 = vmax.f32 %v2256_v12, 0.0 }
 0x59d   : > { %v2296_v62 = vmax.f32 %v2248_v56, 0.0 }
 0x59e   : > { %v2310_v1 = vpack.c.bf16 %v2298_v0, %v2297_v57 }
 0x59f   : > { %v2309_v3 = vpack.c.bf16 %v2296_v62, %v2295_v2  ;;  %v4791_v9 = vpop.f32.mrb[48].mxu0 }
 0x5a0   : > { %v2269_v55 = vadd.f32 %v4791_v9, %v4304_v17  ;;  %v2260_v4 = vpop.f32.mrb[49].mxu0 }
 0x5a1   : > { %v2261_v18 = vadd.f32 %v4304_v17, %v2260_v4  ;;  %v4792_v8 = vpop.f32.mrb[50].mxu0  ;;  %4809 = vmatprep.mubr.msk.bf16.mxu1 %vm701_vm0, %v2309_v3 }
 0x5a2   : > { %v2272_v13 = vadd.f32 %v4792_v8, %v4304_v17  ;;  %v2263_v15 = vpop.f32.mrb[51].mxu0  ;;  %4810 = vmatmul.mubr.msk.bf16.gmra.mrb[60].mxu1 %vm701_vm0, %v2310_v1  ;;  %v2301_v21 = vmax.f32 %v2269_v55, 0.0 }
 0x5a3   : > { %v2264_v6 = vadd.f32 %v4304_v17, %v2263_v15  ;;  %v2299_v39 = vmax.f32 %v2261_v18, 0.0 }
 0x5a4   : > { %v2302_v25 = vmax.f32 %v2272_v13, 0.0 }
 0x5a5   : > { %v2300_v27 = vmax.f32 %v2264_v6, 0.0 }
 0x5a6   : > { %v2312_v11 = vpack.c.bf16 %v2302_v25, %v2301_v21 }
 0x5a7   : > { %v2311_v28 = vpack.c.bf16 %v2300_v27, %v2299_v39  ;;  %v4795_v52 = vpop.f32.mrb[52].mxu0 }
 0x5a8   : > { %v2285_v35 = vadd.f32 %v4795_v52, %v4304_v17  ;;  %v2276_v43 = vpop.f32.mrb[53].mxu0 }
 0x5a9   : > { %v2277_v38 = vadd.f32 %v4304_v17, %v2276_v43  ;;  %v4796_v29 = vpop.f32.mrb[54].mxu0  ;;  %4813 = vmatprep.mubr.msk.bf16.mxu1 %vm701_vm0, %v2311_v28 }
 0x5aa   : > { %v2288_v30 = vadd.f32 %v4796_v29, %v4304_v17  ;;  %v2279_v53 = vpop.f32.mrb[55].mxu0  ;;  %4814 = vmatmul.mubr.msk.bf16.gmra.mrb[64].mxu1 %vm701_vm0, %v2312_v11  ;;  %v2305_v31 = vmax.f32 %v2285_v35, 0.0 }
 0x5ab   : > { %v2280_v20 = vadd.f32 %v4304_v17, %v2279_v53  ;;  %v2303_v32 = vmax.f32 %v2277_v38, 0.0  ;;  %v5035_v17 = vld [vmem:[%s7188_s9 + $0xe0] sm:$0xff]  }
 0x5ac   : > { %v2306_v22 = vmax.f32 %v2288_v30, 0.0  ;;  %4845 = vmatprep.subr.bf16.mxu1 %v5035_v17 }
 0x5ad   : > { %v2304_v47 = vmax.f32 %v2280_v20, 0.0  ;;  %4846 = vmatpush3.bf16.msra.mxu1 %v5035_v17 }
 0x5ae   : > { %v2314_v33 = vpack.c.bf16 %v2306_v22, %v2305_v31  ;;  %4847 = vmatprep.subr.bf16.mxu1 %v5036_v46 }
 0x5af   : > { %v2313_v37 = vpack.c.bf16 %v2304_v47, %v2303_v32 }
 0x5b1   : > { %4817 = vmatprep.mubr.msk.bf16.mxu1 %vm701_vm0, %v2313_v37  ;;  %4848 = vmatpush3.bf16.msra.mxu1 %v5036_v46 }
 0x5b2   : > { %4818 = vmatmul.mubr.msk.bf16.gmra.mrb[68].mxu1 %vm701_vm0, %v2314_v33  ;;  %4849 = vmatprep.subr.bf16.mxu1 %v5037_v45 }
 0x5b5   : > { %4850 = vmatpush3.bf16.msra.mxu1 %v5037_v45 }
 0x66d   : > { %v4807_v41 = vpop.f32.mrb[56].mxu1 }
 0x66e   : > { %v2423_v49 = vadd.f32 %v4807_v41, %v5935_v48  ;;  %v2414_v10 = vpop.f32.mrb[57].mxu1 }
 0x66f   : > { %v2415_v51 = vadd.f32 %v5935_v48, %v2414_v10  ;;  %v4808_v63 = vpop.f32.mrb[58].mxu1 }
 0x670   : > { %v2426_v54 = vadd.f32 %v4808_v63, %v5935_v48  ;;  %v2417_v12 = vpop.f32.mrb[59].mxu1  ;;  %v5945_v57 = vadd.f32 %v2423_v49, %v5817_v23 }
 0x671   : > { %v5941_v34 = vadd.f32 %v2415_v51, %v5813_v19  ;;  %v2418_v56 = vadd.f32 %v5935_v48, %v2417_v12 }
 0x672   : > { %v5948_v0 = vadd.f32 %v2426_v54, %v5820_v26  ;;  %v2495_v19 = vmax.f32 %v5945_v57, 0.0 }
 0x673   : > { %v5951_v2 = vadd.f32 %v2418_v56, %v5823_v50  ;;  %v2493_v1 = vmax.f32 %v5941_v34, 0.0 }
 0x674   : > { %v2496_v62 = vmax.f32 %v5948_v0, 0.0 }
 0x675   : > { %v2494_v3 = vmax.f32 %v5951_v2, 0.0  ;;  %v4811_v9 = vpop.f32.mrb[60].mxu1 }
 0x676   : > { %v2439_v55 = vadd.f32 %v4811_v9, %v5935_v48  ;;  %v2430_v4 = vpop.f32.mrb[61].mxu1  ;;  %v2510_v8 = vpack.c.bf16 %v2496_v62, %v2495_v19  ;;  %v5041_v9 = vld [vmem:[%s7190_s11 + $0x10] sm:$0xff]   ;;  %v4348_v19 = vld [vmem:[%s7189_s10 + $0x6] ss:$0 sm:$0xff] }
 0x677   : > { %v2509_v23 = vpack.c.bf16 %v2494_v3, %v2493_v1  ;;  %v2431_v18 = vadd.f32 %v5935_v48, %v2430_v4  ;;  %v4812_v26 = vpop.f32.mrb[62].mxu1 }
 0x678   : > { %v2442_v50 = vadd.f32 %v4812_v26, %v5935_v48  ;;  %v2433_v13 = vpop.f32.mrb[63].mxu1  ;;  %v5966_v21 = vadd.f32 %v2439_v55, %v5838_v42 }
 0x679   : > { %v5961_v15 = vadd.f32 %v2431_v18, %v5833_v36  ;;  %v2434_v6 = vadd.f32 %v5935_v48, %v2433_v13  ;;  %4829 = vmatprep.mubr.msk.bf16.mxu0 %vm701_vm0, %v2509_v23 }
 0x67a   : > { %v5969_v25 = vadd.f32 %v2442_v50, %v5841_v61  ;;  %4830 = vmatmul.mubr.msk.bf16.vlgmr.msra.gmra.mrb[56].mxu0 %vm701_vm0, %v2510_v8  ;;  %v2499_v52 = vmax.f32 %v5966_v21, 0.0 }
 0x67b   : > { %v5973_v39 = vadd.f32 %v2434_v6, %v5845_v40  ;;  %v2497_v36 = vmax.f32 %v5961_v15, 0.0 }
 0x67c   : > { %v2500_v27 = vmax.f32 %v5969_v25, 0.0 }
 0x67d   : > { %v2498_v11 = vmax.f32 %v5973_v39, 0.0  ;;  %v4815_v28 = vpop.f32.mrb[64].mxu1 }
 0x67e   : > { %v2455_v42 = vadd.f32 %v4815_v28, %v5935_v48  ;;  %v2446_v35 = vpop.f32.mrb[65].mxu1  ;;  %v2512_v29 = vpack.c.bf16 %v2500_v27, %v2499_v52 }
 0x67f   : > { %v2511_v43 = vpack.c.bf16 %v2498_v11, %v2497_v36  ;;  %v2447_v61 = vadd.f32 %v5935_v48, %v2446_v35  ;;  %v4816_v38 = vpop.f32.mrb[66].mxu1 }
 0x680   : > { %v2458_v40 = vadd.f32 %v4816_v38, %v5935_v48  ;;  %v2449_v30 = vpop.f32.mrb[67].mxu1  ;;  %v5988_v31 = vadd.f32 %v2455_v42, %v5860_v58 }
 0x681   : > { %v5983_v53 = vadd.f32 %v2447_v61, %v5855_v7  ;;  %v2450_v20 = vadd.f32 %v5935_v48, %v2449_v30  ;;  %4833 = vmatprep.mubr.msk.bf16.mxu0 %vm701_vm0, %v2511_v43 }
 0x682   : > { %v5991_v22 = vadd.f32 %v2458_v40, %v5863_v59  ;;  %4834 = vmatmul.mubr.msk.bf16.gmra.mrb[60].mxu0 %vm701_vm0, %v2512_v29  ;;  %v2503_v44 = vmax.f32 %v5988_v31, 0.0 }
 0x683   : > { %v5995_v32 = vadd.f32 %v2450_v20, %v5867_v60  ;;  %v2501_v7 = vmax.f32 %v5983_v53, 0.0 }
 0x684   : > { %v2504_v47 = vmax.f32 %v5991_v22, 0.0 }
 0x685   : > { %v2502_v33 = vmax.f32 %v5995_v32, 0.0  ;;  %v4819_v37 = vpop.f32.mrb[68].mxu1 }
 0x686   : > { %v2471_v58 = vadd.f32 %v4819_v37, %v5935_v48  ;;  %v2462_v17 = vpop.f32.mrb[69].mxu1  ;;  %v2514_v41 = vpack.c.bf16 %v2504_v47, %v2503_v44 }
 0x687   : > { %v2513_v46 = vpack.c.bf16 %v2502_v33, %v2501_v7  ;;  %v2463_v59 = vadd.f32 %v5935_v48, %v2462_v17  ;;  %v4820_v45 = vpop.f32.mrb[70].mxu1 }
 0x688   : > { %v2474_v60 = vadd.f32 %v4820_v45, %v5935_v48  ;;  %v2465_v49 = vpop.f32.mrb[71].mxu1  ;;  %v6010_v63 = vadd.f32 %v2471_v58, %v5882_v16  ;;  %v5038_v16 = vld [vmem:[%s7188_s9 + $0xf8] sm:$0xff]  }
 0x689   : > { %v6005_v10 = vadd.f32 %v2463_v59, %v5877_v14  ;;  %v2466_v51 = vadd.f32 %v5935_v48, %v2465_v49  ;;  %4837 = vmatprep.mubr.msk.bf16.mxu0 %vm701_vm0, %v2513_v46  ;;  %4851 = vmatprep.subr.bf16.mxu1 %v5038_v16 }
 0x68a   : > { %v6013_v54 = vadd.f32 %v2474_v60, %v5885_v24  ;;  %4838 = vmatmul.mubr.msk.bf16.gmra.mrb[64].mxu0 %vm701_vm0, %v2514_v41  ;;  %v2507_v48 = vmax.f32 %v6010_v63, 0.0  ;;  %4852 = vmatpush3.bf16.msra.mxu1 %v5038_v16  ;;  %v5039_v24 = vld [vmem:[%s7190_s11] sm:$0xff]  }
 0x68b   : > { %v6017_v12 = vadd.f32 %v2466_v51, %v5889_v5  ;;  %v2505_v14 = vmax.f32 %v6005_v10, 0.0  ;;  %v5040_v5 = vld [vmem:[%s7190_s11 + $0x8] sm:$0xff]   ;;  %4869 = vmatprep.subr.bf16.mxu0 %v5039_v24 }
 0x68c   : > { %v2508_v56 = vmax.f32 %v6013_v54, 0.0  ;;  %4870 = vmatpush3.bf16.msra.mxu0 %v5039_v24 }
 0x68d   : > { %v2506_v62 = vmax.f32 %v6017_v12, 0.0  ;;  %4871 = vmatprep.subr.bf16.mxu0 %v5040_v5 }
 0x68e   : > { %v2516_v3 = vpack.c.bf16 %v2508_v56, %v2507_v48 }
 0x68f   : > { %v2515_v1 = vpack.c.bf16 %v2506_v62, %v2505_v14 }
 0x690   : > { %4872 = vmatpush3.bf16.msra.mxu0 %v5040_v5 }
 0x691   : > { %4841 = vmatprep.mubr.msk.bf16.mxu0 %vm701_vm0, %v2515_v1  ;;  %4873 = vmatprep.subr.bf16.mxu0 %v5041_v9 }
 0x692   : > { %4842 = vmatmul.mubr.msk.bf16.gmra.mrb[68].mxu0 %vm701_vm0, %v2516_v3 }
 0x694   : > { %4874 = vmatpush3.bf16.msra.mxu0 %v5041_v9 }
 0x74d   : > { %v4831_v55 = vpop.f32.mrb[56].mxu0 }
 0x74e   : > { %v2625_v4 = vadd.f32 %v4831_v55, %v4348_v19  ;;  %v2616_v23 = vpop.f32.mrb[57].mxu0 }
 0x74f   : > { %v2617_v18 = vadd.f32 %v4348_v19, %v2616_v23  ;;  %v4832_v26 = vpop.f32.mrb[58].mxu0 }
 0x750   : > { %v2628_v8 = vadd.f32 %v4832_v26, %v4348_v19  ;;  %v2619_v50 = vpop.f32.mrb[59].mxu0  ;;  %v2681_v6 = vmax.f32 %v2625_v4, 0.0 }
 0x751   : > { %v2620_v13 = vadd.f32 %v4348_v19, %v2619_v50  ;;  %v2679_v36 = vmax.f32 %v2617_v18, 0.0 }
 0x752   : > { %v2682_v27 = vmax.f32 %v2628_v8, 0.0 }
 0x753   : > { %v2680_v11 = vmax.f32 %v2620_v13, 0.0 }
 0x754   : > { %v2696_v28 = vpack.c.bf16 %v2682_v27, %v2681_v6  ;;  %v5042_v27 = vld [vmem:[%s7190_s11 + $0x18] sm:$0xff]  }
 0x755   : > { %v2695_v52 = vpack.c.bf16 %v2680_v11, %v2679_v36  ;;  %v4835_v42 = vpop.f32.mrb[60].mxu0  ;;  %4875 = vmatprep.subr.bf16.mxu0 %v5042_v27 }
 0x756   : > { %v2641_v35 = vadd.f32 %v4835_v42, %v4348_v19  ;;  %v2632_v43 = vpop.f32.mrb[61].mxu0  ;;  %4876 = vmatpush3.bf16.msra.mxu0 %v5042_v27 }
 0x757   : > { %v2633_v61 = vadd.f32 %v4348_v19, %v2632_v43  ;;  %v4836_v38 = vpop.f32.mrb[62].mxu0  ;;  %4853 = vmatprep.mubr.msk.bf16.mxu1 %vm701_vm0, %v2695_v52 }
 0x758   : > { %v2644_v29 = vadd.f32 %v4836_v38, %v4348_v19  ;;  %v2635_v40 = vpop.f32.mrb[63].mxu0  ;;  %4854 = vmatmul.mubr.msk.bf16.vlgmr.msra.gmra.mrb[72].mxu1 %vm701_vm0, %v2696_v28  ;;  %v2685_v20 = vmax.f32 %v2641_v35, 0.0 }
 0x759   : > { %v2636_v30 = vadd.f32 %v4348_v19, %v2635_v40  ;;  %v2683_v7 = vmax.f32 %v2633_v61, 0.0 }
 0x75a   : > { %v2686_v47 = vmax.f32 %v2644_v29, 0.0 }
 0x75b   : > { %v2684_v33 = vmax.f32 %v2636_v30, 0.0 }
 0x75c   : > { %v2698_v37 = vpack.c.bf16 %v2686_v47, %v2685_v20 }
 0x75d   : > { %v2697_v44 = vpack.c.bf16 %v2684_v33, %v2683_v7  ;;  %v4839_v58 = vpop.f32.mrb[64].mxu0 }
 0x75e   : > { %v2657_v17 = vadd.f32 %v4839_v58, %v4348_v19  ;;  %v2648_v46 = vpop.f32.mrb[65].mxu0 }
 0x75f   : > { %v2649_v59 = vadd.f32 %v4348_v19, %v2648_v46  ;;  %v4840_v45 = vpop.f32.mrb[66].mxu0  ;;  %4857 = vmatprep.mubr.msk.bf16.mxu1 %vm701_vm0, %v2697_v44 }
 0x760   : > { %v2660_v41 = vadd.f32 %v4840_v45, %v4348_v19  ;;  %v2651_v60 = vpop.f32.mrb[67].mxu0  ;;  %4858 = vmatmul.mubr.msk.bf16.gmra.mrb[76].mxu1 %vm701_vm0, %v2698_v37  ;;  %v2689_v51 = vmax.f32 %v2657_v17, 0.0 }
 0x761   : > { %v2652_v49 = vadd.f32 %v4348_v19, %v2651_v60  ;;  %v2687_v14 = vmax.f32 %v2649_v59, 0.0 }
 0x762   : > { %v2690_v56 = vmax.f32 %v2660_v41, 0.0 }
 0x763   : > { %v2688_v62 = vmax.f32 %v2652_v49, 0.0 }
 0x764   : > { %v2700_v48 = vpack.c.bf16 %v2690_v56, %v2689_v51 }
 0x765   : > { %v2699_v1 = vpack.c.bf16 %v2688_v62, %v2687_v14  ;;  %v4843_v3 = vpop.f32.mrb[68].mxu0 }
 0x766   : > { %v2673_v16 = vadd.f32 %v4843_v3, %v4348_v19  ;;  %v2664_v24 = vpop.f32.mrb[69].mxu0 }
 0x767   : > { %v2665_v5 = vadd.f32 %v4348_v19, %v2664_v24  ;;  %v4844_v9 = vpop.f32.mrb[70].mxu0  ;;  %4861 = vmatprep.mubr.msk.bf16.mxu1 %vm701_vm0, %v2699_v1 }
 0x768   : > { %v2676_v55 = vadd.f32 %v4844_v9, %v4348_v19  ;;  %v2667_v4 = vpop.f32.mrb[71].mxu0  ;;  %4862 = vmatmul.mubr.msk.bf16.gmra.mrb[80].mxu1 %vm701_vm0, %v2700_v48  ;;  %v2693_v18 = vmax.f32 %v2673_v16, 0.0 }
 0x769   : > { %v2668_v23 = vadd.f32 %v4348_v19, %v2667_v4  ;;  %v2691_v8 = vmax.f32 %v2665_v5, 0.0  ;;  %v6054_v19 = vld [vmem:[%s7189_s10 + $0x7] ss:$0 sm:$0xff] }
 0x76a   : > { %v2694_v26 = vmax.f32 %v2676_v55, 0.0 }
 0x76b   : > { %v2692_v50 = vmax.f32 %v2668_v23, 0.0 }
 0x76c   : > { %v2702_v13 = vpack.c.bf16 %v2694_v26, %v2693_v18 }
 0x76d   : > { %v2701_v6 = vpack.c.bf16 %v2692_v50, %v2691_v8 }
 0x76f   : > { %4865 = vmatprep.mubr.msk.bf16.mxu1 %vm701_vm0, %v2701_v6 }
 0x770   : > { %4866 = vmatmul.mubr.msk.bf16.gmra.mrb[84].mxu1 %vm701_vm0, %v2702_v13 }
 0x82b   : > { %v4855_v36 = vpop.f32.mrb[72].mxu1 }
 0x82c   : > { %v2811_v11 = vadd.f32 %v4855_v36, %v6054_v19  ;;  %v2802_v28 = vpop.f32.mrb[73].mxu1 }
 0x82d   : > { %v2803_v52 = vadd.f32 %v6054_v19, %v2802_v28  ;;  %v4856_v42 = vpop.f32.mrb[74].mxu1 }
 0x82e   : > { %v2867_v35 = vadd.f32 %v2811_v11, %v5945_v57  ;;  %v2814_v43 = vadd.f32 %v4856_v42, %v6054_v19  ;;  %v2805_v61 = vpop.f32.mrb[75].mxu1 }
 0x82f   : > { %v2865_v38 = vadd.f32 %v2803_v52, %v5941_v34  ;;  %v2806_v29 = vadd.f32 %v6054_v19, %v2805_v61 }
 0x830   : > { %v2868_v40 = vadd.f32 %v2814_v43, %v5948_v0  ;;  %v2883_v20 = vmax.f32 %v2867_v35, 0.0 }
 0x831   : > { %v2866_v30 = vadd.f32 %v2806_v29, %v5951_v2  ;;  %v2881_v7 = vmax.f32 %v2865_v38, 0.0 }
 0x832   : > { %v2884_v47 = vmax.f32 %v2868_v40, 0.0 }
 0x833   : > { %v2882_v33 = vmax.f32 %v2866_v30, 0.0  ;;  %v4859_v37 = vpop.f32.mrb[76].mxu1 }
 0x834   : > { %v2898_v44 = vpack.c.bf16 %v2884_v47, %v2883_v20  ;;  %v2827_v58 = vadd.f32 %v4859_v37, %v6054_v19  ;;  %v2818_v57 = vpop.f32.mrb[77].mxu1  ;;  %v3325_v20 = vld [vmem:[%s7192_s13 + $0x18] sm:$0x3] }
 0x835   : > { %v2897_v17 = vpack.c.bf16 %v2882_v33, %v2881_v7  ;;  %v2819_v46 = vadd.f32 %v6054_v19, %v2818_v57  ;;  %v4860_v59 = vpop.f32.mrb[78].mxu1  ;;  %v6111_v7 = vld [vmem:[%s7191_s12] ss:$0 sm:$0xff] }
 0x836   : > { %v2871_v34 = vadd.f32 %v2827_v58, %v5966_v21  ;;  %v2830_v45 = vadd.f32 %v4860_v59, %v6054_v19  ;;  %v2821_v0 = vpop.f32.mrb[79].mxu1 }
 0x837   : > { %v2869_v2 = vadd.f32 %v2819_v46, %v5961_v15  ;;  %v2822_v41 = vadd.f32 %v6054_v19, %v2821_v0  ;;  %4877 = vmatprep.mubr.msk.bf16.mxu0 %vm701_vm0, %v2897_v17 }
 0x838   : > { %v2872_v60 = vadd.f32 %v2830_v45, %v5969_v25  ;;  %4878 = vmatmul.mubr.msk.bf16.vlgmr.msra.gmra.mrb[72].mxu0 %vm701_vm0, %v2898_v44  ;;  %v2887_v51 = vmax.f32 %v2871_v34, 0.0 }
 0x839   : > { %v2870_v49 = vadd.f32 %v2822_v41, %v5973_v39  ;;  %v2885_v14 = vmax.f32 %v2869_v2, 0.0 }
 0x83a   : > { %v2888_v56 = vmax.f32 %v2872_v60, 0.0 }
 0x83b   : > { %v2886_v62 = vmax.f32 %v2870_v49, 0.0  ;;  %v4863_v21 = vpop.f32.mrb[80].mxu1 }
 0x83c   : > { %v2900_v48 = vpack.c.bf16 %v2888_v56, %v2887_v51  ;;  %v2843_v1 = vadd.f32 %v4863_v21, %v6054_v19  ;;  %v2834_v3 = vpop.f32.mrb[81].mxu1 }
 0x83d   : > { %v2899_v15 = vpack.c.bf16 %v2886_v62, %v2885_v14  ;;  %v2835_v16 = vadd.f32 %v6054_v19, %v2834_v3  ;;  %v4864_v24 = vpop.f32.mrb[82].mxu1 }
 0x83e   : > { %v2875_v5 = vadd.f32 %v2843_v1, %v5988_v31  ;;  %v2846_v25 = vadd.f32 %v4864_v24, %v6054_v19  ;;  %v2837_v9 = vpop.f32.mrb[83].mxu1 }
 0x83f   : > { %v2873_v39 = vadd.f32 %v2835_v16, %v5983_v53  ;;  %v2838_v55 = vadd.f32 %v6054_v19, %v2837_v9  ;;  %4881 = vmatprep.mubr.msk.bf16.mxu0 %vm701_vm0, %v2899_v15 }
 0x840   : > { %v2876_v4 = vadd.f32 %v2846_v25, %v5991_v22  ;;  %4882 = vmatmul.mubr.msk.bf16.gmra.mrb[76].mxu0 %vm701_vm0, %v2900_v48  ;;  %v2891_v18 = vmax.f32 %v2875_v5, 0.0 }
 0x841   : > { %v2874_v23 = vadd.f32 %v2838_v55, %v5995_v32  ;;  %v2889_v8 = vmax.f32 %v2873_v39, 0.0 }
 0x842   : > { %v2892_v26 = vmax.f32 %v2876_v4, 0.0 }
 0x843   : > { %v2890_v50 = vmax.f32 %v2874_v23, 0.0  ;;  %v4867_v31 = vpop.f32.mrb[84].mxu1 }
 0x844   : > { %v2902_v13 = vpack.c.bf16 %v2892_v26, %v2891_v18  ;;  %v2859_v6 = vadd.f32 %v4867_v31, %v6054_v19  ;;  %v2850_v27 = vpop.f32.mrb[85].mxu1 }
 0x845   : > { %v2901_v53 = vpack.c.bf16 %v2890_v50, %v2889_v8  ;;  %v2851_v36 = vadd.f32 %v6054_v19, %v2850_v27  ;;  %v4868_v11 = vpop.f32.mrb[86].mxu1 }
 0x846   : > { %v2879_v28 = vadd.f32 %v2859_v6, %v6010_v63  ;;  %v2862_v22 = vadd.f32 %v4868_v11, %v6054_v19  ;;  %v2853_v52 = vpop.f32.mrb[87].mxu1 }
 0x847   : > { %v2877_v32 = vadd.f32 %v2851_v36, %v6005_v10  ;;  %v2854_v42 = vadd.f32 %v6054_v19, %v2853_v52  ;;  %4885 = vmatprep.mubr.msk.bf16.mxu0 %vm701_vm0, %v2901_v53  ;;  %v3322_v10 = vld [vmem:[%s7192_s13] sm:$0xff] }
 0x848   : > { %v2880_v35 = vadd.f32 %v2862_v22, %v6013_v54  ;;  %4886 = vmatmul.mubr.msk.bf16.gmra.mrb[80].mxu0 %vm701_vm0, %v2902_v13  ;;  %v2895_v61 = vmax.f32 %v2879_v28, 0.0  ;;  %v3323_v54 = vld [vmem:[%s7192_s13 + $0x8] sm:$0xff] }
 0x849   : > { %v2878_v43 = vadd.f32 %v2854_v42, %v6017_v12  ;;  %v2893_v29 = vmax.f32 %v2877_v32, 0.0  ;;  %v4925_v19 = vpack.c.bf16 %v3323_v54, %v3322_v10  ;;  %v3324_v12 = vld [vmem:[%s7192_s13 + $0x10] sm:$0xff] }
 0x84a   : > { %v2896_v38 = vmax.f32 %v2880_v35, 0.0  ;;  %v4929_v47 = vpack.c.bf16 %v3325_v20, %v3324_v12 }
 0x84b   : > { %v2894_v40 = vmax.f32 %v2878_v43, 0.0  ;;  %4926 = vmatprep.subr.bf16.mxu1 %v4925_v19 }
 0x84c   : > { %v2904_v63 = vpack.c.bf16 %v2896_v38, %v2895_v61  ;;  %4928 = vmatpush3.bf16.msra.mxu1 %v4925_v19 }
 0x84d   : > { %v2903_v30 = vpack.c.bf16 %v2894_v40, %v2893_v29  ;;  %4931 = vmatprep.subr.msk.bf16.mxu1 %vm4930_vm6, %v4929_v47 }
 0x84f   : > { %4889 = vmatprep.mubr.msk.bf16.mxu0 %vm701_vm0, %v2903_v30 }
 0x850   : > { %4890 = vmatmul.mubr.msk.bf16.gmra.mrb[84].mxu0 %vm701_vm0, %v2904_v63  ;;  %4934 = vmatpush3.bf16.msk.msra.mxu1 %vm4930_vm6, %v4929_v47 }
 0x90b   : > { %v4879_v33 = vpop.f32.mrb[72].mxu0 }
 0x90c   : > { %v6114_v37 = vadd.f32 %v4879_v33, %v6111_v7  ;;  %v3002_v44 = vpop.f32.mrb[73].mxu0 }
 0x90d   : > { %v6117_v58 = vadd.f32 %v6111_v7, %v3002_v44  ;;  %v4880_v57 = vpop.f32.mrb[74].mxu0 }
 0x90e   : > { %v3005_v17 = vpop.f32.mrb[75].mxu0  ;;  %v6120_v46 = vmul.f32 100.0, %v6114_v37  ;;  %v6129_v45 = vadd.f32 %v4880_v57, %v6111_v7 }
 0x90f   : > { %v6123_v59 = vmul.f32 100.0, %v6117_v58  ;;  %v6126_v34 = vadd.f32 %v6111_v7, %v3005_v17 }
 0x910   : > { %v3099_v41 = vmin.f32 %v6120_v46, 20.0  ;;  %v6138_v51 = vmul.f32 100.0, %v6129_v45  ;;  %vm3083_vm12 = vcmp.gt.f32.partialorder %v6120_v46, 20.0 }
 0x911   : > { %v3097_v0 = vmin.f32 %v6123_v59, 20.0  ;;  %v6133_v2 = vmul.f32 100.0, %v6126_v34  ;;  %vm3081_vm10 = vcmp.gt.f32.partialorder %v6123_v59, 20.0 }
 0x912   : > { %v3117_v24 = vmul.f32 1.442695, %v3099_v41  ;;  %v3100_v9 = vmin.f32 %v6138_v51, 20.0  ;;  %vm3084_vm15 = vcmp.gt.f32.partialorder %v6138_v51, 20.0 }
 0x913   : > { %v3098_v60 = vmin.f32 %v6133_v2, 20.0  ;;  %v4883_v49 = vpop.f32.mrb[76].mxu0  ;;  %v3113_v62 = vmul.f32 1.442695, %v3097_v0  ;;  %vm3082_vm7 = vcmp.gt.f32.partialorder %v6133_v2, 20.0 }
 0x914   : > { %v6141_v56 = vadd.f32 %v4883_v49, %v6111_v7  ;;  %v3018_v14 = vpop.f32.mrb[77].mxu0  ;;  %v3119_v8 = vmul.f32 1.442695, %v3100_v9 }
 0x915   : > { %v3115_v21 = vmul.f32 1.442695, %v3098_v60  ;;  %v6144_v48 = vadd.f32 %v6111_v7, %v3018_v14  ;;  %v4884_v1 = vpop.f32.mrb[78].mxu0 }
 0x916   : > { %v6147_v3 = vmul.f32 100.0, %v6141_v56  ;;  %v6150_v15 = vadd.f32 %v4884_v1, %v6111_v7  ;;  %v3021_v16 = vpop.f32.mrb[79].mxu0 }
 0x917   : > { %5043 = vpow2.f32 %v3115_v21  ;;  %v6153_v5 = vmul.f32 100.0, %v6144_v48  ;;  %v6156_v25 = vadd.f32 %v6111_v7, %v3021_v16 }
 0x918   : > { %v6160_v39 = vmul.f32 100.0, %v6150_v15  ;;  %5045 = vpow2.f32 %v3113_v62  ;;  %v3103_v55 = vmin.f32 %v6147_v3, 20.0  ;;  %vm3087_vm4 = vcmp.gt.f32.partialorder %v6147_v3, 20.0 }
 0x919   : > { %v3101_v4 = vmin.f32 %v6153_v5, 20.0  ;;  %v6165_v23 = vmul.f32 100.0, %v6156_v25  ;;  %5047 = vpow2.f32 %v3117_v24  ;;  %vm3085_vm1 = vcmp.gt.f32.partialorder %v6153_v5, 20.0 }
 0x91a   : > { %v3104_v18 = vmin.f32 %v6160_v39, 20.0  ;;  %v3125_v13 = vmul.f32 1.442695, %v3103_v55  ;;  %5049 = vpow2.f32 %v3119_v8 }
 0x91b   : > { %v4887_v26 = vpop.f32.mrb[80].mxu0  ;;  %v3121_v53 = vmul.f32 1.442695, %v3101_v4  ;;  %v3102_v36 = vmin.f32 %v6165_v23, 20.0  ;;  %vm3086_vm2 = vcmp.gt.f32.partialorder %v6165_v23, 20.0 }
 0x91c   : > { %v6169_v50 = vadd.f32 %v4887_v26, %v6111_v7  ;;  %v3034_v31 = vpop.f32.mrb[81].mxu0  ;;  %v3127_v52 = vmul.f32 1.442695, %v3104_v18  ;;  %5051 = vpow2.f32 %v3125_v13 }
 0x91d   : > { %v6172_v6 = vadd.f32 %v6111_v7, %v3034_v31  ;;  %v4888_v27 = vpop.f32.mrb[82].mxu0  ;;  %5053 = vpow2.f32 %v3121_v53  ;;  %v3123_v29 = vmul.f32 1.442695, %v3102_v36 }
 0x91e   : > { %v6176_v11 = vmul.f32 100.0, %v6169_v50  ;;  %v6179_v28 = vadd.f32 %v4888_v27, %v6111_v7  ;;  %v3037_v22 = vpop.f32.mrb[83].mxu0  ;;  %5055 = vpow2.f32 %v3127_v52 }
 0x91f   : > { %v6182_v32 = vmul.f32 100.0, %v6172_v6  ;;  %v6185_v42 = vadd.f32 %v6111_v7, %v3037_v22 }
 0x920   : > { %v3107_v43 = vmin.f32 %v6176_v11, 20.0  ;;  %v6191_v61 = vmul.f32 100.0, %v6179_v28 }
 0x921   : > { %v6187_v35 = vpop.eup %5043  ;;  %v6195_v40 = vmul.f32 100.0, %v6185_v42  ;;  %v3105_v30 = vmin.f32 %v6182_v32, 20.0 }
 0x922   : > { %v3154_v38 = vadd.f32 1.0, %v6187_v35  ;;  %v6197_v63 = vpop.eup %5045  ;;  %v3157_v54 = vmul.f32 -0.5, %v6187_v35  ;;  %v3133_v20 = vmul.f32 1.442695, %v3107_v43  ;;  %v3108_v47 = vmin.f32 %v6191_v61, 20.0 }
 0x923   : > { %v4891_v10 = vpop.f32.mrb[84].mxu0  ;;  %v6201_v12 = vpop.eup %5047  ;;  %v3106_v17 = vmin.f32 %v6195_v40, 20.0  ;;  %v3145_v60 = vadd.f32 1.0, %v6197_v63  ;;  %v3129_v49 = vmul.f32 1.442695, %v3105_v30  ;;  %v3148_v24 = vmul.f32 -0.5, %v6197_v63 }
 0x924   : > { %5057 = vlog2.f32 %v3154_v38  ;;  %v3050_v19 = vpop.f32.mrb[85].mxu0  ;;  %v6205_v33 = vadd.f32 %v4891_v10, %v6111_v7  ;;  %v3158_v1 = vadd.f32 1.0, %v3157_v54  ;;  %v3163_v9 = vadd.f32 1.0, %v6201_v12  ;;  %v5050_v26 = vpop.eup %5049 }
 0x925   : > { %v6208_v44 = vadd.f32 %v6111_v7, %v3050_v19  ;;  %v4892_v57 = vpop.f32.mrb[86].mxu0  ;;  %5059 = vpow2.f32 %v3123_v29  ;;  %v3135_v55 = vmul.f32 1.442695, %v3108_v47  ;;  %v3131_v8 = vmul.f32 1.442695, %v3106_v17 }
 0x926   : > { %v6212_v0 = vadd.f32 %v4892_v57, %v6111_v7  ;;  %v3053_v41 = vpop.f32.mrb[87].mxu0  ;;  %v6216_v14 = vmul.f32 100.0, %v6205_v33  ;;  %5061 = vpow2.f32 %v3133_v20  ;;  %v3160_v36 = vand.u32 2147483647, %v6187_v35 }
 0x927   : > { %v6219_v62 = vmul.f32 100.0, %v6208_v44  ;;  %v6222_v21 = vadd.f32 %v6111_v7, %v3053_v41  ;;  %5063 = vlog2.f32 %v3145_v60  ;;  %v6234_v7 = vpop.eup %5051  ;;  %v3159_v38 = vmul.f32 %v6187_v35, %v3158_v1 }
 0x928   : > { %v6225_v16 = vmul.f32 100.0, %v6212_v0  ;;  %v3111_v4 = vmin.f32 %v6216_v14, 20.0  ;;  %5065 = vpow2.f32 %v3129_v49  ;;  %v6237_v53 = vpop.eup %5053  ;;  %v3149_v29 = vadd.f32 1.0, %v3148_v24 }
 0x929   : > { %v3109_v18 = vmin.f32 %v6219_v62, 20.0  ;;  %v6232_v31 = vmul.f32 100.0, %v6222_v21  ;;  %5067 = vlog2.f32 %v3163_v9  ;;  %v6241_v43 = vpop.eup %5055  ;;  %v3172_v30 = vadd.f32 1.0, %v5050_v26 }
 0x92a   : > { %v3141_v13 = vmul.f32 1.442695, %v3111_v4  ;;  %v3112_v27 = vmin.f32 %v6225_v16, 20.0  ;;  %5069 = vpow2.f32 %v3135_v55  ;;  %v3151_v54 = vand.u32 2147483647, %v6197_v63 }
 0x92b   : > { %v3137_v22 = vmul.f32 1.442695, %v3109_v18  ;;  %v3110_v52 = vmin.f32 %v6232_v31, 20.0  ;;  %5071 = vpow2.f32 %v3131_v8  ;;  %v3166_v19 = vmul.f32 -0.5, %v6201_v12 }
 0x92c   : > { %v3175_v20 = vmul.f32 -0.5, %v5050_v26  ;;  %5073 = vpow2.f32 %v3141_v13  ;;  %v3143_v57 = vmul.f32 1.442695, %v3112_v27  ;;  %v3169_v17 = vand.u32 2147483647, %v6201_v12 }
 0x92d   : > { %vm6250_vm8 = vcmp.lt.f32.partialorder %v3160_v36, 0.0004427343  ;;  %5075 = vpow2.f32 %v3137_v22  ;;  %v3139_v60 = vmul.f32 1.442695, %v3110_v52  ;;  %v3181_v49 = vadd.f32 1.0, %v6237_v53 }
 0x92e   : > { %v5058_v10 = vpop.eup %5057  ;;  %v3150_v24 = vmul.f32 %v6197_v63, %v3149_v29  ;;  %5077 = vlog2.f32 %v3172_v30  ;;  %v3178_v9 = vand.u32 2147483647, %v5050_v26  ;;  %vm6259_vm11 = vcmp.lt.f32.partialorder %v3151_v54, 0.0004427343 }
 0x92f   : > { %v3156_v47 = vmul.f32 0.6931472, %v5058_v10  ;;  %v6248_v41 = vpop.eup %5059  ;;  %v3167_v4 = vadd.f32 1.0, %v3166_v19  ;;  %v3176_v18 = vadd.f32 1.0, %v3175_v20  ;;  %5079 = vlog2.f32 %v3181_v49 }
 0x930   : > { %v6263_v8 = vpop.eup %5061  ;;  %5081 = vpow2.f32 %v3143_v57  ;;  %vm6266_vm13 = vcmp.lt.f32.partialorder %v3169_v17, 0.0004427343  ;;  %v3184_v63 = vmul.f32 -0.5, %v6237_v53  ;;  %v3190_v27 = vadd.f32 1.0, %v6248_v41 }
 0x931   : > { %v3162_v1 = vsel %vm6250_vm8, %v3159_v38, %v3156_v47  ;;  %v5064_v36 = vpop.eup %5063  ;;  %5083 = vpow2.f32 %v3139_v60  ;;  %v3187_v52 = vand.u32 2147483647, %v6237_v53  ;;  %v3199_v38 = vadd.f32 1.0, %v6234_v7 }
 0x932   : > { %v3291_v22 = vmul.f32 0.01, %v3162_v1  ;;  %v6274_v29 = vpop.eup %5065  ;;  %v3147_v30 = vmul.f32 0.6931472, %v5064_v36  ;;  %vm6276_vm14 = vcmp.lt.f32.partialorder %v3178_v9, 0.0004427343  ;;  %5085 = vlog2.f32 %v3190_v27 }
 0x933   : > { %v3193_v54 = vmul.f32 -0.5, %v6248_v41  ;;  %v5068_v19 = vpop.eup %5067  ;;  %v3168_v20 = vmul.f32 %v6201_v12, %v3167_v4  ;;  %v3177_v47 = vmul.f32 %v5050_v26, %v3176_v18  ;;  %5087 = vlog2.f32 %v3199_v38 }
 0x934   : > { %v3202_v57 = vmul.f32 -0.5, %v6234_v7  ;;  %v6283_v17 = vpop.eup %5069  ;;  %v3153_v35 = vsel %vm6259_vm11, %v3150_v24, %v3147_v30  ;;  %v3165_v60 = vmul.f32 0.6931472, %v5068_v19  ;;  %v3185_v49 = vadd.f32 1.0, %v3184_v63 }
 0x935   : > { %v3208_v1 = vadd.f32 1.0, %v6241_v43  ;;  %v6288_v9 = vpop.eup %5071  ;;  %v3307_v12 = vsel %vm3082_vm7, %v6126_v34, %v3291_v22  ;;  %v3290_v26 = vmul.f32 0.01, %v3153_v35  ;;  %vm6294_vm0 = vcmp.lt.f32.partialorder %v3187_v52, 0.0004427343 }
 0x936   : > { %v3196_v55 = vand.u32 2147483647, %v6248_v41  ;;  %v6299_v24 = vpop.eup %5073  ;;  %v3171_v18 = vsel %vm6266_vm13, %v3168_v20, %v3165_v60  ;;  %v3194_v63 = vadd.f32 1.0, %v3193_v54  ;;  %v3217_v27 = vadd.f32 1.0, %v6274_v29 }
 0x937   : > { %5089 = vlog2.f32 %v3208_v1  ;;  %v6305_v2 = vpop.eup %5075  ;;  %v3306_v34 = vsel %vm3081_vm10, %v6117_v58, %v3290_v26  ;;  %v3292_v36 = vmul.f32 0.01, %v3171_v18  ;;  %v3203_v22 = vadd.f32 1.0, %v3202_v57 }
 0x938   : > { %v3205_v52 = vand.u32 2147483647, %v6234_v7  ;;  %v5078_v38 = vpop.eup %5077  ;;  %4901 = vmatprep.mubr.msk.f32.mxu1 %vm3333_vm9, %v3306_v34  ;;  %v3211_v13 = vmul.f32 -0.5, %v6241_v43  ;;  %v3214_v30 = vand.u32 2147483647, %v6241_v43  ;;  %5091 = vlog2.f32 %v3217_v27 }
 0x939   : > { %v3226_v54 = vadd.f32 1.0, %v6288_v9  ;;  %v5080_v19 = vpop.eup %5079  ;;  %4902 = vmatmul.mubr.msk.f32.vlgmr.msra.gmra.mrb[88].mxu1 %vm3333_vm9, %v3307_v12  ;;  %v3308_v58 = vsel %vm3083_vm12, %v6114_v37, %v3292_v36  ;;  %v3174_v59 = vmul.f32 0.6931472, %v5078_v38  ;;  %v3186_v20 = vmul.f32 %v6237_v53, %v3185_v49 }
 0x93a   : > { %vm6321_vm3 = vcmp.lt.f32.partialorder %v3196_v55, 0.0004427343  ;;  %v6325_v35 = vpop.eup %5081  ;;  %4904 = vmatprep.mubr.msk.f32.mxu1 %vm3333_vm9, %v3308_v58  ;;  %v3183_v60 = vmul.f32 0.6931472, %v5080_v19  ;;  %v3195_v1 = vmul.f32 %v6248_v41, %v3194_v63  ;;  %v3220_v12 = vmul.f32 -0.5, %v6274_v29 }
 0x93b   : > { %5093 = vlog2.f32 %v3226_v54  ;;  %v6331_v37 = vpop.eup %5083  ;;  %v3180_v46 = vsel %vm6276_vm14, %v3177_v47, %v3174_v59  ;;  %v3204_v53 = vmul.f32 %v6234_v7, %v3203_v22  ;;  %vm6336_vm5 = vcmp.lt.f32.partialorder %v3205_v52, 0.0004427343 }
 0x93c   : > { %v3235_v26 = vadd.f32 1.0, %v6263_v8  ;;  %v5086_v55 = vpop.eup %5085  ;;  %v3293_v18 = vmul.f32 0.01, %v3180_v46  ;;  %v3189_v41 = vsel %vm6294_vm0, %v3186_v20, %v3183_v60  ;;  %v3212_v63 = vadd.f32 1.0, %v3211_v13 }
 0x93d   : > { %vm6343_vm6 = vcmp.lt.f32.partialorder %v3214_v30, 0.0004427343  ;;  %v5088_v10 = vpop.eup %5087  ;;  %vm3088_vm7 = vcmp.gt.f32.partialorder %v6160_v39, 20.0  ;;  %v3294_v7 = vmul.f32 0.01, %v3189_v41  ;;  %v3229_v34 = vmul.f32 -0.5, %v6288_v9 }
 0x93e   : > { %v3192_v47 = vmul.f32 0.6931472, %v5086_v55  ;;  %5095 = vlog2.f32 %v3235_v26  ;;  %v3309_v36 = vsel %vm3084_vm15, %v6129_v45, %v3293_v18  ;;  %v3201_v22 = vmul.f32 0.6931472, %v5088_v10 }
 0x93f   : > { %v3221_v4 = vadd.f32 1.0, %v3220_v12  ;;  %v3238_v52 = vmul.f32 -0.5, %v6263_v8  ;;  %4905 = vmatmul.mubr.msk.f32.gmra.mrb[90].mxu1 %vm3333_vm9, %v3309_v36  ;;  %v3310_v38 = vsel %vm3085_vm1, %v6144_v48, %v3294_v7  ;;  %v3223_v30 = vand.u32 2147483647, %v6274_v29 }
 0x940   : > { %v3198_v13 = vsel %vm6321_vm3, %v3195_v1, %v3192_v47  ;;  %v3244_v54 = vadd.f32 1.0, %v6283_v17  ;;  %4907 = vmatprep.mubr.msk.f32.mxu1 %vm3333_vm9, %v3310_v38  ;;  %v3207_v51 = vsel %vm6336_vm5, %v3204_v53, %v3201_v22  ;;  %v3213_v58 = vmul.f32 %v6241_v43, %v3212_v63 }
 0x941   : > { %v5090_v19 = vpop.eup %5089  ;;  %v3295_v45 = vmul.f32 0.01, %v3198_v13  ;;  %v3232_v59 = vand.u32 2147483647, %v6288_v9  ;;  %v3296_v5 = vmul.f32 0.01, %v3207_v51  ;;  %v3222_v1 = vmul.f32 %v6274_v29, %v3221_v4 }
 0x942   : > { %v3210_v48 = vmul.f32 0.6931472, %v5090_v19  ;;  %v3230_v20 = vadd.f32 1.0, %v3229_v34  ;;  %5097 = vlog2.f32 %v3244_v54  ;;  %v5092_v57 = vpop.eup %5091  ;;  %v3239_v12 = vadd.f32 1.0, %v3238_v52 }
 0x943   : > { %v3311_v60 = vsel %vm3086_vm2, %v6156_v25, %v3295_v45  ;;  %v3253_v46 = vadd.f32 1.0, %v6305_v2  ;;  %v3312_v43 = vsel %vm3087_vm4, %v6141_v56, %v3296_v5  ;;  %v3219_v49 = vmul.f32 0.6931472, %v5092_v57 }
 0x944   : > { %4908 = vmatmul.mubr.msk.f32.gmra.mrb[92].mxu1 %vm3333_vm9, %v3311_v60  ;;  %v3216_v53 = vsel %vm6343_vm6, %v3213_v58, %v3210_v48  ;;  %v3247_v26 = vmul.f32 -0.5, %v6283_v17  ;;  %vm3224_vm8 = vcmp.lt.f32.partialorder %v3223_v30, 0.0004427343  ;;  %vm6379_vm10 = vcmp.lt.f32.partialorder %v3232_v59, 0.0004427343 }
 0x945   : > { %v5094_v55 = vpop.eup %5093  ;;  %4910 = vmatprep.mubr.msk.f32.mxu1 %vm3333_vm9, %v3312_v43  ;;  %v3297_v25 = vmul.f32 0.01, %v3216_v53  ;;  %5099 = vlog2.f32 %v3253_v46  ;;  %v3225_v29 = vsel %vm3224_vm8, %v3222_v1, %v3219_v49  ;;  %v3231_v56 = vmul.f32 %v6288_v9, %v3230_v20 }
 0x946   : > { %v3228_v18 = vmul.f32 0.6931472, %v5094_v55  ;;  %v3241_v3 = vand.u32 2147483647, %v6263_v8  ;;  %v3298_v63 = vmul.f32 0.01, %v3225_v29  ;;  %v3240_v9 = vmul.f32 %v6263_v8, %v3239_v12 }
 0x947   : > { %v3313_v41 = vsel %vm3088_vm7, %v6150_v15, %v3297_v25  ;;  %v3256_v27 = vmul.f32 -0.5, %v6305_v2  ;;  %v3262_v10 = vadd.f32 1.0, %v6331_v37  ;;  %vm3089_vm11 = vcmp.gt.f32.partialorder %v6182_v32, 20.0 }
 0x948   : > { %v5096_v7 = vpop.eup %5095  ;;  %4911 = vmatmul.mubr.msk.f32.gmra.mrb[94].mxu1 %vm3333_vm9, %v3313_v41  ;;  %v3234_v47 = vsel %vm6379_vm10, %v3231_v56, %v3228_v18  ;;  %v3248_v34 = vadd.f32 1.0, %v3247_v26  ;;  %v3314_v36 = vsel %vm3089_vm11, %v6172_v6, %v3298_v63  ;;  %vm3090_vm12 = vcmp.gt.f32.partialorder %v6195_v40, 20.0  ;;  %v6438_v63 = vld [vmem:[%s7193_s14] ss:$0 sm:$0xff] }
 0x949   : > { %v3299_v39 = vmul.f32 0.01, %v3234_v47  ;;  %v3237_v15 = vmul.f32 0.6931472, %v5096_v7  ;;  %5101 = vlog2.f32 %v3262_v10  ;;  %4913 = vmatprep.mubr.msk.f32.mxu1 %vm3333_vm9, %v3314_v36  ;;  %vm3242_vm13 = vcmp.lt.f32.partialorder %v3241_v3, 0.0004427343 }
 0x94a   : > { %v3250_v32 = vand.u32 2147483647, %v6283_v17  ;;  %v3271_v22 = vadd.f32 1.0, %v6299_v24  ;;  %v3257_v38 = vadd.f32 1.0, %v3256_v27  ;;  %v3280_v8 = vadd.f32 1.0, %v6325_v35 }
 0x94b   : > { %v3315_v4 = vsel %vm3090_vm12, %v6185_v42, %v3299_v39  ;;  %v3243_v52 = vsel %vm3242_vm13, %v3240_v9, %v3237_v15  ;;  %vm3091_vm14 = vcmp.gt.f32.partialorder %v6176_v11, 20.0  ;;  %v3265_v40 = vmul.f32 -0.5, %v6331_v37 }
 0x94c   : > { %v5098_v13 = vpop.eup %5097  ;;  %4914 = vmatmul.mubr.msk.f32.gmra.mrb[96].mxu1 %vm3333_vm9, %v3315_v4  ;;  %v3300_v6 = vmul.f32 0.01, %v3243_v52  ;;  %5103 = vlog2.f32 %v3271_v22  ;;  %v3249_v54 = vmul.f32 %v6283_v17, %v3248_v34  ;;  %v3259_v19 = vand.u32 2147483647, %v6305_v2 }
 0x94d   : > { %v3246_v30 = vmul.f32 0.6931472, %v5098_v13  ;;  %5105 = vlog2.f32 %v3280_v8  ;;  %vm3251_vm15 = vcmp.lt.f32.partialorder %v3250_v32, 0.0004427343  ;;  %v3258_v11 = vmul.f32 %v6305_v2, %v3257_v38 }
 0x94e   : > { %v3316_v42 = vsel %vm3091_vm14, %v6169_v50, %v3300_v6  ;;  %v3274_v58 = vmul.f32 -0.5, %v6299_v24  ;;  %v3266_v48 = vadd.f32 1.0, %v3265_v40  ;;  %v3283_v20 = vmul.f32 -0.5, %v6325_v35 }
 0x94f   : > { %v5100_v45 = vpop.eup %5099  ;;  %4916 = vmatprep.mubr.msk.f32.mxu1 %vm3333_vm9, %v3316_v42  ;;  %v3252_v51 = vsel %vm3251_vm15, %v3249_v54, %v3246_v30  ;;  %vm3092_vm0 = vcmp.gt.f32.partialorder %v6191_v61, 20.0  ;;  %vm3260_vm1 = vcmp.lt.f32.partialorder %v3259_v19, 0.0004427343  ;;  %v3268_v17 = vand.u32 2147483647, %v6331_v37 }
 0x950   : > { %v3301_v59 = vmul.f32 0.01, %v3252_v51  ;;  %v3255_v5 = vmul.f32 0.6931472, %v5100_v45  ;;  %vm3093_vm2 = vcmp.gt.f32.partialorder %v6219_v62, 20.0  ;;  %v3275_v1 = vadd.f32 1.0, %v3274_v58 }
 0x951   : > { %v3267_v46 = vmul.f32 %v6331_v37, %v3266_v48  ;;  %v3277_v43 = vand.u32 2147483647, %v6299_v24  ;;  %v3284_v53 = vadd.f32 1.0, %v3283_v20  ;;  %vm3269_vm3 = vcmp.lt.f32.partialorder %v3268_v17, 0.0004427343 }
 0x952   : > { %v3317_v50 = vsel %vm3092_vm0, %v6179_v28, %v3301_v59  ;;  %v3261_v57 = vsel %vm3260_vm1, %v3258_v11, %v3255_v5  ;;  %v3286_v49 = vand.u32 2147483647, %v6325_v35  ;;  %v3276_v23 = vmul.f32 %v6299_v24, %v3275_v1 }
 0x953   : > { %v5102_v60 = vpop.eup %5101  ;;  %4917 = vmatmul.mubr.msk.f32.gmra.mrb[98].mxu1 %vm3333_vm9, %v3317_v50  ;;  %v3302_v2 = vmul.f32 0.01, %v3261_v57  ;;  %vm3094_vm4 = vcmp.gt.f32.partialorder %v6232_v31, 20.0  ;;  %vm3278_vm5 = vcmp.lt.f32.partialorder %v3277_v43, 0.0004427343  ;;  %v3285_v29 = vmul.f32 %v6325_v35, %v3284_v53 }
 0x954   : > { %v3264_v12 = vmul.f32 0.6931472, %v5102_v60  ;;  %vm3287_vm6 = vcmp.lt.f32.partialorder %v3286_v49, 0.0004427343  ;;  %vm3095_vm7 = vcmp.gt.f32.partialorder %v6216_v14, 20.0  ;;  %vm3096_vm8 = vcmp.gt.f32.partialorder %v6225_v16, 20.0 }
 0x955   : > { %v3318_v61 = vsel %vm3093_vm2, %v6208_v44, %v3302_v2  ;;  %vm3549_vm13 = vcmask 23552  }
 0x956   : > { %v5104_v28 = vpop.eup %5103  ;;  %4919 = vmatprep.mubr.msk.f32.mxu1 %vm3333_vm9, %v3318_v61  ;;  %v3270_v26 = vsel %vm3269_vm3, %v3267_v46, %v3264_v12 }
 0x957   : > { %v5106_v62 = vpop.eup %5105  ;;  %v3303_v55 = vmul.f32 0.01, %v3270_v26  ;;  %v3273_v25 = vmul.f32 0.6931472, %v5104_v28 }
 0x958   : > { %v3282_v37 = vmul.f32 0.6931472, %v5106_v62 }
 0x959   : > { %v3319_v44 = vsel %vm3094_vm4, %v6222_v21, %v3303_v55  ;;  %v3279_v18 = vsel %vm3278_vm5, %v3276_v23, %v3273_v25  ;;  %v3531_v21 = vlaneseq }
 0x95a   : > { %4920 = vmatmul.mubr.msk.f32.gmra.mrb[100].mxu1 %vm3333_vm9, %v3319_v44  ;;  %v3304_v56 = vmul.f32 0.01, %v3279_v18  ;;  %v3288_v3 = vsel %vm3287_vm6, %v3285_v29, %v3282_v37 }
 0x95b   : > { %v3305_v41 = vmul.f32 0.01, %v3288_v3  ;;  %v6433_v35 = vand.u32 127, %v3531_v21 }
 0x95c   : > { %v3320_v24 = vsel %vm3095_vm7, %v6205_v33, %v3304_v56 }
 0x95d   : > { %4922 = vmatprep.mubr.msk.f32.mxu1 %vm3333_vm9, %v3320_v24  ;;  %v3321_v31 = vsel %vm3096_vm8, %v6212_v0, %v3305_v41  ;;  %vm3710_vm10 = vcmp.ge.s32.totalorder %v6433_v35, 7  ;;  %vm3711_vm11 = vcmp.lt.s32.totalorder %v6433_v35, 11  ;;  %vm3971_vm4 = vcmp.lt.s32.totalorder %v6433_v35, 7 }
 0x95e   : > { %4923 = vmatmul.mubr.msk.f32.gmra.mrb[102].mxu1 %vm3333_vm9, %v3321_v31  ;;  %vm6450_vm12 = vmand %vm3710_vm10, %vm3711_vm11  ;;  %vm3970_vm5 = vcmp.eq.s32.totalorder %v6433_v35, 3  ;;  %vm3953_vm6 = vcmp.lt.s32.totalorder %v6433_v35, 3 }
 0xa0c   : > { %v4903_v14 = vpop.f32.mrb[88].mxu1 }
 0xa0d   : > { %v6443_v33 = vadd.f32 %v4903_v14, %v6438_v63  ;;  %v3452_v16 = vpop.f32.mrb[89].mxu1 }
 0xa0e   : > { %v6446_v0 = vadd.f32 %v6438_v63, %v3452_v16 }
 0xa0f   : > { %v3714_v10 = vmul.f32 %v6443_v33, %v6443_v33  ;;  %v3664_v27 = vmul.f32 1.442695, %v6443_v33 }
 0xa10   : > { %v3713_v7 = vmul.f32 %v6446_v0, %v6446_v0 }
 0xa11   : > { %v3730_v47 = vsel %vm6450_vm12, %v3714_v10, 0.0 }
 0xa12   : > { %v4906_v9 = vpop.f32.mrb[90].mxu1  ;;  %v3748_v34 = vsel %vm3333_vm9, %v3730_v47, 0.0  ;;  %v3729_v36 = vsel %vm6450_vm12, %v3713_v7, 0.0 }
 0xa13   : > { %v6464_v39 = vadd.f32 %v4906_v9, %v6438_v63  ;;  %v3462_v15 = vpop.f32.mrb[91].mxu1  ;;  %3749 = vadd.xlane.f32.xlu1 %v3748_v34  ;;  %v3745_v32 = vsel %vm3333_vm9, %v3729_v36, 0.0 }
 0xa14   : > { %v6468_v22 = vadd.f32 %v6438_v63, %v3462_v15  ;;  %3746 = vadd.xlane.f32.xlu0 %v3745_v32 }
 0xa15   : > { %v3716_v4 = vmul.f32 %v6464_v39, %v6464_v39 }
 0xa16   : > { %v3715_v38 = vmul.f32 %v6468_v22, %v6468_v22 }
 0xa17   : > { %v4909_v52 = vpop.f32.mrb[92].mxu1  ;;  %v3732_v13 = vsel %vm6450_vm12, %v3716_v4, 0.0 }
 0xa18   : > { %v3472_v8 = vpop.f32.mrb[93].mxu1  ;;  %v3754_v40 = vsel %vm3333_vm9, %v3732_v13, 0.0  ;;  %v3731_v30 = vsel %vm6450_vm12, %v3715_v38, 0.0  ;;  %v6483_v54 = vadd.f32 %v4909_v52, %v6438_v63 }
 0xa19   : > { %v6477_v6 = vadd.f32 %v6438_v63, %v3472_v8  ;;  %3755 = vadd.xlane.f32.xlu0 %v3754_v40  ;;  %v3751_v51 = vsel %vm3333_vm9, %v3731_v30, 0.0 }
 0xa1a   : > { %v3718_v59 = vmul.f32 %v6483_v54, %v6483_v54 }
 0xa1b   : > { %v4912_v19 = vpop.f32.mrb[94].mxu1  ;;  %v3717_v45 = vmul.f32 %v6477_v6, %v6477_v6 }
 0xa1c   : > { %v3482_v42 = vpop.f32.mrb[95].mxu1  ;;  %v3734_v50 = vsel %vm6450_vm12, %v3718_v59, 0.0  ;;  %v6508_v43 = vadd.f32 %v4912_v19, %v6438_v63  ;;  %v4419_v59 = vmul.f32 -1.442695, %v6483_v54 }
 0xa1d   : > { %v6489_v11 = vadd.f32 %v6438_v63, %v3482_v42  ;;  %3752 = vadd.xlane.f32.xlu0 %v3751_v51  ;;  %v3733_v48 = vsel %vm6450_vm12, %v3717_v45, 0.0  ;;  %v3760_v1 = vsel %vm3333_vm9, %v3734_v50, 0.0  ;;  %v4415_v42 = vmul.f32 -1.442695, %v6443_v33 }
 0xa1e   : > { %v3757_v20 = vsel %vm3333_vm9, %v3733_v48, 0.0  ;;  %v3720_v55 = vmul.f32 %v6508_v43, %v6508_v43  ;;  %v4414_v45 = vmul.f32 -1.442695, %v6446_v0  ;;  %v4417_v51 = vmul.f32 -1.442695, %v6464_v39 }
 0xa1f   : > { %v4915_v58 = vpop.f32.mrb[96].mxu1  ;;  %v3719_v17 = vmul.f32 %v6489_v11, %v6489_v11  ;;  %3758 = vadd.xlane.f32.xlu1 %v3757_v20  ;;  %5107 = vpow2.f32 %v4415_v42  ;;  %v3662_v48 = vmul.f32 1.442695, %v6446_v0  ;;  %v3668_v20 = vmul.f32 1.442695, %v6464_v39 }
 0xa20   : > { %v3492_v5 = vpop.f32.mrb[97].mxu1  ;;  %v6513_v61 = vadd.f32 %v4915_v58, %v6438_v63  ;;  %v3736_v23 = vsel %vm6450_vm12, %v3720_v55, 0.0  ;;  %5109 = vpow2.f32 %v4414_v45  ;;  %v4416_v58 = vmul.f32 -1.442695, %v6468_v22 }
 0xa21   : > { %v6501_v57 = vadd.f32 %v6438_v63, %v3492_v5  ;;  %v3735_v2 = vsel %vm6450_vm12, %v3719_v17, 0.0  ;;  %3761 = vadd.xlane.f32.xlu0 %v3760_v1  ;;  %v3766_v18 = vsel %vm3333_vm9, %v3736_v23, 0.0  ;;  %5111 = vpow2.f32 %v4417_v51 }
 0xa22   : > { %v3763_v12 = vsel %vm3333_vm9, %v3735_v2, 0.0  ;;  %v3722_v44 = vmul.f32 %v6513_v61, %v6513_v61  ;;  %v4418_v5 = vmul.f32 -1.442695, %v6477_v6  ;;  %5113 = vpow2.f32 %v4416_v58 }
 0xa23   : > { %3764 = vadd.xlane.f32.xlu1 %v3763_v12  ;;  %v3721_v53 = vmul.f32 %v6501_v57, %v6501_v57  ;;  %5115 = vpow2.f32 %v4419_v59  ;;  %v3666_v50 = vmul.f32 1.442695, %v6468_v22  ;;  %v3672_v2 = vmul.f32 1.442695, %v6483_v54 }
 0xa24   : > { %v3738_v24 = vsel %vm6450_vm12, %v3722_v44, 0.0  ;;  %5117 = vpow2.f32 %v3664_v27  ;;  %v3676_v55 = vmul.f32 1.442695, %v6508_v43 }
 0xa25   : > { %v3737_v28 = vsel %vm6450_vm12, %v3721_v53, 0.0  ;;  %3767 = vadd.xlane.f32.xlu0 %v3766_v18  ;;  %v3772_v14 = vsel %vm3333_vm9, %v3738_v24, 0.0  ;;  %5119 = vpow2.f32 %v4418_v5  ;;  %v4423_v18 = vmul.f32 -1.442695, %v6513_v61  ;;  %v3534_v5 = vld [vmem:[%s6621_s17 + $0x8] sm:$0xff] }
 0xa26   : > { %v4918_v60 = vpop.f32.mrb[98].mxu1  ;;  %v3769_v62 = vsel %vm3333_vm9, %v3737_v28, 0.0  ;;  %5121 = vpow2.f32 %v3662_v48  ;;  %v4420_v28 = vmul.f32 -1.442695, %v6489_v11 }
 0xa27   : > { %v3502_v46 = vpop.f32.mrb[99].mxu1  ;;  %v6521_v26 = vadd.f32 %v4918_v60, %v6438_v63  ;;  %3770 = vadd.xlane.f32.xlu1 %v3769_v62  ;;  %v4421_v60 = vmul.f32 -1.442695, %v6508_v43  ;;  %5123 = vpow2.f32 %v3668_v20 }
 0xa28   : > { %v6516_v49 = vadd.f32 %v6438_v63, %v3502_v46  ;;  %5125 = vpow2.f32 %v3666_v50  ;;  %v3670_v46 = vmul.f32 1.442695, %v6477_v6  ;;  %v3536_v50 = vld [vmem:[%s6621_s17 + $0x18] sm:$0xff] }
 0xa29   : > { %v3724_v56 = vmul.f32 %v6521_v26, %v6521_v26  ;;  %3773 = vadd.xlane.f32.xlu0 %v3772_v14  ;;  %v5108_v17 = vpop.eup %5107  ;;  %5127 = vpow2.f32 %v4421_v60  ;;  %v3680_v14 = vmul.f32 1.442695, %v6513_v61 }
 0xa2a   : > { %v3723_v29 = vmul.f32 %v6516_v49, %v6516_v49  ;;  %v5110_v1 = vpop.eup %5109  ;;  %v3615_v12 = vadd.f32 1.0, %v5108_v17  ;;  %5129 = vpow2.f32 %v3672_v2  ;;  %v4424_v58 = vmul.f32 -1.442695, %v6516_v49  ;;  %v3533_v17 = vld [vmem:[%s6621_s17] sm:$0xff]  ;;  %v3535_v2 = vld [vmem:[%s6621_s17 + $0x10] sm:$0xff] }
 0xa2b   : > { %v3740_v10 = vsel %vm6450_vm12, %v3724_v56, 0.0  ;;  %v5112_v53 = vpop.eup %5111  ;;  %v3614_v62 = vadd.f32 1.0, %v5110_v1  ;;  %v3682_v48 = vmul.f32 1.442695, %v6516_v49  ;;  %v3538_v1 = vld [vmem:[%s6621_s17 + $0x28] sm:$0xff] }
 0xa2c   : > { %v3739_v41 = vsel %vm6450_vm12, %v3723_v29, 0.0  ;;  %v3778_v36 = vsel %vm3333_vm9, %v3740_v10, 0.0  ;;  %5131 = vrcp.f32 %v3615_v12  ;;  %v3617_v23 = vadd.f32 1.0, %v5112_v53  ;;  %v3537_v12 = vld [vmem:[%s6621_s17 + $0x20] sm:$0xff] }
 0xa2d   : > { %v4921_v25 = vpop.f32.mrb[100].mxu1  ;;  %v3775_v21 = vsel %vm3333_vm9, %v3739_v41, 0.0  ;;  %3779 = vadd.xlane.f32.xlu0 %v3778_v36  ;;  %5133 = vpow2.f32 %v3670_v46  ;;  %v3674_v29 = vmul.f32 1.442695, %v6489_v11  ;;  %v4422_v36 = vmul.f32 -1.442695, %v6501_v57 }
 0xa2e   : > { %v3512_v37 = vpop.f32.mrb[101].mxu1  ;;  %3776 = vadd.xlane.f32.xlu1 %v3775_v21  ;;  %v6547_v7 = vadd.f32 %v4921_v25, %v6438_v63  ;;  %v5114_v25 = vpop.eup %5113  ;;  %5135 = vpow2.f32 %v4420_v28  ;;  %v3551_v28 = vsel %vm3549_vm13, %v3534_v5, 0.0 }
 0xa2f   : > { %v6536_v3 = vadd.f32 %v6438_v63, %v3512_v37  ;;  %v5116_v37 = vpop.eup %5115  ;;  %5137 = vrcp.f32 %v3614_v62  ;;  %v3616_v41 = vadd.f32 1.0, %v5114_v25  ;;  %v3540_v62 = vld [vmem:[%s6621_s17 + $0x38] sm:$0xff] }
 0xa30   : > { %7224 = vst [vmem:[#allocation3_spill] sm:$0xff] %v6547_v7  ;;  %v3726_v4 = vmul.f32 %v6547_v7, %v6547_v7  ;;  %v6592_v44 = vpop.eup %5117  ;;  %5139 = vpow2.f32 %v3676_v55  ;;  %v4427_v46 = vmul.f32 -1.442695, %v6547_v7  ;;  %v3539_v55 = vld [vmem:[%s6621_s17 + $0x30] sm:$0xff] }
 0xa31   : > { %7223 = vst [vmem:[#allocation2_spill] sm:$0xff] %v6536_v3  ;;  %v4924_v31 = vpop.f32.mrb[102].mxu1  ;;  %v3725_v47 = vmul.f32 %v6536_v3, %v6536_v3  ;;  %v5120_v56 = vpop.eup %5119  ;;  %5141 = vrcp.f32 %v3617_v23 }
 0xa32   : > { %v3522_v16 = vpop.f32.mrb[103].mxu1  ;;  %v6552_v9 = vadd.f32 %v4924_v31, %v6438_v63  ;;  %v6595_v24 = vpop.eup %5121  ;;  %v3619_v31 = vadd.f32 1.0, %v5116_v37  ;;  %5143 = vpow2.f32 %v3674_v29  ;;  %v3618_v10 = vadd.f32 1.0, %v5120_v56 }
 0xa33   : > { %v6555_v34 = vadd.f32 %v6438_v63, %v3522_v16  ;;  %v3741_v15 = vsel %vm6450_vm12, %v3725_v47, 0.0  ;;  %v3742_v63 = vsel %vm6450_vm12, %v3726_v4, 0.0  ;;  %v6597_v21 = vpop.eup %5123  ;;  %5145 = vpow2.f32 %v4423_v18  ;;  %v3541_v18 = vld [vmem:[%s6621_s17 + $0x40] sm:$0xff] }
 0xa34   : > { %7225 = vst [vmem:[#allocation4_spill] sm:$0xff] %v6552_v9  ;;  %v3781_v32 = vsel %vm3333_vm9, %v3741_v15, 0.0  ;;  %v3728_v38 = vmul.f32 %v6552_v9, %v6552_v9  ;;  %v3784_v8 = vsel %vm3333_vm9, %v3742_v63, 0.0  ;;  %v6600_v16 = vpop.eup %5125  ;;  %5147 = vrcp.f32 %v3616_v41 }
 0xa35   : > { %7226 = vst [vmem:[#allocation5_spill] sm:$0xff] %v6555_v34  ;;  %3782 = vadd.xlane.f32.xlu1 %v3781_v32  ;;  %v3727_v52 = vmul.f32 %v6555_v34, %v6555_v34  ;;  %3785 = vadd.xlane.f32.xlu0 %v3784_v8  ;;  %v5128_v47 = vpop.eup %5127  ;;  %5149 = vrcp.f32 %v3619_v31  ;;  %v3678_v32 = vmul.f32 1.442695, %v6501_v57  ;;  %v3550_v37 = vsel %vm3549_vm13, %v3533_v17, 0.0 }
 0xa36   : > { %v3744_v30 = vsel %vm6450_vm12, %v3728_v38, 0.0  ;;  %v6603_v15 = vpop.eup %5129  ;;  %5151 = vpow2.f32 %v3680_v14  ;;  %v3621_v63 = vadd.f32 1.0, %v5128_v47  ;;  %v3553_v29 = vsel %vm3549_vm13, %v3536_v50, 0.0 }
 0xa37   : > { %v3743_v13 = vsel %vm6450_vm12, %v3727_v52, 0.0  ;;  %v3790_v19 = vsel %vm3333_vm9, %v3744_v30, 0.0  ;;  %v6606_v4 = vpop.eup %5131  ;;  %v4425_v52 = vmul.f32 -1.442695, %v6521_v26  ;;  %5153 = vrcp.f32 %v3618_v10 }
 0xa38   : > { %v3787_v40 = vsel %vm3333_vm9, %v3743_v13, 0.0  ;;  %v6609_v38 = vpop.eup %5133  ;;  %5155 = vpow2.f32 %v4422_v36  ;;  %v3684_v30 = vmul.f32 1.442695, %v6521_v26  ;;  %v3688_v56 = vmul.f32 1.442695, %v6547_v7 }
 0xa39   : > { %3788 = vadd.xlane.f32.xlu1 %v3787_v40  ;;  %3791 = vadd.xlane.f32.xlu0 %v3790_v19  ;;  %v5136_v8 = vpop.eup %5135  ;;  %5157 = vpow2.f32 %v3678_v32  ;;  %v3552_v14 = vsel %vm3549_vm13, %v3535_v2, 0.0  ;;  %v3555_v10 = vsel %vm3549_vm13, %v3538_v1, 0.0  ;;  %v3554_v47 = vsel %vm3549_vm13, %v3537_v12, 0.0 }
 0xa3a   : > { %v6612_v13 = vpop.eup %5137  ;;  %5159 = vpow2.f32 %v4425_v52  ;;  %v3620_v42 = vadd.f32 1.0, %v5136_v8  ;;  %v3557_v32 = vsel %vm3549_vm13, %v3540_v62, 0.0  ;;  %v3556_v52 = vsel %vm3549_vm13, %v3539_v55, 0.0 }
 0xa3b   : > { %v6614_v40 = vpop.eup %5139  ;;  %5161 = vrcp.f32 %v3621_v63  ;;  %v4426_v63 = vmul.f32 -1.442695, %v6536_v3  ;;  %v6677_v5 = vadd.f32 %v3550_v37, %v6446_v0  ;;  %v6683_v17 = vadd.f32 %v3552_v14, %v6468_v22 }
 0xa3c   : > { %v6624_v19 = vpop.eup %5141  ;;  %v6688_v1 = vadd.f32 %v3555_v10, %v6483_v54  ;;  %v6691_v12 = vadd.f32 %v3554_v47, %v6477_v6  ;;  %v4429_v55 = vmul.f32 -1.442695, %v6552_v9 }
 0xa3d   : > { %v6628_v51 = vpop.eup %5143 }
 0xa3e   : > { %v5146_v27 = vpop.eup %5145 }
 0xa3f   : > { %v6637_v20 = vpop.eup %5147  ;;  %v3623_v25 = vadd.f32 1.0, %v5146_v27 }
 0xa40   : > { %v6641_v60 = vpop.eup %5149 }
 0xa41   : > { %v6647_v53 = vpop.eup %5151 }
 0xa42   : > { %v6652_v23 = vpop.eup %5153 }
 0xa43   : > { %v5156_v31 = vpop.eup %5155 }
 0xa44   : > { %v6664_v36 = vpop.eup %5157 }
 0xa45   : > { %v5160_v8 = vpop.eup %5159 }
 0xa46   : > { %v6674_v27 = vpop.eup %5161 }
 0xaa0   : > { %v6626_v45 = vpop.xlane.xlu1 %3749 }
 0xaa1   : > { %5163 = vrsqrt.f32 %v6626_v45  ;;  %v6632_v59 = vpop.xlane.xlu0 %3746  ;;  %vm3802_vm14 = vcmp.eq.f32.partialorder %v6626_v45, inf  ;;  %vm3804_vm15 = vcmp.eq.f32.partialorder %v6626_v45, 0.0 }
 0xaa2   : > { %5165 = vrsqrt.f32 %v6632_v59  ;;  %vm3795_vm0 = vcmp.eq.f32.partialorder %v6632_v59, inf  ;;  %v3798_v14 = vand.u32 2147483648, %v6632_v59  ;;  %vm3797_vm1 = vcmp.eq.f32.partialorder %v6632_v59, 0.0 }
 0xaa3   : > { %5167 = vpow2.f32 %v3684_v30  ;;  %v6670_v30 = vadd.f32 %v3551_v28, %v6443_v33 }
 0xaa4   : > { %5169 = vrcp.f32 %v3620_v42  ;;  %v3558_v42 = vsel %vm3549_vm13, %v3541_v18, 0.0 }
 0xaa5   : > { %5171 = vpow2.f32 %v4424_v58  ;;  %v3686_v58 = vmul.f32 1.442695, %v6536_v3 }
 0xaa6   : > { %5173 = vpow2.f32 %v3682_v48  ;;  %v6658_v41 = vpop.xlane.xlu0 %3755  ;;  %v6680_v48 = vadd.f32 %v3553_v29, %v6464_v39  ;;  %v3805_v29 = vand.u32 2147483648, %v6626_v45 }
 0xaa7   : > { %5175 = vrsqrt.f32 %v6658_v41  ;;  %vm3816_vm2 = vcmp.eq.f32.partialorder %v6658_v41, inf  ;;  %vm3818_vm3 = vcmp.eq.f32.partialorder %v6658_v41, 0.0 }
 0xaa8   : > { %5177 = vpow2.f32 %v4427_v46  ;;  %v3622_v46 = vadd.f32 1.0, %v5156_v31 }
 0xaa9   : > { %5179 = vrcp.f32 %v3623_v25 }
 0xaaa   : > { %5181 = vpow2.f32 %v3688_v56  ;;  %v6685_v50 = vpop.xlane.xlu0 %3752 }
 0xaab   : > { %v5164_v2 = vpop.eup %5163  ;;  %5183 = vrsqrt.f32 %v6685_v50  ;;  %vm3809_vm7 = vcmp.eq.f32.partialorder %v6685_v50, inf  ;;  %vm3811_vm8 = vcmp.eq.f32.partialorder %v6685_v50, 0.0 }
 0xaac   : > { %v5166_v28 = vpop.eup %5165  ;;  %5185 = vpow2.f32 %v4426_v63  ;;  %v3801_v25 = vmul.f32 %v5164_v2, %v6626_v45 }
 0xaad   : > { %v6697_v37 = vpop.eup %5167  ;;  %5187 = vpow2.f32 %v3686_v58  ;;  %v3794_v18 = vmul.f32 %v5166_v28, %v6632_v59  ;;  %v6710_v58 = vpop.xlane.xlu1 %3758  ;;  %v6715_v28 = vadd.f32 %v3557_v32, %v6508_v43 }
 0xaae   : > { %v6702_v56 = vpop.eup %5169  ;;  %v3803_v31 = vsel %vm3802_vm14, %v6626_v45, %v3801_v25  ;;  %5189 = vrcp.f32 %v3622_v46  ;;  %v6720_v46 = vadd.f32 %v3556_v52, %v6489_v11  ;;  %v6729_v52 = vpop.xlane.xlu0 %3761  ;;  %vm3823_vm10 = vcmp.eq.f32.partialorder %v6710_v58, inf }
 0xaaf   : > { %v5172_v10 = vpop.eup %5171  ;;  %v3806_v47 = vsel %vm3804_vm15, %v3805_v29, %v3803_v31  ;;  %v3796_v63 = vsel %vm3795_vm0, %v6632_v59, %v3794_v18  ;;  %5191 = vrsqrt.f32 %v6710_v58  ;;  %v3625_v31 = vadd.f32 1.0, %v5160_v8 }
 0xab0   : > { %v6712_v2 = vpop.eup %5173  ;;  %v3906_v25 = vmax.f32 %v3806_v47, 1e-12  ;;  %v3799_v45 = vsel %vm3797_vm1, %v3798_v14, %v3796_v63  ;;  %5193 = vpow2.f32 %v4429_v55  ;;  %v3692_v14 = vmul.f32 1.442695, %v6552_v9 }
 0xab1   : > { %v5176_v62 = vpop.eup %5175  ;;  %v3905_v29 = vmax.f32 %v3799_v45, 1e-12  ;;  %v3819_v47 = vand.u32 2147483648, %v6658_v41  ;;  %v6734_v63 = vadd.f32 %v3558_v42, %v6501_v57  ;;  %v3624_v45 = vadd.f32 1.0, %v5172_v10 }
 0xab2   : > { %v5178_v59 = vpop.eup %5177  ;;  %5195 = vrcp.f32 %v3906_v25  ;;  %v3815_v32 = vmul.f32 %v5176_v62, %v6658_v41  ;;  %v6738_v62 = vpop.xlane.xlu1 %3764  ;;  %vm3825_vm12 = vcmp.eq.f32.partialorder %v6710_v58, 0.0  ;;  %vm3830_vm14 = vcmp.eq.f32.partialorder %v6729_v52, inf }
 0xab3   : > { %v6724_v3 = vpop.eup %5179  ;;  %5197 = vrcp.f32 %v3905_v29  ;;  %v4428_v29 = vmul.f32 -1.442695, %v6555_v34  ;;  %vm3832_vm15 = vcmp.eq.f32.partialorder %v6729_v52, 0.0  ;;  %vm3837_vm0 = vcmp.eq.f32.partialorder %v6738_v62, inf }
 0xab4   : > { %7227 = vst [vmem:[#allocation6_spill] sm:$0xff] %v6724_v3  ;;  %v6731_v55 = vpop.eup %5181  ;;  %v3817_v8 = vsel %vm3816_vm2, %v6658_v41, %v3815_v32  ;;  %5199 = vrsqrt.f32 %v6729_v52  ;;  %vm3839_vm1 = vcmp.eq.f32.partialorder %v6738_v62, 0.0 }
 0xab5   : > { %7228 = vst [vmem:[#allocation7_spill] sm:$0xff] %v6731_v55  ;;  %v5184_v25 = vpop.eup %5183  ;;  %v3820_v18 = vsel %vm3818_vm3, %v3819_v47, %v3817_v8  ;;  %5201 = vrsqrt.f32 %v6738_v62  ;;  %v3812_v47 = vand.u32 2147483648, %v6685_v50  ;;  %v6766_v8 = vmul.f32 1.442695, %v6555_v34 }
 0xab6   : > { %v6745_v42 = vpop.eup %5185  ;;  %5203 = vrcp.f32 %v3625_v31  ;;  %v3908_v41 = vmax.f32 %v3820_v18, 1e-12  ;;  %v3808_v7 = vmul.f32 %v5184_v25, %v6685_v50  ;;  %v6762_v32 = vpop.xlane.xlu1 %3770 }
 0xab7   : > { %v6750_v9 = vpop.eup %5187  ;;  %5205 = vpow2.f32 %v3692_v14  ;;  %vm3851_vm2 = vcmp.eq.f32.partialorder %v6762_v32, inf  ;;  %vm3853_vm3 = vcmp.eq.f32.partialorder %v6762_v32, 0.0 }
 0xab8   : > { %7229 = vst [vmem:[#allocation8_spill] sm:$0xff] %v6750_v9  ;;  %5207 = vrcp.f32 %v3908_v41  ;;  %v3810_v31 = vsel %vm3809_vm7, %v6685_v50, %v3808_v7  ;;  %v6758_v18 = vpop.eup %5189  ;;  %v6771_v50 = vadd.f32 1.0, %v5178_v59 }
 0xab9   : > { %5209 = vpow2.f32 %v4428_v29  ;;  %v3813_v14 = vsel %vm3811_vm8, %v3812_v47, %v3810_v31  ;;  %v5192_v55 = vpop.eup %5191  ;;  %v3826_v47 = vand.u32 2147483648, %v6710_v58  ;;  %v6778_v31 = vpop.xlane.xlu0 %3767 }
 0xaba   : > { %v3907_v41 = vmax.f32 %v3813_v14, 1e-12  ;;  %5211 = vrsqrt.f32 %v6762_v32  ;;  %v6769_v7 = vpop.eup %5193  ;;  %v3822_v25 = vmul.f32 %v5192_v55, %v6710_v58  ;;  %vm3844_vm7 = vcmp.eq.f32.partialorder %v6778_v31, inf }
 0xabb   : > { %5213 = vrcp.f32 %v3624_v45  ;;  %vm3846_vm8 = vcmp.eq.f32.partialorder %v6778_v31, 0.0 }
 0xabc   : > { %v5196_v29 = vpop.eup %5195  ;;  %5215 = vrcp.f32 %v3907_v41  ;;  %v3824_v59 = vsel %vm3823_vm10, %v6710_v58, %v3822_v25  ;;  %v3840_v58 = vand.u32 2147483648, %v6738_v62 }
 0xabd   : > { %v5198_v14 = vpop.eup %5197  ;;  %v3924_v45 = vmul.f32 %v5196_v29, %v6443_v33  ;;  %5217 = vrsqrt.f32 %v6778_v31  ;;  %v3827_v10 = vsel %vm3825_vm12, %v3826_v47, %v3824_v59  ;;  %v7231_v47 = vmin.f32 %v6592_v44, 0.05  ;;  %v6810_v59 = vpop.xlane.xlu1 %3776 }
 0xabe   : > { %v5200_v55 = vpop.eup %5199  ;;  %v3922_v9 = vmul.f32 %v5198_v14, %v6446_v0  ;;  %v3909_v29 = vmax.f32 %v3827_v10, 1e-12  ;;  %vm3865_vm10 = vcmp.eq.f32.partialorder %v6810_v59, inf  ;;  %vm3867_vm12 = vcmp.eq.f32.partialorder %v6810_v59, 0.0 }
 0xabf   : > { %v5202_v41 = vpop.eup %5201  ;;  %v3973_v34 = vsel %vm3711_vm11, %v3924_v45, %v6443_v33  ;;  %v3829_v25 = vmul.f32 %v5200_v55, %v6729_v52  ;;  %v3833_v45 = vand.u32 2147483648, %v6729_v52  ;;  %v6812_v55 = vpop.xlane.xlu0 %3773 }
 0xac0   : > { %v6792_v3 = vpop.eup %5203  ;;  %v3989_v14 = vsel %vm3971_vm4, %v7231_v47, %v3973_v34  ;;  %v3972_v33 = vsel %vm3711_vm11, %v3922_v9, %v6446_v0  ;;  %v3836_v10 = vmul.f32 %v5202_v41, %v6738_v62  ;;  %v7232_v34 = vmin.f32 %v6595_v24, 0.05 }
 0xac1   : > { %7230 = vst [vmem:[#allocation9_spill] sm:$0xff] %v6792_v3  ;;  %v6814_v3 = vpop.eup %5205  ;;  %v4005_v44 = vsel %vm3970_vm5, %v6606_v4, %v3989_v14  ;;  %5219 = vrcp.f32 %v3909_v29  ;;  %v3831_v9 = vsel %vm3830_vm14, %v6729_v52, %v3829_v25  ;;  %vm3858_vm14 = vcmp.eq.f32.partialorder %v6812_v55, inf }
 0xac2   : > { %v3988_v0 = vsel %vm3971_vm4, %v7232_v34, %v3972_v33  ;;  %v5208_v41 = vpop.eup %5207  ;;  %v4021_v47 = vsel %vm3953_vm6, %v6670_v30, %v4005_v44  ;;  %v3838_v24 = vsel %vm3837_vm0, %v6738_v62, %v3836_v10  ;;  %v3834_v29 = vsel %vm3832_vm15, %v3833_v45, %v3831_v9 }
 0xac3   : > { %v4004_v4 = vsel %vm3970_vm5, %v6612_v13, %v3988_v0  ;;  %v6837_v14 = vpop.eup %5209  ;;  %4037 = vst.msk [vmem:[%s6799_s19 + $0x8] sm:$0xff] %vm3333_vm9, %v4021_v47  ;;  %v3928_v30 = vmul.f32 %v5208_v41, %v6464_v39  ;;  %v3841_v13 = vsel %vm3839_vm1, %v3840_v58, %v3838_v24  ;;  %v3910_v33 = vmax.f32 %v3834_v29, 1e-12  ;;  %v6854_v45 = vpop.xlane.xlu0 %3779 }
 0xac4   : > { %v4020_v25 = vsel %vm3953_vm6, %v6677_v5, %v4004_v4  ;;  %v5212_v44 = vpop.eup %5211  ;;  %v6848_v10 = vadd.f32 1.0, %v6745_v42  ;;  %v3911_v52 = vmax.f32 %v3841_v13, 1e-12  ;;  %5221 = vrsqrt.f32 %v6810_v59  ;;  %v6869_v41 = vpop.xlane.xlu1 %3782 }
 0xac5   : > { %4036 = vst.msk [vmem:[%s6799_s19] sm:$0xff] %vm3333_vm9, %v4020_v25  ;;  %v6856_v5 = vpop.eup %5213  ;;  %v3975_v62 = vsel %vm3711_vm11, %v3928_v30, %v6464_v39  ;;  %5223 = vrcp.f32 %v3910_v33  ;;  %v3850_v58 = vmul.f32 %v5212_v44, %v6762_v32  ;;  %v7233_v34 = vmin.f32 %v6597_v21, 0.05 }
 0xac6   : > { %v5216_v42 = vpop.eup %5215  ;;  %5225 = vrcp.f32 %v3911_v52  ;;  %v3854_v9 = vand.u32 2147483648, %v6762_v32  ;;  %vm3860_vm15 = vcmp.eq.f32.partialorder %v6812_v55, 0.0  ;;  %vm3872_vm0 = vcmp.eq.f32.partialorder %v6854_v45, inf }
 0xac7   : > { %v3991_v0 = vsel %vm3971_vm4, %v7233_v34, %v3975_v62  ;;  %v5218_v39 = vpop.eup %5217  ;;  %v3926_v4 = vmul.f32 %v5216_v42, %v6468_v22  ;;  %v3852_v21 = vsel %vm3851_vm2, %v6762_v32, %v3850_v58  ;;  %5227 = vrsqrt.f32 %v6812_v55  ;;  %v6891_v13 = vpop.xlane.xlu0 %3785 }
 0xac8   : > { %v4007_v47 = vsel %vm3970_vm5, %v6624_v19, %v3991_v0  ;;  %v3855_v29 = vsel %vm3853_vm3, %v3854_v9, %v3852_v21  ;;  %v3843_v25 = vmul.f32 %v5218_v39, %v6778_v31  ;;  %v3847_v32 = vand.u32 2147483648, %v6778_v31  ;;  %v6911_v34 = vpop.xlane.xlu1 %3788 }
 0xac9   : > { %v4023_v24 = vsel %vm3953_vm6, %v6680_v48, %v4007_v47  ;;  %v3974_v19 = vsel %vm3711_vm11, %v3926_v4, %v6468_v22  ;;  %v3913_v30 = vmax.f32 %v3855_v29, 1e-12  ;;  %5229 = vrsqrt.f32 %v6854_v45 }
 0xaca   : > { %4039 = vst.msk [vmem:[%s6799_s19 + $0x18] sm:$0xff] %vm3333_vm9, %v4023_v24  ;;  %v7234_v48 = vmin.f32 %v6600_v16, 0.05  ;;  %v3845_v44 = vsel %vm3844_vm7, %v6778_v31, %v3843_v25  ;;  %v3868_v16 = vand.u32 2147483648, %v6810_v59  ;;  %vm3874_vm1 = vcmp.eq.f32.partialorder %v6854_v45, 0.0 }
 0xacb   : > { %v5220_v22 = vpop.eup %5219  ;;  %5231 = vrcp.f32 %v3913_v30  ;;  %v3848_v62 = vsel %vm3846_vm8, %v3847_v32, %v3845_v44  ;;  %v6924_v9 = vpop.xlane.xlu0 %3791  ;;  %v7235_v47 = vmin.f32 %v6609_v38, 0.05  ;;  %v3875_v24 = vand.u32 2147483648, %v6854_v45 }
 0xacc   : > { %v3990_v33 = vsel %vm3971_vm4, %v7234_v48, %v3974_v19  ;;  %v3930_v58 = vmul.f32 %v5220_v22, %v6477_v6  ;;  %v3912_v31 = vmax.f32 %v3848_v62, 1e-12  ;;  %5233 = vrsqrt.f32 %v6869_v41 }
 0xacd   : > { %v4006_v52 = vsel %vm3970_vm5, %v6637_v20, %v3990_v33  ;;  %v3861_v20 = vand.u32 2147483648, %v6812_v55  ;;  %5235 = vrsqrt.f32 %v6891_v13  ;;  %vm3879_vm2 = vcmp.eq.f32.partialorder %v6869_v41, inf }
 0xace   : > { %v4022_v42 = vsel %vm3953_vm6, %v6683_v17, %v4006_v52  ;;  %v5222_v0 = vpop.eup %5221  ;;  %v3976_v17 = vsel %vm3711_vm11, %v3930_v58, %v6477_v6  ;;  %5237 = vrcp.f32 %v3912_v31  ;;  %v3882_v38 = vand.u32 2147483648, %v6869_v41 }
 0xacf   : > { %4038 = vst.msk [vmem:[%s6799_s19 + $0x10] sm:$0xff] %vm3333_vm9, %v4022_v42  ;;  %v5224_v39 = vpop.eup %5223  ;;  %v3992_v4 = vsel %vm3971_vm4, %v7235_v47, %v3976_v17  ;;  %v3864_v21 = vmul.f32 %v5222_v0, %v6810_v59  ;;  %5239 = vrsqrt.f32 %v6911_v34  ;;  %vm3881_vm3 = vcmp.eq.f32.partialorder %v6869_v41, 0.0 }
 0xad0   : > { %v5226_v6 = vpop.eup %5225  ;;  %v4008_v29 = vsel %vm3970_vm5, %v6652_v23, %v3992_v4  ;;  %v3932_v25 = vmul.f32 %v5224_v39, %v6483_v54  ;;  %vm3886_vm7 = vcmp.eq.f32.partialorder %v6891_v13, inf  ;;  %5241 = vrsqrt.f32 %v6924_v9 }
 0xad1   : > { %v5228_v19 = vpop.eup %5227  ;;  %v4024_v30 = vsel %vm3953_vm6, %v6691_v12, %v4008_v29  ;;  %v3934_v32 = vmul.f32 %v5226_v6, %v6489_v11  ;;  %v3866_v48 = vsel %vm3865_vm10, %v6810_v59, %v3864_v21  ;;  %vm3888_vm8 = vcmp.eq.f32.partialorder %v6891_v13, 0.0 }
 0xad2   : > { %4040 = vst.msk [vmem:[%s6799_s19 + $0x20] sm:$0xff] %vm3333_vm9, %v4024_v30  ;;  %v3977_v23 = vsel %vm3711_vm11, %v3932_v25, %v6483_v54  ;;  %v3869_v12 = vsel %vm3867_vm12, %v3868_v16, %v3866_v48  ;;  %v3857_v33 = vmul.f32 %v5228_v19, %v6812_v55  ;;  %v7236_v52 = vmin.f32 %v6603_v15, 0.05 }
 0xad3   : > { %v5230_v44 = vpop.eup %5229  ;;  %v3978_v22 = vsel %vm3711_vm11, %v3934_v32, %v6489_v11  ;;  %v3915_v58 = vmax.f32 %v3869_v12, 1e-12  ;;  %v3889_v54 = vand.u32 2147483648, %v6891_v13  ;;  %v7237_v59 = vmin.f32 %v6628_v51, 0.05 }
 0xad4   : > { %v3993_v62 = vsel %vm3971_vm4, %v7236_v52, %v3977_v23  ;;  %v3859_v11 = vsel %vm3858_vm14, %v6812_v55, %v3857_v33  ;;  %v3871_v15 = vmul.f32 %v5230_v44, %v6854_v45  ;;  %vm3893_vm10 = vcmp.eq.f32.partialorder %v6911_v34, inf }
 0xad5   : > { %v3994_v16 = vsel %vm3971_vm4, %v7237_v59, %v3978_v22  ;;  %v4009_v42 = vsel %vm3970_vm5, %v6641_v60, %v3993_v62  ;;  %v5232_v31 = vpop.eup %5231  ;;  %5243 = vrcp.f32 %v3915_v58  ;;  %v3862_v60 = vsel %vm3860_vm15, %v3861_v20, %v3859_v11  ;;  %v3542_v58 = vld [vmem:[%s6621_s17 + $0x48] sm:$0xff] }
 0xad6   : > { %v4010_v0 = vsel %vm3970_vm5, %v6702_v56, %v3994_v16  ;;  %v4025_v51 = vsel %vm3953_vm6, %v6688_v1, %v4009_v42  ;;  %v5234_v17 = vpop.eup %5233  ;;  %v3938_v47 = vmul.f32 %v5232_v31, %v6501_v57  ;;  %v3914_v56 = vmax.f32 %v3862_v60, 1e-12 }
 0xad7   : > { %v4026_v39 = vsel %vm3953_vm6, %v6720_v46, %v4010_v0  ;;  %4041 = vst.msk [vmem:[%s6799_s19 + $0x28] sm:$0xff] %vm3333_vm9, %v4025_v51  ;;  %v3873_v1 = vsel %vm3872_vm0, %v6854_v45, %v3871_v15  ;;  %v5236_v4 = vpop.eup %5235  ;;  %v3878_v20 = vmul.f32 %v5234_v17, %v6869_v41  ;;  %vm3895_vm12 = vcmp.eq.f32.partialorder %v6911_v34, 0.0  ;;  %v3544_v51 = vld [vmem:[%s6621_s17 + $0x58] sm:$0xff] }
 0xad8   : > { %4042 = vst.msk [vmem:[%s6799_s19 + $0x30] sm:$0xff] %vm3333_vm9, %v4026_v39  ;;  %v3876_v55 = vsel %vm3874_vm1, %v3875_v24, %v3873_v1  ;;  %v3896_v46 = vand.u32 2147483648, %v6911_v34  ;;  %v5238_v21 = vpop.eup %5237  ;;  %v3980_v6 = vsel %vm3711_vm11, %v3938_v47, %v6501_v57  ;;  %5245 = vrcp.f32 %v3914_v56  ;;  %v3545_v56 = vld [vmem:[%s6621_s17 + $0x60] sm:$0xff] }
 0xad9   : > { %v3916_v29 = vmax.f32 %v3876_v55, 1e-12  ;;  %v3885_v25 = vmul.f32 %v5236_v4, %v6891_v13  ;;  %v5240_v19 = vpop.eup %5239  ;;  %v7238_v45 = vmin.f32 %v6664_v36, 0.05  ;;  %v3936_v30 = vmul.f32 %v5238_v21, %v6508_v43 }
 0xada   : > { %v3880_v32 = vsel %vm3879_vm2, %v6869_v41, %v3878_v20  ;;  %vm3900_vm14 = vcmp.eq.f32.partialorder %v6924_v9, inf  ;;  %v5242_v23 = vpop.eup %5241  ;;  %v3543_v41 = vld [vmem:[%s6621_s17 + $0x50] sm:$0xff]  ;;  %vm3902_vm15 = vcmp.eq.f32.partialorder %v6924_v9, 0.0  ;;  %v3704_v0 = vmin.f32 %v6712_v2, 0.05  ;;  %v3546_v20 = vld [vmem:[%s6621_s17 + $0x68] sm:$0xff] }
 0xadb   : > { %v3996_v24 = vsel %vm3971_vm4, %v7238_v45, %v3980_v6  ;;  %5247 = vrcp.f32 %v3916_v29  ;;  %v3883_v48 = vsel %vm3881_vm3, %v3882_v38, %v3880_v32  ;;  %v3887_v36 = vsel %vm3886_vm7, %v6891_v13, %v3885_v25  ;;  %v7240_v6 = vld [vmem:[#allocation6_spill] sm:$0xff] }
 0xadc   : > { %v4012_v57 = vsel %vm3970_vm5, %v6758_v18, %v3996_v24  ;;  %v3979_v33 = vsel %vm3711_vm11, %v3936_v30, %v6508_v43  ;;  %v3917_v44 = vmax.f32 %v3883_v48, 1e-12  ;;  %v3890_v18 = vsel %vm3888_vm8, %v3889_v54, %v3887_v36  ;;  %v7241_v24 = vld [vmem:[#allocation2_spill] sm:$0xff]  ;;  %v7242_v48 = vld [vmem:[#allocation8_spill] sm:$0xff] }
 0xadd   : > { %v4028_v12 = vsel %vm3953_vm6, %v6734_v63, %v4012_v57  ;;  %v7239_v38 = vmin.f32 %v6614_v40, 0.05  ;;  %v3918_v52 = vmax.f32 %v3890_v18, 1e-12  ;;  %v3892_v63 = vmul.f32 %v5240_v19, %v6911_v34  ;;  %v7245_v18 = vld [vmem:[#allocation7_spill] sm:$0xff] }
 0xade   : > { %4044 = vst.msk [vmem:[%s6799_s19 + $0x40] sm:$0xff] %vm3333_vm9, %v4028_v12  ;;  %v3899_v62 = vmul.f32 %v5242_v23, %v6924_v9  ;;  %5249 = vrcp.f32 %v3917_v44  ;;  %v3903_v13 = vand.u32 2147483648, %v6924_v9  ;;  %v3560_v16 = vsel %vm3549_vm13, %v3543_v41, 0.0  ;;  %v7243_v23 = vld [vmem:[#allocation9_spill] sm:$0xff]  ;;  %v7244_v12 = vld [vmem:[#allocation3_spill] sm:$0xff] }
 0xadf   : > { %v3995_v22 = vsel %vm3971_vm4, %v7239_v38, %v3979_v33  ;;  %5251 = vrcp.f32 %v3918_v52  ;;  %v3894_v54 = vsel %vm3893_vm10, %v6911_v34, %v3892_v63  ;;  %v5244_v59 = vpop.eup %5243  ;;  %v3964_v60 = vadd.f32 %v3560_v16, %v6516_v49  ;;  %v3547_v38 = vld [vmem:[%s6621_s17 + $0x70] sm:$0xff] }
 0xae0   : > { %v4011_v43 = vsel %vm3970_vm5, %v6674_v27, %v3995_v22  ;;  %v3901_v27 = vsel %vm3900_vm14, %v6924_v9, %v3899_v62  ;;  %5253 = vpow2.f32 %v6766_v8  ;;  %v3942_v11 = vmul.f32 %v5244_v59, %v6516_v49 }
 0xae1   : > { %v4027_v40 = vsel %vm3953_vm6, %v6715_v28, %v4011_v43  ;;  %v3897_v28 = vsel %vm3895_vm12, %v3896_v46, %v3894_v54  ;;  %v3904_v42 = vsel %vm3902_vm15, %v3903_v13, %v3901_v27  ;;  %5255 = vrcp.f32 %v6771_v50  ;;  %v3548_v43 = vld [vmem:[%s6621_s17 + $0x78] sm:$0xff] }
 0xae2   : > { %4043 = vst.msk [vmem:[%s6799_s19 + $0x38] sm:$0xff] %vm3333_vm9, %v4027_v40  ;;  %v3919_v15 = vmax.f32 %v3897_v28, 1e-12  ;;  %v3920_v31 = vmax.f32 %v3904_v42, 1e-12  ;;  %v3559_v9 = vsel %vm3549_vm13, %v3542_v58, 0.0  ;;  %5257 = vrcp.f32 %v6848_v10  ;;  %v5246_v8 = vpop.eup %5245 }
 0xae3   : > { %v3628_v34 = vadd.f32 1.0, %v6837_v14  ;;  %v3982_v50 = vsel %vm3711_vm11, %v3942_v11, %v6516_v49  ;;  %v3629_v17 = vadd.f32 1.0, %v6769_v7  ;;  %v3940_v10 = vmul.f32 %v5246_v8, %v6513_v61 }
 0xae4   : > { %5259 = vrcp.f32 %v3919_v15  ;;  %v3998_v2 = vsel %vm3971_vm4, %v3704_v0, %v3982_v50  ;;  %v3703_v47 = vmin.f32 %v6647_v53, 0.05  ;;  %v3561_v49 = vsel %vm3549_vm13, %v3544_v51, 0.0  ;;  %v7246_v15 = vld [vmem:[#allocation5_spill] sm:$0xff]  ;;  %v7247_v51 = vld [vmem:[#allocation4_spill] sm:$0xff] }
 0xae5   : > { %5261 = vrcp.f32 %v3920_v31  ;;  %v5248_v39 = vpop.eup %5247  ;;  %v4014_v14 = vsel %vm3970_vm5, %v6856_v5, %v3998_v2  ;;  %v3981_v1 = vsel %vm3711_vm11, %v3940_v10, %v6513_v61  ;;  %v3963_v55 = vadd.f32 %v3559_v9, %v6513_v61 }
 0xae6   : > { %v4030_v7 = vsel %vm3953_vm6, %v3964_v60, %v4014_v14  ;;  %v3944_v4 = vmul.f32 %v5248_v39, %v6521_v26  ;;  %v3705_v53 = vmin.f32 %v6697_v37, 0.05  ;;  %5263 = vrcp.f32 %v3628_v34 }
 0xae7   : > { %4046 = vst.msk [vmem:[%s6799_s19 + $0x50] sm:$0xff] %vm3333_vm9, %v4030_v7  ;;  %v3997_v5 = vsel %vm3971_vm4, %v3703_v47, %v3981_v1  ;;  %v3562_v21 = vsel %vm3549_vm13, %v3545_v56, 0.0  ;;  %5265 = vrcp.f32 %v3629_v17  ;;  %v3965_v25 = vadd.f32 %v3561_v49, %v6521_v26 }
 0xae8   : > { %v5250_v46 = vpop.eup %5249  ;;  %v4013_v29 = vsel %vm3970_vm5, %v7240_v6, %v3997_v5  ;;  %v3983_v61 = vsel %vm3711_vm11, %v3944_v4, %v6521_v26  ;;  %v3563_v57 = vsel %vm3549_vm13, %v3546_v20, 0.0  ;;  %v3706_v36 = vmin.f32 %v7242_v48, 0.05 }
 0xae9   : > { %v5252_v37 = vpop.eup %5251  ;;  %v4029_v19 = vsel %vm3953_vm6, %v3963_v55, %v4013_v29  ;;  %v3999_v45 = vsel %vm3971_vm4, %v3705_v53, %v3983_v61  ;;  %v3946_v30 = vmul.f32 %v5250_v46, %v7241_v24  ;;  %v3707_v41 = vmin.f32 %v7245_v18, 0.05 }
 0xaea   : > { %v5254_v32 = vpop.eup %5253  ;;  %4045 = vst.msk [vmem:[%s6799_s19 + $0x48] sm:$0xff] %vm3333_vm9, %v4029_v19  ;;  %v4015_v26 = vsel %vm3970_vm5, %v7243_v23, %v3999_v45  ;;  %v3948_v33 = vmul.f32 %v5252_v37, %v7244_v12  ;;  %v3966_v62 = vadd.f32 %v3562_v21, %v7241_v24  ;;  %v3967_v54 = vadd.f32 %v3563_v57, %v7244_v12 }
 0xaeb   : > { %v5256_v44 = vpop.eup %5255  ;;  %v4031_v22 = vsel %vm3953_vm6, %v3965_v25, %v4015_v26  ;;  %v3984_v52 = vsel %vm3711_vm11, %v3946_v30, %v7241_v24  ;;  %v3564_v28 = vsel %vm3549_vm13, %v3547_v38, 0.0  ;;  %v3565_v9 = vsel %vm3549_vm13, %v3548_v43, 0.0 }
 0xaec   : > { %v5258_v63 = vpop.eup %5257  ;;  %4047 = vst.msk [vmem:[%s6799_s19 + $0x58] sm:$0xff] %vm3333_vm9, %v4031_v22  ;;  %v4000_v13 = vsel %vm3971_vm4, %v3706_v36, %v3984_v52  ;;  %v3985_v58 = vsel %vm3711_vm11, %v3948_v33, %v7244_v12  ;;  %v3708_v0 = vmin.f32 %v5254_v32, 0.05  ;;  %v3709_v34 = vmin.f32 %v6814_v3, 0.05 }
 0xaed   : > { %v4016_v27 = vsel %vm3970_vm5, %v5258_v63, %v4000_v13  ;;  %v4001_v59 = vsel %vm3971_vm4, %v3707_v41, %v3985_v58  ;;  %v3968_v2 = vadd.f32 %v3564_v28, %v7246_v15  ;;  %v3969_v56 = vadd.f32 %v3565_v9, %v7247_v51 }
 0xaee   : > { %v5260_v40 = vpop.eup %5259  ;;  %v4032_v42 = vsel %vm3953_vm6, %v3966_v62, %v4016_v27  ;;  %v4017_v11 = vsel %vm3970_vm5, %v5256_v44, %v4001_v59 }
 0xaef   : > { %v5262_v16 = vpop.eup %5261  ;;  %v3950_v31 = vmul.f32 %v5260_v40, %v7246_v15  ;;  %4048 = vst.msk [vmem:[%s6799_s19 + $0x60] sm:$0xff] %vm3333_vm9, %v4032_v42  ;;  %v4033_v8 = vsel %vm3953_vm6, %v3967_v54, %v4017_v11 }
 0xaf0   : > { %v3952_v60 = vmul.f32 %v5262_v16, %v7247_v51  ;;  %4049 = vst.msk [vmem:[%s6799_s19 + $0x68] sm:$0xff] %vm3333_vm9, %v4033_v8  ;;  %v5264_v17 = vpop.eup %5263 }
 0xaf1   : > { %v3986_v50 = vsel %vm3711_vm11, %v3950_v31, %v7246_v15  ;;  %v5266_v47 = vpop.eup %5265 }
 0xaf2   : > { %v4002_v10 = vsel %vm3971_vm4, %v3708_v0, %v3986_v50  ;;  %v3987_v39 = vsel %vm3711_vm11, %v3952_v60, %v7247_v51 }
 0xaf3   : > { %v4018_v3 = vsel %vm3970_vm5, %v5264_v17, %v4002_v10  ;;  %v4003_v14 = vsel %vm3971_vm4, %v3709_v34, %v3987_v39 }
 0xaf4   : > { %v4034_v49 = vsel %vm3953_vm6, %v3968_v2, %v4018_v3  ;;  %v4019_v7 = vsel %vm3970_vm5, %v5266_v47, %v4003_v14 }
 0xaf5   : > { %4050 = vst.msk [vmem:[%s6799_s19 + $0x70] sm:$0xff] %vm3333_vm9, %v4034_v49  ;;  %v4035_v1 = vsel %vm3953_vm6, %v3969_v56, %v4019_v7 }
 0xaf6   : > { %4051 = vst.msk [vmem:[%s6799_s19 + $0x78] sm:$0xff] %vm3333_vm9, %v4035_v1 }
 0xaf7 PF: > { %s25_s18 = sadd.s32 1, %s5273_s18  }
 0xaf8   : > { %p22_p4 = scmp.ge.s32.totalorder %s25_s18, 4  }
 0xafa   :  { %24 = sbr.rel (!%p22_p4) target bundleno = 1 (0x1), region = 133 }

</bundles_post_ra>
